<compile_context>
chip_gen: v7x
topology: tpu7x:2x2x1
jax: 0.10.0
libtpu: 0.0.40
codegen_flags: <defaults>
</compile_context>

<pallas_src>
import functools

import jax
import jax.numpy as jnp
from jax.experimental import pallas as pl
from jax.experimental.pallas import tpu as pltpu


CPAD = 128  # all activation channel counts are padded to one full lane-width


def _round_up(x, m):
    return (x + m - 1) // m * m


def _fused_model_kernel(H, W,
                        xp_ref,
                        w0_ref, b0_ref, w1_ref, b1_ref,
                        w2_ref, b2_ref, w3_ref, b3_ref,
                        o_ref,
                        pad1_ref, pad2_ref, pad3_ref):
    """stump/body1/body2/head conv(+ReLU) stack for one image, all in VMEM."""

    def matmul_bias_relu(lhs_bf16, w_ref, b_ref):
        acc = jnp.dot(lhs_bf16, w_ref[...], preferred_element_type=jnp.float32)
        return jnp.maximum(acc + b_ref[...], 0.0)           # f32 (H*W, 128)

    def stage(dst_ref, act_f32):
        # Zero only the 1-wide halo; the interior is fully overwritten below.
        # Runs every grid step => per-core safe on v7x (separate scratch per TC).
        Hp, Wp, C = dst_ref.shape
        dst_ref[0:1, :, :] = jnp.zeros((1, Wp, C), dst_ref.dtype)
        dst_ref[Hp - 1:Hp, :, :] = jnp.zeros((1, Wp, C), dst_ref.dtype)
        dst_ref[1:1 + H, 0:1, :] = jnp.zeros((H, 1, C), dst_ref.dtype)
        dst_ref[1:1 + H, Wp - 1:Wp, :] = jnp.zeros((H, 1, C), dst_ref.dtype)
        dst_ref[1:1 + H, 1:1 + W, :] = act_f32.reshape(H, W, C).astype(dst_ref.dtype)

    def conv3x3_relu(pad_ref, w_ref, b_ref):
        # im2col over the 3x3 halo.  With C == 128 every tap is a whole-vreg
        # slab, the concatenate is whole-vreg movement, and K = 9*128 needs no
        # MXU K-masking.  Single MXU dot with f32 accumulation.
        C = pad_ref.shape[-1]
        taps = [pad_ref[kh:kh + H, kw:kw + W, :]
                for kh in range(3) for kw in range(3)]
        patches = jnp.concatenate(taps, axis=-1).reshape(H * W, 9 * C)
        return matmul_bias_relu(patches.astype(jnp.bfloat16), w_ref, b_ref)

    # stump (5x5, pad=2): patch matrix prebuilt on the host -> one 128-K matmul.
    a = matmul_bias_relu(xp_ref[0], w0_ref, b0_ref)          # (H*W, 128)

    stage(pad1_ref, a)
    a = conv3x3_relu(pad1_ref, w1_ref, b1_ref)               # body1
    stage(pad2_ref, a)
    a = conv3x3_relu(pad2_ref, w2_ref, b2_ref)               # body2
    stage(pad3_ref, a)
    a = conv3x3_relu(pad3_ref, w3_ref, b3_ref)               # head

    o_ref[...] = a[None].astype(o_ref.dtype)                 # lane-dense store


def simple_model_pallas(x_patches, kparams, H, W):
    """x_patches: (N, H*W, Kpad) bf16 stump im2col.  Returns (N, H*W, 128) f32."""
    N, HW, Kp = x_patches.shape
    (w0, b0), (w1, b1), (w2, b2), (w3, b3) = kparams
    C = w3.shape[1]                                          # 128

    def const_spec(arr):
        # Constant index_map => each weight/bias is DMA'd into VMEM once and
        # reused across the whole grid.
        nd = arr.ndim
        return pl.BlockSpec(arr.shape, lambda n, _nd=nd: (0,) * _nd)

    kernel = functools.partial(_fused_model_kernel, H, W)

    return pl.pallas_call(
        kernel,
        out_shape=jax.ShapeDtypeStruct((N, HW, C), jnp.float32),
        grid=(N,),
        in_specs=[
            pl.BlockSpec((1, HW, Kp), lambda n: (n, 0, 0)),
            const_spec(w0), const_spec(b0),
            const_spec(w1), const_spec(b1),
            const_spec(w2), const_spec(b2),
            const_spec(w3), const_spec(b3),
        ],
        out_specs=pl.BlockSpec((1, HW, C), lambda n: (n, 0, 0)),
        scratch_shapes=[
            # Padded activation staging, persistent per-core VMEM (~220 KB each).
            pltpu.VMEM((H + 2, W + 2, C), jnp.float32),      # body1 input
            pltpu.VMEM((H + 2, W + 2, C), jnp.float32),      # body2 input
            pltpu.VMEM((H + 2, W + 2, C), jnp.float32),      # head  input
        ],
        compiler_params=pltpu.CompilerParams(
            dimension_semantics=("parallel",)),              # v7x: image per TC
    )(x_patches, w0, b0, w1, b1, w2, b2, w3, b3)


def stump_im2col(x_nhwc, k_pad):
    """(N,H,W,Cin) -> (N, H*W, k_pad) bf16 patch matrix for the 5x5/pad=2 stump."""
    N, H, W, Cin = x_nhwc.shape
    xp = jnp.pad(x_nhwc, ((0, 0), (2, 2), (2, 2), (0, 0)))
    taps = [xp[:, kh:kh + H, kw:kw + W, :]
            for kh in range(5) for kw in range(5)]           # (kh, kw, c) order
    p = jnp.concatenate(taps, axis=-1).reshape(N, H * W, 5 * 5 * Cin)
    if k_pad > 5 * 5 * Cin:
        p = jnp.pad(p, ((0, 0), (0, 0), (0, k_pad - 5 * 5 * Cin)))
    return p.astype(jnp.bfloat16)


def pixel_shuffle_nhwc(x, r):
    # PyTorch PixelShuffle: in[n, c*r*r + i*r + j, h, w] -> out[n, c, h*r+i, w*r+j]
    # In NHWC: (N, H, W, C*r*r) -> (N, H*r, W*r, C).
    N, H, W, Crr = x.shape
    C = Crr // (r * r)
    x = x.reshape(N, H, W, C, r, r)
    x = jnp.transpose(x, (0, 1, 4, 2, 5, 3))
    return x.reshape(N, H * r, W * r, C)


def init_params(key, in_channels, n_classes, upscale_factor):
    # Deterministic synthetic parameters (shapes follow the PyTorch module).
    # TODO(synk): PyTorch uses orthogonal init; plain scaled-normal init here.
    def conv_w(k, kh, kw, cin, cout):
        w = jax.random.normal(k, (cout, cin, kh, kw), jnp.float32)  # OIHW
        w = w * (1.0 / jnp.sqrt(float(cin * kh * kw)))
        return jnp.transpose(w, (2, 3, 1, 0))  # OIHW -> HWIO

    ks = jax.random.split(key, 8)
    head_out = upscale_factor ** 2 * n_classes
    return {
        "stump_w": conv_w(ks[0], 5, 5, in_channels, 64),
        "stump_b": 0.01 * jax.random.normal(ks[1], (64,), jnp.float32),
        "body1_w": conv_w(ks[2], 3, 3, 64, 64),
        "body1_b": 0.01 * jax.random.normal(ks[3], (64,), jnp.float32),
        "body2_w": conv_w(ks[4], 3, 3, 64, 32),
        "body2_b": 0.01 * jax.random.normal(ks[5], (32,), jnp.float32),
        "head_w": conv_w(ks[6], 3, 3, 32, head_out),
        "head_b": 0.01 * jax.random.normal(ks[7], (head_out,), jnp.float32),
    }


def prepare_params(params):
    """HWIO conv params -> kernel-ready bf16 weight matrices / (1,128) f32 biases.

    Every layer's output channels are zero-padded to 128 (lane-dense activations,
    unmasked lane stores); the 3x3 layers' input channels are padded to 128 to
    match, and the stump's contraction dim (5*5*Cin) is padded to 128 to match
    the host-built patch matrix.  Padded rows/columns are zero, so the padded
    activation channels are exactly 0 and the maths is unchanged.
    """
    def prep(w_hwio, b, cin_pad=None, k_pad=None):
        KH, KW, Cin, Cout = w_hwio.shape
        assert Cout <= CPAD
        if cin_pad is not None and cin_pad > Cin:
            w_hwio = jnp.pad(w_hwio, ((0, 0), (0, 0), (0, cin_pad - Cin), (0, 0)))
            Cin = cin_pad
        w2d = w_hwio.reshape(KH * KW * Cin, Cout)     # matches in-kernel tap order
        if k_pad is not None and k_pad > w2d.shape[0]:
            w2d = jnp.pad(w2d, ((0, k_pad - w2d.shape[0]), (0, 0)))
        w2d = jnp.pad(w2d, ((0, 0), (0, CPAD - Cout)))
        b2d = jnp.pad(b, (0, CPAD - Cout)).reshape(1, CPAD).astype(jnp.float32)
        return w2d.astype(jnp.bfloat16), b2d

    kh, kw, cin, _ = params["stump_w"].shape
    k_stump = _round_up(kh * kw * cin, 128)
    return (prep(params["stump_w"], params["stump_b"], k_pad=k_stump),
            prep(params["body1_w"], params["body1_b"], cin_pad=CPAD),
            prep(params["body2_w"], params["body2_b"], cin_pad=CPAD),
            prep(params["head_w"], params["head_b"], cin_pad=CPAD))


@functools.partial(jax.jit, static_argnames=("n_classes", "upscale_factor"))
def simple_model_forward(x_nchw, kparams, *, n_classes, upscale_factor):
    N, _, H, W = x_nchw.shape
    head_cout = upscale_factor ** 2 * n_classes
    x = jnp.transpose(x_nchw, (0, 2, 3, 1))                  # NCHW -> NHWC (glue)
    k_pad = kparams[0][0].shape[0]                           # stump K (padded)
    xp = stump_im2col(x, k_pad)                              # (N, H*W, Kp) bf16
    y = simple_model_pallas(xp, kparams, H, W)               # (N, H*W, 128) f32
    y = y[:, :, :head_cout].reshape(N, H, W, head_cout)      # drop channel pad
    y = pixel_shuffle_nhwc(y, upscale_factor)                # (N, H*r, W*r, C)
    # Final ReLU after PixelShuffle is a no-op: values are already >= 0 in-kernel.
    return jnp.transpose(y, (0, 3, 1, 2))                    # NHWC -> NCHW


def reference_forward(x_nchw, params, upscale_factor):
    """Pure-XLA f32 reference for correctness checking."""
    x = jnp.transpose(x_nchw, (0, 2, 3, 1))

    def conv(x, w, b, pad):
        y = jax.lax.conv_general_dilated(
            x, w, window_strides=(1, 1), padding=[(pad, pad), (pad, pad)],
            dimension_numbers=("NHWC", "HWIO", "NHWC"))
        return jnp.maximum(y + b, 0.0)

    x = conv(x, params["stump_w"], params["stump_b"], 2)
    x = conv(x, params["body1_w"], params["body1_b"], 1)
    x = conv(x, params["body2_w"], params["body2_b"], 1)
    x = conv(x, params["head_w"], params["head_b"], 1)
    x = pixel_shuffle_nhwc(x, upscale_factor)
    x = jnp.maximum(x, 0.0)
    return jnp.transpose(x, (0, 3, 1, 2))


if __name__ == "__main__":
    in_channels, n_classes, upscale_factor = 4, 3, 4
    N, H, W = 2, 16, 16

    key = jax.random.PRNGKey(0)
    k_x, k_p = jax.random.split(key)
    x = jax.random.normal(k_x, (N, in_channels, H, W), jnp.float32)
    params = init_params(k_p, in_channels, n_classes, upscale_factor)
    kparams = prepare_params(params)

    out = simple_model_forward(x, kparams, n_classes=n_classes,
                               upscale_factor=upscale_factor)
    out = jax.block_until_ready(out)

    expected_shape = (N, n_classes, H * upscale_factor, W * upscale_factor)
    assert out.shape == expected_shape, (out.shape, expected_shape)
    assert bool(jnp.all(out >= 0.0))                         # ReLU semantics

    # Numerical sanity check vs. the pure-XLA f32 reference (kernel uses bf16 MXU
    # inputs with f32 accumulation over 4 layers, so allow a loose tolerance).
    ref = reference_forward(x, params, upscale_factor)
    max_err = float(jnp.max(jnp.abs(out - ref)))
    assert max_err < 0.25, max_err

    print("KERNEL_OK")
</pallas_src>

<mosaic_0001>
module attributes {stable_mosaic.version = 11 : i64} {
  func.func @_fused_model_kernel(%arg0: i32, %arg1: memref<1x256x128xbf16, #tpu.memory_space<vmem>>, %arg2: memref<128x128xbf16, #tpu.memory_space<vmem>>, %arg3: memref<1x128xf32, #tpu.memory_space<vmem>>, %arg4: memref<1152x128xbf16, #tpu.memory_space<vmem>>, %arg5: memref<1x128xf32, #tpu.memory_space<vmem>>, %arg6: memref<1152x128xbf16, #tpu.memory_space<vmem>>, %arg7: memref<1x128xf32, #tpu.memory_space<vmem>>, %arg8: memref<1152x128xbf16, #tpu.memory_space<vmem>>, %arg9: memref<1x128xf32, #tpu.memory_space<vmem>>, %arg10: memref<1x256x128xf32, #tpu.memory_space<vmem>>, %arg11: memref<18x18x128xf32, #tpu.memory_space<vmem>>, %arg12: memref<18x18x128xf32, #tpu.memory_space<vmem>>, %arg13: memref<18x18x128xf32, #tpu.memory_space<vmem>>) attributes {dimension_semantics = [#tpu.dimension_semantics<parallel>], iteration_bounds = array<i64: 2>, scalar_prefetch = 0 : i64, scratch_operands = 3 : i64, tpu.core_type = #tpu.core_type<tc>, window_params = [{transform_indices = @transform_0, window_bounds = array<i64: 1, 256, 128>}, {pipeline_mode = #tpu.pipeline_mode<synchronous>, transform_indices = @transform_1, window_bounds = array<i64: 128, 128>}, {pipeline_mode = #tpu.pipeline_mode<synchronous>, transform_indices = @transform_2, window_bounds = array<i64: 1, 128>}, {pipeline_mode = #tpu.pipeline_mode<synchronous>, transform_indices = @transform_3, window_bounds = array<i64: 1152, 128>}, {pipeline_mode = #tpu.pipeline_mode<synchronous>, transform_indices = @transform_4, window_bounds = array<i64: 1, 128>}, {pipeline_mode = #tpu.pipeline_mode<synchronous>, transform_indices = @transform_5, window_bounds = array<i64: 1152, 128>}, {pipeline_mode = #tpu.pipeline_mode<synchronous>, transform_indices = @transform_6, window_bounds = array<i64: 1, 128>}, {pipeline_mode = #tpu.pipeline_mode<synchronous>, transform_indices = @transform_7, window_bounds = array<i64: 1152, 128>}, {pipeline_mode = #tpu.pipeline_mode<synchronous>, transform_indices = @transform_8, window_bounds = array<i64: 1, 128>}, {transform_indices = @transform_9, window_bounds = array<i64: 1, 256, 128>}]} {
    %c0 = arith.constant 0 : index
    %c0_0 = arith.constant 0 : index
    %c0_1 = arith.constant 0 : index
    %0 = vector.load %arg1[%c0, %c0_0, %c0_1] : memref<1x256x128xbf16, #tpu.memory_space<vmem>>, vector<1x256x128xbf16>
    %1 = vector.shape_cast %0 : vector<1x256x128xbf16> to vector<256x128xbf16>
    %c0_2 = arith.constant 0 : index
    %c0_3 = arith.constant 0 : index
    %2 = vector.load %arg2[%c0_2, %c0_3] : memref<128x128xbf16, #tpu.memory_space<vmem>>, vector<128x128xbf16>
    %cst = arith.constant dense<0.000000e+00> : vector<256x128xf32>
    %3 = tpu.matmul %1, %2, %cst {dimension_numbers = #tpu.dot_dimension_numbers<[1], [0], [0], [1], [0, 0, 1, 1], [], []>} : vector<256x128xbf16>, vector<128x128xbf16>, vector<256x128xf32> -> vector<256x128xf32>
    %c0_4 = arith.constant 0 : index
    %c0_5 = arith.constant 0 : index
    %4 = vector.load %arg3[%c0_4, %c0_5] : memref<1x128xf32, #tpu.memory_space<vmem>>, vector<1x128xf32>
    %5 = vector.broadcast %4 : vector<1x128xf32> to vector<256x128xf32>
    %6 = arith.addf %3, %5 : vector<256x128xf32>
    %cst_6 = arith.constant 0.000000e+00 : f32
    %7 = vector.broadcast %cst_6 : f32 to vector<256x128xf32>
    %8 = arith.maximumf %6, %7 : vector<256x128xf32>
    %cst_7 = arith.constant 0.000000e+00 : f32
    %9 = vector.broadcast %cst_7 : f32 to vector<1x18x128xf32>
    %c0_8 = arith.constant 0 : index
    %c0_9 = arith.constant 0 : index
    %c0_10 = arith.constant 0 : index
    %10 = vector.load %arg11[%c0_8, %c0_9, %c0_10] : memref<18x18x128xf32, #tpu.memory_space<vmem>>, vector<1x18x128xf32>
    tpu.vector_store %arg11[%c0_8, %c0_9, %c0_10], %9 {strides = array<i32>} : memref<18x18x128xf32, #tpu.memory_space<vmem>>, vector<1x18x128xf32>,
    %cst_11 = arith.constant 0.000000e+00 : f32
    %11 = vector.broadcast %cst_11 : f32 to vector<1x18x128xf32>
    %c17 = arith.constant 17 : index
    %c0_12 = arith.constant 0 : index
    %c0_13 = arith.constant 0 : index
    %12 = vector.load %arg11[%c17, %c0_12, %c0_13] : memref<18x18x128xf32, #tpu.memory_space<vmem>>, vector<1x18x128xf32>
    tpu.vector_store %arg11[%c17, %c0_12, %c0_13], %11 {strides = array<i32>} : memref<18x18x128xf32, #tpu.memory_space<vmem>>, vector<1x18x128xf32>,
    %cst_14 = arith.constant 0.000000e+00 : f32
    %13 = vector.broadcast %cst_14 : f32 to vector<16x1x128xf32>
    %c1 = arith.constant 1 : index
    %c0_15 = arith.constant 0 : index
    %c0_16 = arith.constant 0 : index
    %14 = vector.load %arg11[%c1, %c0_15, %c0_16] : memref<18x18x128xf32, #tpu.memory_space<vmem>>, vector<16x1x128xf32>
    tpu.vector_store %arg11[%c1, %c0_15, %c0_16], %13 {strides = array<i32>} : memref<18x18x128xf32, #tpu.memory_space<vmem>>, vector<16x1x128xf32>,
    %cst_17 = arith.constant 0.000000e+00 : f32
    %15 = vector.broadcast %cst_17 : f32 to vector<16x1x128xf32>
    %c1_18 = arith.constant 1 : index
    %c17_19 = arith.constant 17 : index
    %c0_20 = arith.constant 0 : index
    %16 = vector.load %arg11[%c1_18, %c17_19, %c0_20] : memref<18x18x128xf32, #tpu.memory_space<vmem>>, vector<16x1x128xf32>
    tpu.vector_store %arg11[%c1_18, %c17_19, %c0_20], %15 {strides = array<i32>} : memref<18x18x128xf32, #tpu.memory_space<vmem>>, vector<16x1x128xf32>,
    %17 = vector.shape_cast %8 : vector<256x128xf32> to vector<16x16x128xf32>
    %c1_21 = arith.constant 1 : index
    %c1_22 = arith.constant 1 : index
    %c0_23 = arith.constant 0 : index
    %18 = vector.load %arg11[%c1_21, %c1_22, %c0_23] : memref<18x18x128xf32, #tpu.memory_space<vmem>>, vector<16x16x128xf32>
    tpu.vector_store %arg11[%c1_21, %c1_22, %c0_23], %17 {strides = array<i32>} : memref<18x18x128xf32, #tpu.memory_space<vmem>>, vector<16x16x128xf32>,
    %c0_24 = arith.constant 0 : index
    %c0_25 = arith.constant 0 : index
    %c0_26 = arith.constant 0 : index
    %19 = vector.load %arg11[%c0_24, %c0_25, %c0_26] : memref<18x18x128xf32, #tpu.memory_space<vmem>>, vector<16x16x128xf32>
    %c0_27 = arith.constant 0 : index
    %c1_28 = arith.constant 1 : index
    %c0_29 = arith.constant 0 : index
    %20 = vector.load %arg11[%c0_27, %c1_28, %c0_29] : memref<18x18x128xf32, #tpu.memory_space<vmem>>, vector<16x16x128xf32>
    %c0_30 = arith.constant 0 : index
    %c2 = arith.constant 2 : index
    %c0_31 = arith.constant 0 : index
    %21 = vector.load %arg11[%c0_30, %c2, %c0_31] : memref<18x18x128xf32, #tpu.memory_space<vmem>>, vector<16x16x128xf32>
    %c1_32 = arith.constant 1 : index
    %c0_33 = arith.constant 0 : index
    %c0_34 = arith.constant 0 : index
    %22 = vector.load %arg11[%c1_32, %c0_33, %c0_34] : memref<18x18x128xf32, #tpu.memory_space<vmem>>, vector<16x16x128xf32>
    %c1_35 = arith.constant 1 : index
    %c1_36 = arith.constant 1 : index
    %c0_37 = arith.constant 0 : index
    %23 = vector.load %arg11[%c1_35, %c1_36, %c0_37] : memref<18x18x128xf32, #tpu.memory_space<vmem>>, vector<16x16x128xf32>
    %c1_38 = arith.constant 1 : index
    %c2_39 = arith.constant 2 : index
    %c0_40 = arith.constant 0 : index
    %24 = vector.load %arg11[%c1_38, %c2_39, %c0_40] : memref<18x18x128xf32, #tpu.memory_space<vmem>>, vector<16x16x128xf32>
    %c2_41 = arith.constant 2 : index
    %c0_42 = arith.constant 0 : index
    %c0_43 = arith.constant 0 : index
    %25 = vector.load %arg11[%c2_41, %c0_42, %c0_43] : memref<18x18x128xf32, #tpu.memory_space<vmem>>, vector<16x16x128xf32>
    %c2_44 = arith.constant 2 : index
    %c1_45 = arith.constant 1 : index
    %c0_46 = arith.constant 0 : index
    %26 = vector.load %arg11[%c2_44, %c1_45, %c0_46] : memref<18x18x128xf32, #tpu.memory_space<vmem>>, vector<16x16x128xf32>
    %c2_47 = arith.constant 2 : index
    %c2_48 = arith.constant 2 : index
    %c0_49 = arith.constant 0 : index
    %27 = vector.load %arg11[%c2_47, %c2_48, %c0_49] : memref<18x18x128xf32, #tpu.memory_space<vmem>>, vector<16x16x128xf32>
    %28 = tpu.concatenate %19, %20, %21, %22, %23, %24, %25, %26, %27 in 2 : vector<16x16x128xf32>, vector<16x16x128xf32>, vector<16x16x128xf32>, vector<16x16x128xf32>, vector<16x16x128xf32>, vector<16x16x128xf32>, vector<16x16x128xf32>, vector<16x16x128xf32>, vector<16x16x128xf32> -> vector<16x16x1152xf32>
    %29 = vector.shape_cast %28 : vector<16x16x1152xf32> to vector<256x1152xf32>
    %30 = arith.truncf %29 : vector<256x1152xf32> to vector<256x1152xbf16>
    %c0_50 = arith.constant 0 : index
    %c0_51 = arith.constant 0 : index
    %31 = vector.load %arg4[%c0_50, %c0_51] : memref<1152x128xbf16, #tpu.memory_space<vmem>>, vector<1152x128xbf16>
    %cst_52 = arith.constant dense<0.000000e+00> : vector<256x128xf32>
    %32 = tpu.matmul %30, %31, %cst_52 {dimension_numbers = #tpu.dot_dimension_numbers<[1], [0], [0], [1], [0, 0, 1, 1], [], []>} : vector<256x1152xbf16>, vector<1152x128xbf16>, vector<256x128xf32> -> vector<256x128xf32>
    %c0_53 = arith.constant 0 : index
    %c0_54 = arith.constant 0 : index
    %33 = vector.load %arg5[%c0_53, %c0_54] : memref<1x128xf32, #tpu.memory_space<vmem>>, vector<1x128xf32>
    %34 = vector.broadcast %33 : vector<1x128xf32> to vector<256x128xf32>
    %35 = arith.addf %32, %34 : vector<256x128xf32>
    %cst_55 = arith.constant 0.000000e+00 : f32
    %36 = vector.broadcast %cst_55 : f32 to vector<256x128xf32>
    %37 = arith.maximumf %35, %36 : vector<256x128xf32>
    %cst_56 = arith.constant 0.000000e+00 : f32
    %38 = vector.broadcast %cst_56 : f32 to vector<1x18x128xf32>
    %c0_57 = arith.constant 0 : index
    %c0_58 = arith.constant 0 : index
    %c0_59 = arith.constant 0 : index
    %39 = vector.load %arg12[%c0_57, %c0_58, %c0_59] : memref<18x18x128xf32, #tpu.memory_space<vmem>>, vector<1x18x128xf32>
    tpu.vector_store %arg12[%c0_57, %c0_58, %c0_59], %38 {strides = array<i32>} : memref<18x18x128xf32, #tpu.memory_space<vmem>>, vector<1x18x128xf32>,
    %cst_60 = arith.constant 0.000000e+00 : f32
    %40 = vector.broadcast %cst_60 : f32 to vector<1x18x128xf32>
    %c17_61 = arith.constant 17 : index
    %c0_62 = arith.constant 0 : index
    %c0_63 = arith.constant 0 : index
    %41 = vector.load %arg12[%c17_61, %c0_62, %c0_63] : memref<18x18x128xf32, #tpu.memory_space<vmem>>, vector<1x18x128xf32>
    tpu.vector_store %arg12[%c17_61, %c0_62, %c0_63], %40 {strides = array<i32>} : memref<18x18x128xf32, #tpu.memory_space<vmem>>, vector<1x18x128xf32>,
    %cst_64 = arith.constant 0.000000e+00 : f32
    %42 = vector.broadcast %cst_64 : f32 to vector<16x1x128xf32>
    %c1_65 = arith.constant 1 : index
    %c0_66 = arith.constant 0 : index
    %c0_67 = arith.constant 0 : index
    %43 = vector.load %arg12[%c1_65, %c0_66, %c0_67] : memref<18x18x128xf32, #tpu.memory_space<vmem>>, vector<16x1x128xf32>
    tpu.vector_store %arg12[%c1_65, %c0_66, %c0_67], %42 {strides = array<i32>} : memref<18x18x128xf32, #tpu.memory_space<vmem>>, vector<16x1x128xf32>,
    %cst_68 = arith.constant 0.000000e+00 : f32
    %44 = vector.broadcast %cst_68 : f32 to vector<16x1x128xf32>
    %c1_69 = arith.constant 1 : index
    %c17_70 = arith.constant 17 : index
    %c0_71 = arith.constant 0 : index
    %45 = vector.load %arg12[%c1_69, %c17_70, %c0_71] : memref<18x18x128xf32, #tpu.memory_space<vmem>>, vector<16x1x128xf32>
    tpu.vector_store %arg12[%c1_69, %c17_70, %c0_71], %44 {strides = array<i32>} : memref<18x18x128xf32, #tpu.memory_space<vmem>>, vector<16x1x128xf32>,
    %46 = vector.shape_cast %37 : vector<256x128xf32> to vector<16x16x128xf32>
    %c1_72 = arith.constant 1 : index
    %c1_73 = arith.constant 1 : index
    %c0_74 = arith.constant 0 : index
    %47 = vector.load %arg12[%c1_72, %c1_73, %c0_74] : memref<18x18x128xf32, #tpu.memory_space<vmem>>, vector<16x16x128xf32>
    tpu.vector_store %arg12[%c1_72, %c1_73, %c0_74], %46 {strides = array<i32>} : memref<18x18x128xf32, #tpu.memory_space<vmem>>, vector<16x16x128xf32>,
    %c0_75 = arith.constant 0 : index
    %c0_76 = arith.constant 0 : index
    %c0_77 = arith.constant 0 : index
    %48 = vector.load %arg12[%c0_75, %c0_76, %c0_77] : memref<18x18x128xf32, #tpu.memory_space<vmem>>, vector<16x16x128xf32>
    %c0_78 = arith.constant 0 : index
    %c1_79 = arith.constant 1 : index
    %c0_80 = arith.constant 0 : index
    %49 = vector.load %arg12[%c0_78, %c1_79, %c0_80] : memref<18x18x128xf32, #tpu.memory_space<vmem>>, vector<16x16x128xf32>
    %c0_81 = arith.constant 0 : index
    %c2_82 = arith.constant 2 : index
    %c0_83 = arith.constant 0 : index
    %50 = vector.load %arg12[%c0_81, %c2_82, %c0_83] : memref<18x18x128xf32, #tpu.memory_space<vmem>>, vector<16x16x128xf32>
    %c1_84 = arith.constant 1 : index
    %c0_85 = arith.constant 0 : index
    %c0_86 = arith.constant 0 : index
    %51 = vector.load %arg12[%c1_84, %c0_85, %c0_86] : memref<18x18x128xf32, #tpu.memory_space<vmem>>, vector<16x16x128xf32>
    %c1_87 = arith.constant 1 : index
    %c1_88 = arith.constant 1 : index
    %c0_89 = arith.constant 0 : index
    %52 = vector.load %arg12[%c1_87, %c1_88, %c0_89] : memref<18x18x128xf32, #tpu.memory_space<vmem>>, vector<16x16x128xf32>
    %c1_90 = arith.constant 1 : index
    %c2_91 = arith.constant 2 : index
    %c0_92 = arith.constant 0 : index
    %53 = vector.load %arg12[%c1_90, %c2_91, %c0_92] : memref<18x18x128xf32, #tpu.memory_space<vmem>>, vector<16x16x128xf32>
    %c2_93 = arith.constant 2 : index
    %c0_94 = arith.constant 0 : index
    %c0_95 = arith.constant 0 : index
    %54 = vector.load %arg12[%c2_93, %c0_94, %c0_95] : memref<18x18x128xf32, #tpu.memory_space<vmem>>, vector<16x16x128xf32>
    %c2_96 = arith.constant 2 : index
    %c1_97 = arith.constant 1 : index
    %c0_98 = arith.constant 0 : index
    %55 = vector.load %arg12[%c2_96, %c1_97, %c0_98] : memref<18x18x128xf32, #tpu.memory_space<vmem>>, vector<16x16x128xf32>
    %c2_99 = arith.constant 2 : index
    %c2_100 = arith.constant 2 : index
    %c0_101 = arith.constant 0 : index
    %56 = vector.load %arg12[%c2_99, %c2_100, %c0_101] : memref<18x18x128xf32, #tpu.memory_space<vmem>>, vector<16x16x128xf32>
    %57 = tpu.concatenate %48, %49, %50, %51, %52, %53, %54, %55, %56 in 2 : vector<16x16x128xf32>, vector<16x16x128xf32>, vector<16x16x128xf32>, vector<16x16x128xf32>, vector<16x16x128xf32>, vector<16x16x128xf32>, vector<16x16x128xf32>, vector<16x16x128xf32>, vector<16x16x128xf32> -> vector<16x16x1152xf32>
    %58 = vector.shape_cast %57 : vector<16x16x1152xf32> to vector<256x1152xf32>
    %59 = arith.truncf %58 : vector<256x1152xf32> to vector<256x1152xbf16>
    %c0_102 = arith.constant 0 : index
    %c0_103 = arith.constant 0 : index
    %60 = vector.load %arg6[%c0_102, %c0_103] : memref<1152x128xbf16, #tpu.memory_space<vmem>>, vector<1152x128xbf16>
    %cst_104 = arith.constant dense<0.000000e+00> : vector<256x128xf32>
    %61 = tpu.matmul %59, %60, %cst_104 {dimension_numbers = #tpu.dot_dimension_numbers<[1], [0], [0], [1], [0, 0, 1, 1], [], []>} : vector<256x1152xbf16>, vector<1152x128xbf16>, vector<256x128xf32> -> vector<256x128xf32>
    %c0_105 = arith.constant 0 : index
    %c0_106 = arith.constant 0 : index
    %62 = vector.load %arg7[%c0_105, %c0_106] : memref<1x128xf32, #tpu.memory_space<vmem>>, vector<1x128xf32>
    %63 = vector.broadcast %62 : vector<1x128xf32> to vector<256x128xf32>
    %64 = arith.addf %61, %63 : vector<256x128xf32>
    %cst_107 = arith.constant 0.000000e+00 : f32
    %65 = vector.broadcast %cst_107 : f32 to vector<256x128xf32>
    %66 = arith.maximumf %64, %65 : vector<256x128xf32>
    %cst_108 = arith.constant 0.000000e+00 : f32
    %67 = vector.broadcast %cst_108 : f32 to vector<1x18x128xf32>
    %c0_109 = arith.constant 0 : index
    %c0_110 = arith.constant 0 : index
    %c0_111 = arith.constant 0 : index
    %68 = vector.load %arg13[%c0_109, %c0_110, %c0_111] : memref<18x18x128xf32, #tpu.memory_space<vmem>>, vector<1x18x128xf32>
    tpu.vector_store %arg13[%c0_109, %c0_110, %c0_111], %67 {strides = array<i32>} : memref<18x18x128xf32, #tpu.memory_space<vmem>>, vector<1x18x128xf32>,
    %cst_112 = arith.constant 0.000000e+00 : f32
    %69 = vector.broadcast %cst_112 : f32 to vector<1x18x128xf32>
    %c17_113 = arith.constant 17 : index
    %c0_114 = arith.constant 0 : index
    %c0_115 = arith.constant 0 : index
    %70 = vector.load %arg13[%c17_113, %c0_114, %c0_115] : memref<18x18x128xf32, #tpu.memory_space<vmem>>, vector<1x18x128xf32>
    tpu.vector_store %arg13[%c17_113, %c0_114, %c0_115], %69 {strides = array<i32>} : memref<18x18x128xf32, #tpu.memory_space<vmem>>, vector<1x18x128xf32>,
    %cst_116 = arith.constant 0.000000e+00 : f32
    %71 = vector.broadcast %cst_116 : f32 to vector<16x1x128xf32>
    %c1_117 = arith.constant 1 : index
    %c0_118 = arith.constant 0 : index
    %c0_119 = arith.constant 0 : index
    %72 = vector.load %arg13[%c1_117, %c0_118, %c0_119] : memref<18x18x128xf32, #tpu.memory_space<vmem>>, vector<16x1x128xf32>
    tpu.vector_store %arg13[%c1_117, %c0_118, %c0_119], %71 {strides = array<i32>} : memref<18x18x128xf32, #tpu.memory_space<vmem>>, vector<16x1x128xf32>,
    %cst_120 = arith.constant 0.000000e+00 : f32
    %73 = vector.broadcast %cst_120 : f32 to vector<16x1x128xf32>
    %c1_121 = arith.constant 1 : index
    %c17_122 = arith.constant 17 : index
    %c0_123 = arith.constant 0 : index
    %74 = vector.load %arg13[%c1_121, %c17_122, %c0_123] : memref<18x18x128xf32, #tpu.memory_space<vmem>>, vector<16x1x128xf32>
    tpu.vector_store %arg13[%c1_121, %c17_122, %c0_123], %73 {strides = array<i32>} : memref<18x18x128xf32, #tpu.memory_space<vmem>>, vector<16x1x128xf32>,
    %75 = vector.shape_cast %66 : vector<256x128xf32> to vector<16x16x128xf32>
    %c1_124 = arith.constant 1 : index
    %c1_125 = arith.constant 1 : index
    %c0_126 = arith.constant 0 : index
    %76 = vector.load %arg13[%c1_124, %c1_125, %c0_126] : memref<18x18x128xf32, #tpu.memory_space<vmem>>, vector<16x16x128xf32>
    tpu.vector_store %arg13[%c1_124, %c1_125, %c0_126], %75 {strides = array<i32>} : memref<18x18x128xf32, #tpu.memory_space<vmem>>, vector<16x16x128xf32>,
    %c0_127 = arith.constant 0 : index
    %c0_128 = arith.constant 0 : index
    %c0_129 = arith.constant 0 : index
    %77 = vector.load %arg13[%c0_127, %c0_128, %c0_129] : memref<18x18x128xf32, #tpu.memory_space<vmem>>, vector<16x16x128xf32>
    %c0_130 = arith.constant 0 : index
    %c1_131 = arith.constant 1 : index
    %c0_132 = arith.constant 0 : index
    %78 = vector.load %arg13[%c0_130, %c1_131, %c0_132] : memref<18x18x128xf32, #tpu.memory_space<vmem>>, vector<16x16x128xf32>
    %c0_133 = arith.constant 0 : index
    %c2_134 = arith.constant 2 : index
    %c0_135 = arith.constant 0 : index
    %79 = vector.load %arg13[%c0_133, %c2_134, %c0_135] : memref<18x18x128xf32, #tpu.memory_space<vmem>>, vector<16x16x128xf32>
    %c1_136 = arith.constant 1 : index
    %c0_137 = arith.constant 0 : index
    %c0_138 = arith.constant 0 : index
    %80 = vector.load %arg13[%c1_136, %c0_137, %c0_138] : memref<18x18x128xf32, #tpu.memory_space<vmem>>, vector<16x16x128xf32>
    %c1_139 = arith.constant 1 : index
    %c1_140 = arith.constant 1 : index
    %c0_141 = arith.constant 0 : index
    %81 = vector.load %arg13[%c1_139, %c1_140, %c0_141] : memref<18x18x128xf32, #tpu.memory_space<vmem>>, vector<16x16x128xf32>
    %c1_142 = arith.constant 1 : index
    %c2_143 = arith.constant 2 : index
    %c0_144 = arith.constant 0 : index
    %82 = vector.load %arg13[%c1_142, %c2_143, %c0_144] : memref<18x18x128xf32, #tpu.memory_space<vmem>>, vector<16x16x128xf32>
    %c2_145 = arith.constant 2 : index
    %c0_146 = arith.constant 0 : index
    %c0_147 = arith.constant 0 : index
    %83 = vector.load %arg13[%c2_145, %c0_146, %c0_147] : memref<18x18x128xf32, #tpu.memory_space<vmem>>, vector<16x16x128xf32>
    %c2_148 = arith.constant 2 : index
    %c1_149 = arith.constant 1 : index
    %c0_150 = arith.constant 0 : index
    %84 = vector.load %arg13[%c2_148, %c1_149, %c0_150] : memref<18x18x128xf32, #tpu.memory_space<vmem>>, vector<16x16x128xf32>
    %c2_151 = arith.constant 2 : index
    %c2_152 = arith.constant 2 : index
    %c0_153 = arith.constant 0 : index
    %85 = vector.load %arg13[%c2_151, %c2_152, %c0_153] : memref<18x18x128xf32, #tpu.memory_space<vmem>>, vector<16x16x128xf32>
    %86 = tpu.concatenate %77, %78, %79, %80, %81, %82, %83, %84, %85 in 2 : vector<16x16x128xf32>, vector<16x16x128xf32>, vector<16x16x128xf32>, vector<16x16x128xf32>, vector<16x16x128xf32>, vector<16x16x128xf32>, vector<16x16x128xf32>, vector<16x16x128xf32>, vector<16x16x128xf32> -> vector<16x16x1152xf32>
    %87 = vector.shape_cast %86 : vector<16x16x1152xf32> to vector<256x1152xf32>
    %88 = arith.truncf %87 : vector<256x1152xf32> to vector<256x1152xbf16>
    %c0_154 = arith.constant 0 : index
    %c0_155 = arith.constant 0 : index
    %89 = vector.load %arg8[%c0_154, %c0_155] : memref<1152x128xbf16, #tpu.memory_space<vmem>>, vector<1152x128xbf16>
    %cst_156 = arith.constant dense<0.000000e+00> : vector<256x128xf32>
    %90 = tpu.matmul %88, %89, %cst_156 {dimension_numbers = #tpu.dot_dimension_numbers<[1], [0], [0], [1], [0, 0, 1, 1], [], []>} : vector<256x1152xbf16>, vector<1152x128xbf16>, vector<256x128xf32> -> vector<256x128xf32>
    %c0_157 = arith.constant 0 : index
    %c0_158 = arith.constant 0 : index
    %91 = vector.load %arg9[%c0_157, %c0_158] : memref<1x128xf32, #tpu.memory_space<vmem>>, vector<1x128xf32>
    %92 = vector.broadcast %91 : vector<1x128xf32> to vector<256x128xf32>
    %93 = arith.addf %90, %92 : vector<256x128xf32>
    %cst_159 = arith.constant 0.000000e+00 : f32
    %94 = vector.broadcast %cst_159 : f32 to vector<256x128xf32>
    %95 = arith.maximumf %93, %94 : vector<256x128xf32>
    %96 = vector.shape_cast %95 : vector<256x128xf32> to vector<1x256x128xf32>
    %c0_160 = arith.constant 0 : index
    %c0_161 = arith.constant 0 : index
    %c0_162 = arith.constant 0 : index
    %97 = vector.load %arg10[%c0_160, %c0_161, %c0_162] : memref<1x256x128xf32, #tpu.memory_space<vmem>>, vector<1x256x128xf32>
    tpu.vector_store %arg10[%c0_160, %c0_161, %c0_162], %96 {strides = array<i32>} : memref<1x256x128xf32, #tpu.memory_space<vmem>>, vector<1x256x128xf32>,
    return
  }
  func.func @transform_0(%arg0: i32) -> (i32, i32, i32) {
    %c0_i32 = arith.constant 0 : i32
    %c0_i32_0 = arith.constant 0 : i32
    %c0_i32_1 = arith.constant 0 : i32
    return %arg0, %c0_i32, %c0_i32_0 : i32, i32, i32
  }
  func.func @transform_1(%arg0: i32) -> (i32, i32) {
    %c0_i32 = arith.constant 0 : i32
    %c0_i32_0 = arith.constant 0 : i32
    %c0_i32_1 = arith.constant 0 : i32
    return %c0_i32, %c0_i32_0 : i32, i32
  }
  func.func @transform_2(%arg0: i32) -> (i32, i32) {
    %c0_i32 = arith.constant 0 : i32
    %c0_i32_0 = arith.constant 0 : i32
    %c0_i32_1 = arith.constant 0 : i32
    return %c0_i32, %c0_i32_0 : i32, i32
  }
  func.func @transform_3(%arg0: i32) -> (i32, i32) {
    %c0_i32 = arith.constant 0 : i32
    %c0_i32_0 = arith.constant 0 : i32
    %c0_i32_1 = arith.constant 0 : i32
    return %c0_i32, %c0_i32_0 : i32, i32
  }
  func.func @transform_4(%arg0: i32) -> (i32, i32) {
    %c0_i32 = arith.constant 0 : i32
    %c0_i32_0 = arith.constant 0 : i32
    %c0_i32_1 = arith.constant 0 : i32
    return %c0_i32, %c0_i32_0 : i32, i32
  }
  func.func @transform_5(%arg0: i32) -> (i32, i32) {
    %c0_i32 = arith.constant 0 : i32
    %c0_i32_0 = arith.constant 0 : i32
    %c0_i32_1 = arith.constant 0 : i32
    return %c0_i32, %c0_i32_0 : i32, i32
  }
  func.func @transform_6(%arg0: i32) -> (i32, i32) {
    %c0_i32 = arith.constant 0 : i32
    %c0_i32_0 = arith.constant 0 : i32
    %c0_i32_1 = arith.constant 0 : i32
    return %c0_i32, %c0_i32_0 : i32, i32
  }
  func.func @transform_7(%arg0: i32) -> (i32, i32) {
    %c0_i32 = arith.constant 0 : i32
    %c0_i32_0 = arith.constant 0 : i32
    %c0_i32_1 = arith.constant 0 : i32
    return %c0_i32, %c0_i32_0 : i32, i32
  }
  func.func @transform_8(%arg0: i32) -> (i32, i32) {
    %c0_i32 = arith.constant 0 : i32
    %c0_i32_0 = arith.constant 0 : i32
    %c0_i32_1 = arith.constant 0 : i32
    return %c0_i32, %c0_i32_0 : i32, i32
  }
  func.func @transform_9(%arg0: i32) -> (i32, i32, i32) {
    %c0_i32 = arith.constant 0 : i32
    %c0_i32_0 = arith.constant 0 : i32
    %c0_i32_1 = arith.constant 0 : i32
    return %arg0, %c0_i32, %c0_i32_0 : i32, i32, i32
  }
}

</mosaic_0001>

<bundles_post_ra>
// kernel: simple_model_forward.1
= control target key start
LH: loop header
LB: loop body
LE: loop exit
PB: predicated region body
PF: predicated region fallthrough
CT: control target
= control target key end

     0   :  { %s8789_s30 = smov 0   ;;  %s10971_s0 = inlined_call_operand.vmem [shape: bf16[2,256,128], index: 0, kind: input, shape index: {}]   ;;  %s10972_s1 = inlined_call_operand.vmem [shape: bf16[128,128], index: 1, kind: input, shape index: {}]   ;;  %s10973_s2 = inlined_call_operand.vmem [shape: f32[1,128], index: 2, kind: input, shape index: {}]   ;;  %s10974_s3 = inlined_call_operand.vmem [shape: bf16[1152,128], index: 3, kind: input, shape index: {}]   ;;  %s10975_s4 = inlined_call_operand.vmem [shape: f32[1,128], index: 4, kind: input, shape index: {}]   ;;  %s10976_s5 = inlined_call_operand.vmem [shape: bf16[1152,128], index: 5, kind: input, shape index: {}]   ;;  %s10977_s6 = inlined_call_operand.vmem [shape: f32[1,128], index: 6, kind: input, shape index: {}]   ;;  %s10978_s7 = inlined_call_operand.vmem [shape: bf16[1152,128], index: 7, kind: input, shape index: {}]   ;;  %s10979_s8 = inlined_call_operand.vmem [shape: f32[1,128], index: 8, kind: input, shape index: {}]   ;;  %s10980_s9 = inlined_call_operand.vmem [shape: f32[2,256,128], index: 9, kind: output, shape index: {}]  }
   0x1 LB: > { %s6588_s10 = sadd.s32 4294967295, %s8735_s30   ;;  %p6592_p0 = scmp.ge.s32.totalorder %s8735_s30, 1  ;;  %s8735_s30 = sphi %s8789_s30, %s19_s30  }
   0x2   : > { %p287_p1 = scmp.lt.s32.totalorder %s8735_s30, 3 }
   0x4   : > { %p288_p2 = pnand %p6592_p0, %p287_p1 }
   0x5   : > { %v8486_v0 = vld [vmem:[%s10972_s1] sm:$0xff] (!%p288_p2)   ;;  %p323_p3 = scmp.lt.s32.totalorder (!%p288_p2), %s6588_s10, 1  ;;  %v8487_v1 = vld [vmem:[%s10972_s1 + $0x8] sm:$0xff] (!%p288_p2)   ;;  %v8488_v2 = vld [vmem:[%s10972_s1 + $0x10] sm:$0xff] (!%p288_p2)   ;;  %v8737_v43 = vmov (!%p288_p2), 0.0   ;;  %v8738_v56 = vmov (!%p288_p2), 0.0|0.0  }
   0x6   : > { %291 = sbr.rel (%p288_p2) target bundleno = 1745 (0x6d1), region = 56  ;;  %8285 = vmatprep.subr.bf16.mxu0 (!%p288_p2), %v8486_v0  ;;  %v8489_v3 = vld [vmem:[%s10972_s1 + $0x18] sm:$0xff] (!%p288_p2)   ;;  %v8490_v5 = vld [vmem:[%s10972_s1 + $0x20] sm:$0xff] (!%p288_p2)   ;;  %v8491_v6 = vld [vmem:[%s10972_s1 + $0x28] sm:$0xff] (!%p288_p2)   ;;  %726 = vst [vmem:[#allocation2] sm:$0xff] (!%p288_p2), %v8737_v43 }
   0x7   : > { %8286 = vmatpush3.bf16.msra.mxu0 (!%p288_p2), %v8486_v0  ;;  %v8492_v7 = vld [vmem:[%s10972_s1 + $0x30] sm:$0xff] (!%p288_p2)   ;;  %v8493_v8 = vld [vmem:[%s10972_s1 + $0x38] sm:$0xff] (!%p288_p2)   ;;  %v8510_v9 = vld [vmem:[%s10974_s3 + $0x40] sm:$0xff] (!%p288_p2)   ;;  %727 = vst [vmem:[#allocation2 + $0x8] sm:$0xff] (!%p288_p2), %v8737_v43 }
   0x8   : > { %8287 = vmatprep.subr.bf16.mxu0 (!%p288_p2), %v8487_v1  ;;  %v8511_v10 = vld [vmem:[%s10974_s3] sm:$0xff] (!%p288_p2)   ;;  %6869 = vmatprep.subr.bf16.mxu1 (!%p288_p2), %v8510_v9  ;;  %v8512_v11 = vld [vmem:[%s10974_s3 + $0x48] sm:$0xff] (!%p288_p2)   ;;  %v8514_v14 = vld [vmem:[%s10974_s3 + $0x50] sm:$0xff] (!%p288_p2)   ;;  %728 = vst [vmem:[#allocation2 + $0x10] sm:$0x3] (!%p288_p2), %v8737_v43 }
   0x9   : > { %6870 = vmatpush3.bf16.msra.mxu1 (!%p288_p2), %v8511_v10  ;;  %v8513_v12 = vld [vmem:[%s10974_s3 + $0x8] sm:$0xff] (!%p288_p2)   ;;  %v8515_v16 = vld [vmem:[%s10974_s3 + $0x10] sm:$0xff] (!%p288_p2)   ;;  %v8516_v17 = vld [vmem:[%s10974_s3 + $0xc0] sm:$0xff] (!%p288_p2)   ;;  %730 = vst [vmem:[#allocation2 + $0x198] sm:$0xff] (!%p288_p2), %v8737_v43 }
   0xa   : > { %6871 = vmatprep.subr.bf16.mxu1 (!%p288_p2), %v8512_v11  ;;  %v8517_v18 = vld [vmem:[%s10974_s3 + $0x58] sm:$0xff] (!%p288_p2)   ;;  %v8518_v19 = vld [vmem:[%s10974_s3 + $0x80] sm:$0xff] (!%p288_p2)   ;;  %v8520_v21 = vld [vmem:[%s10974_s3 + $0xc8] sm:$0xff] (!%p288_p2)   ;;  %731 = vst [vmem:[#allocation2 + $0x1a0] sm:$0xff] (!%p288_p2), %v8737_v43 }
   0xb   : > { %8288 = vmatpush3.bf16.msra.mxu0 (!%p288_p2), %v8487_v1  ;;  %v8519_v20 = vld [vmem:[%s10974_s3 + $0x18] sm:$0xff] (!%p288_p2)   ;;  %v8521_v22 = vld [vmem:[%s10974_s3 + $0x60] sm:$0xff] (!%p288_p2)   ;;  %v8522_v24 = vld [vmem:[%s10974_s3 + $0x88] sm:$0xff] (!%p288_p2)   ;;  %732 = vst [vmem:[#allocation2 + $0x1a8] sm:$0x3] (!%p288_p2), %v8737_v43 }
   0xc   : > { %8289 = vmatprep.subr.bf16.mxu0 (!%p288_p2), %v8488_v2  ;;  %v8523_v26 = vld [vmem:[%s10974_s3 + $0x20] sm:$0xff] (!%p288_p2)   ;;  %v8524_v27 = vld [vmem:[%s10974_s3 + $0xd0] sm:$0xff] (!%p288_p2)   ;;  %v8525_v28 = vld [vmem:[%s10974_s3 + $0x68] sm:$0xff] (!%p288_p2)   ;;  %734 = vst [vmem:[#allocation2 + $0x18] sm:$0x1] (!%p288_p2), %v8737_v43 }
   0xd   : > { %s10982_s10 = smov (!%p323_p3, %s6588_s10), 1  ;;  %6872 = vmatpush3.bf16.msra.mxu1 %v8513_v12  ;;  %v8526_v29 = vld [vmem:[%s10974_s3 + $0x90] sm:$0xff]   ;;  %v8527_v30 = vld [vmem:[%s10974_s3 + $0x28] sm:$0xff]   ;;  %v8528_v31 = vld [vmem:[%s10974_s3 + $0xd8] sm:$0xff]   ;;  %735 = vst [vmem:[#allocation2 + $0x30] sm:$0x1] %v8737_v43 }
   0xe   : > { %s6843_s17 = sshll.u32 %s10982_s10, 7  ;;  %6873 = vmatprep.subr.bf16.mxu1 %v8514_v14  ;;  %736 = vst [vmem:[#allocation2 + $0x48] sm:$0x1] %v8737_v43  ;;  %737 = vst [vmem:[#allocation2 + $0x60] sm:$0x1] %v8737_v43  ;;  %v8529_v44 = vld [vmem:[%s10974_s3 + $0x70] sm:$0xff]  }
   0xf   : > { %s8812_s20 = scalar_lea.vmem %s10971_s0, %s6843_s17  ;;  %8290 = vmatpush3.bf16.msra.mxu0 %v8488_v2  ;;  %738 = vst [vmem:[#allocation2 + $0x78] sm:$0x1] %v8737_v43  ;;  %739 = vst [vmem:[#allocation2 + $0x90] sm:$0x1] %v8737_v43  ;;  %v8530_v45 = vld [vmem:[%s10974_s3 + $0x98] sm:$0xff]   ;;  %v8531_v46 = vld [vmem:[%s10974_s3 + $0x30] sm:$0xff]  }
  0x10   : > { %v8494_v4 = vld [vmem:[%s8812_s20] sm:$0xff]   ;;  %8291 = vmatprep.subr.bf16.mxu0 %v8489_v3  ;;  %v8495_v13 = vld [vmem:[%s8812_s20 + $0x8] sm:$0xff]   ;;  %v8496_v15 = vld [vmem:[%s8812_s20 + $0x10] sm:$0xff]   ;;  %740 = vst [vmem:[#allocation2 + $0xa8] sm:$0x1] %v8737_v43  ;;  %s6844_s16 = sshll.u32 %s10982_s10, 8 }
  0x11   : > { %8301 = vmatprep.mubr.bf16.mxu0 %v8494_v4  ;;  %6874 = vmatpush3.bf16.msra.mxu1 %v8515_v16  ;;  %v8497_v23 = vld [vmem:[%s8812_s20 + $0x18] sm:$0xff]   ;;  %v8498_v25 = vld [vmem:[%s8812_s20 + $0x20] sm:$0xff]   ;;  %v8499_v32 = vld [vmem:[%s8812_s20 + $0x28] sm:$0xff]   ;;  %741 = vst [vmem:[#allocation2 + $0xc0] sm:$0x1] %v8737_v43  ;;  %s10899_s19 = scalar_lea.vmem %s10980_s9, %s6844_s16 }
  0x12   : > { %6875 = vmatprep.subr.bf16.mxu1 %v8517_v18  ;;  %v8500_v33 = vld [vmem:[%s8812_s20 + $0x30] sm:$0xff]   ;;  %v8501_v34 = vld [vmem:[%s8812_s20 + $0x38] sm:$0xff]   ;;  %v8502_v35 = vld [vmem:[%s8812_s20 + $0x40] sm:$0xff]   ;;  %742 = vst [vmem:[#allocation2 + $0xd8] sm:$0x1] %v8737_v43 }
  0x13   : > { %8292 = vmatpush3.bf16.msra.mxu0 %v8489_v3  ;;  %v8503_v36 = vld [vmem:[%s8812_s20 + $0x48] sm:$0xff]   ;;  %v8504_v37 = vld [vmem:[%s8812_s20 + $0x50] sm:$0xff]   ;;  %v8505_v38 = vld [vmem:[%s8812_s20 + $0x58] sm:$0xff]   ;;  %743 = vst [vmem:[#allocation2 + $0xf0] sm:$0x1] %v8737_v43 }
  0x14   : > { %8293 = vmatprep.subr.bf16.mxu0 %v8490_v5  ;;  %v8506_v39 = vld [vmem:[%s8812_s20 + $0x60] sm:$0xff]   ;;  %v8507_v40 = vld [vmem:[%s8812_s20 + $0x68] sm:$0xff]   ;;  %v8508_v41 = vld [vmem:[%s8812_s20 + $0x70] sm:$0xff]   ;;  %744 = vst [vmem:[#allocation2 + $0x108] sm:$0x1] %v8737_v43 }
  0x15   : > { %6876 = vmatpush3.bf16.msra.mxu1 %v8519_v20  ;;  %v8509_v42 = vld [vmem:[%s8812_s20 + $0x78] sm:$0xff]   ;;  %745 = vst [vmem:[#allocation2 + $0x120] sm:$0x1] %v8737_v43  ;;  %746 = vst [vmem:[#allocation2 + $0x138] sm:$0x1] %v8737_v43  ;;  %v8532_v47 = vld [vmem:[%s10974_s3 + $0xe0] sm:$0xff]  }
  0x16   : > { %6877 = vmatprep.subr.bf16.mxu1 %v8521_v22  ;;  %747 = vst [vmem:[#allocation2 + $0x150] sm:$0x1] %v8737_v43  ;;  %748 = vst [vmem:[#allocation2 + $0x168] sm:$0x1] %v8737_v43  ;;  %v8533_v48 = vld [vmem:[%s10974_s3 + $0x78] sm:$0xff]   ;;  %v8534_v49 = vld [vmem:[%s10974_s3 + $0xa0] sm:$0xff]  }
  0x17   : > { %8294 = vmatpush3.bf16.msra.mxu0 %v8490_v5  ;;  %749 = vst [vmem:[#allocation2 + $0x180] sm:$0x1] %v8737_v43  ;;  %750 = vst [vmem:[#allocation2 + $0x29] sm:$0x1] %v8737_v43  ;;  %v8535_v50 = vld [vmem:[%s10974_s3 + $0x38] sm:$0xff]   ;;  %v830_v51 = vld [vmem:[#allocation2 + $0x1] sm:$0xff] }
  0x18   : > { %8295 = vmatprep.subr.bf16.mxu0 %v8491_v6  ;;  %751 = vst [vmem:[#allocation2 + $0x41] sm:$0x1] %v8737_v43  ;;  %752 = vst [vmem:[#allocation2 + $0x59] sm:$0x1] %v8737_v43  ;;  %v831_v52 = vld [vmem:[#allocation2 + $0x9] sm:$0xff]  ;;  %v8538_v57 = vld [vmem:[%s10974_s3 + $0x140] sm:$0xff]  }
  0x19   : > { %6878 = vmatpush3.bf16.msra.mxu1 %v8523_v26  ;;  %753 = vst [vmem:[#allocation2 + $0x71] sm:$0x1] %v8737_v43  ;;  %754 = vst [vmem:[#allocation2 + $0x89] sm:$0x1] %v8737_v43  ;;  %v1088_v53 = vpack.c.bf16 %v831_v52, %v830_v51  ;;  %v8536_v54 = vld [vmem:[%s10974_s3 + $0xe8] sm:$0xff]   ;;  %v8539_v58 = vld [vmem:[%s10974_s3 + $0xf0] sm:$0xff]  }
  0x1a   : > { %6879 = vmatprep.subr.bf16.mxu1 %v8525_v28  ;;  %755 = vst [vmem:[#allocation2 + $0xa1] sm:$0x1] %v8737_v43  ;;  %756 = vst [vmem:[#allocation2 + $0xb9] sm:$0x1] %v8737_v43  ;;  %v8537_v55 = vld [vmem:[%s10974_s3 + $0xa8] sm:$0xff]   ;;  %v8540_v59 = vld [vmem:[%s10974_s3 + $0x100] sm:$0xff]  }
  0x1b   : > { %8296 = vmatpush3.bf16.msra.mxu0 %v8491_v6  ;;  %757 = vst [vmem:[#allocation2 + $0xd1] sm:$0x1] %v8737_v43  ;;  %758 = vst [vmem:[#allocation2 + $0xe9] sm:$0x1] %v8737_v43  ;;  %1846 = vmatprep.mubr.bf16.mxu1 %v1088_v53  ;;  %v8541_v60 = vld [vmem:[%s10974_s3 + $0xb0] sm:$0xff]   ;;  %v8542_v61 = vld [vmem:[%s10974_s3 + $0xf8] sm:$0xff]  }
  0x1c   : > { %8297 = vmatprep.subr.bf16.mxu0 %v8492_v7  ;;  %759 = vst [vmem:[#allocation2 + $0x101] sm:$0x1] %v8737_v43  ;;  %760 = vst [vmem:[#allocation2 + $0x119] sm:$0x1] %v8737_v43  ;;  %v8543_v62 = vld [vmem:[%s10974_s3 + $0xb8] sm:$0xff]   ;;  %v8544_v63 = vld [vmem:[%s10974_s3 + $0x148] sm:$0xff]  }
  0x1d   : > { %6880 = vmatpush3.bf16.msra.mxu1 %v8527_v30  ;;  %761 = vst [vmem:[#allocation2 + $0x131] sm:$0x1] %v8737_v43  ;;  %762 = vst [vmem:[#allocation2 + $0x149] sm:$0x1] %v8737_v43  ;;  %v8545_v0 = vld [vmem:[%s10974_s3 + $0x108] sm:$0xff]   ;;  %v8546_v1 = vld [vmem:[%s10974_s3 + $0x150] sm:$0xff]  }
  0x1e   : > { %763 = vst [vmem:[#allocation2 + $0x161] sm:$0x1] %v8737_v43  ;;  %764 = vst [vmem:[#allocation2 + $0x179] sm:$0x1] %v8737_v43  ;;  %6881 = vmatprep.subr.bf16.mxu1 %v8529_v44  ;;  %v8547_v2 = vld [vmem:[%s10974_s3 + $0x110] sm:$0xff]   ;;  %v8548_v3 = vld [vmem:[%s10974_s3 + $0x158] sm:$0xff]  }
  0x1f   : > { %8298 = vmatpush3.bf16.msra.mxu0 %v8492_v7  ;;  %765 = vst [vmem:[#allocation2 + $0x191] sm:$0x1] %v8737_v43  ;;  %2651 = vst [vmem:[#allocation3] sm:$0xff] %v8737_v43  ;;  %v8549_v4 = vld [vmem:[%s10974_s3 + $0x118] sm:$0xff]   ;;  %v8550_v5 = vld [vmem:[%s10974_s3 + $0x160] sm:$0xff]  }
  0x20   : > { %8299 = vmatprep.subr.bf16.mxu0 %v8493_v8  ;;  %2652 = vst [vmem:[#allocation3 + $0x8] sm:$0xff] %v8737_v43  ;;  %2653 = vst [vmem:[#allocation3 + $0x10] sm:$0x3] %v8737_v43  ;;  %v8551_v6 = vld [vmem:[%s10974_s3 + $0x120] sm:$0xff]   ;;  %v8552_v7 = vld [vmem:[%s10974_s3 + $0x168] sm:$0xff]  }
  0x21   : > { %2655 = vst [vmem:[#allocation3 + $0x198] sm:$0xff] %v8737_v43  ;;  %2656 = vst [vmem:[#allocation3 + $0x1a0] sm:$0xff] %v8737_v43  ;;  %6882 = vmatpush3.bf16.msra.mxu1 %v8531_v46  ;;  %v8554_v9 = vld [vmem:[%s10974_s3 + $0x170] sm:$0xff]   ;;  %v8556_v11 = vld [vmem:[%s10974_s3 + $0x1c0] sm:$0xff]  }
  0x22   : > { %2657 = vst [vmem:[#allocation3 + $0x1a8] sm:$0x3] %v8737_v43  ;;  %2659 = vst [vmem:[#allocation3 + $0x18] sm:$0x1] %v8737_v43  ;;  %6883 = vmatprep.subr.bf16.mxu1 %v8533_v48  ;;  %v8555_v10 = vld [vmem:[%s10974_s3 + $0x130] sm:$0xff]   ;;  %v8560_v12 = vld [vmem:[%s10974_s3 + $0x178] sm:$0xff]  }
  0x23   : > { %8300 = vmatpush3.bf16.msra.mxu0 %v8493_v8  ;;  %2660 = vst [vmem:[#allocation3 + $0x30] sm:$0x1] %v8737_v43  ;;  %2661 = vst [vmem:[#allocation3 + $0x48] sm:$0x1] %v8737_v43  ;;  %v8553_v8 = vld [vmem:[%s10974_s3 + $0x128] sm:$0xff]   ;;  %v8557_v52 = vld [vmem:[%s10974_s3 + $0x180] sm:$0xff]  }
  0x24   : > { %6981 = vmatprep.subr.bf16.mxu0 %v8516_v17  ;;  %2662 = vst [vmem:[#allocation3 + $0x60] sm:$0x1] %v8737_v43  ;;  %2663 = vst [vmem:[#allocation3 + $0x78] sm:$0x1] %v8737_v43  ;;  %v9109_v14 = vld [vmem:[%s10973_s2] ss:$0 sm:$0xff] }
  0x25   : > { %2664 = vst [vmem:[#allocation3 + $0x90] sm:$0x1] %v8737_v43  ;;  %2665 = vst [vmem:[#allocation3 + $0xa8] sm:$0x1] %v8737_v43  ;;  %6884 = vmatpush3.bf16.msra.mxu1 %v8535_v50 }
  0x26   : > { %8302 = vmatmul.mubr.bf16.vlgmr.msra.gmra.mrb[0].mxu0 %v8495_v13  ;;  %2666 = vst [vmem:[#allocation3 + $0xc0] sm:$0x1] %v8737_v43  ;;  %2667 = vst [vmem:[#allocation3 + $0xd8] sm:$0x1] %v8737_v43  ;;  %7093 = vmatprep.subr.bf16.mxu1 %v8538_v57  ;;  %v8561_v13 = vld [vmem:[%s10974_s3 + $0x138] sm:$0xff]  }
  0x27   : > { %8305 = vmatprep.mubr.bf16.mxu0 %v8496_v15  ;;  %6982 = vmatpush3.bf16.msra.mxu0 %v8518_v19  ;;  %2668 = vst [vmem:[#allocation3 + $0xf0] sm:$0x1] %v8737_v43  ;;  %2669 = vst [vmem:[#allocation3 + $0x108] sm:$0x1] %v8737_v43 }
  0x28   : > { %6983 = vmatprep.subr.bf16.mxu0 %v8520_v21  ;;  %2670 = vst [vmem:[#allocation3 + $0x120] sm:$0x1] %v8737_v43  ;;  %2671 = vst [vmem:[#allocation3 + $0x138] sm:$0x1] %v8737_v43  ;;  %1847 = vmatmul.mubr.bf16.vlgmr.msra.gmra.mrb[0].mxu1 %v8738_v56  ;;  %v8558_v56 = vld [vmem:[%s10974_s3 + $0x1c8] sm:$0xff]  }
  0x29   : > { %2672 = vst [vmem:[#allocation3 + $0x150] sm:$0x1] %v8737_v43  ;;  %2673 = vst [vmem:[#allocation3 + $0x168] sm:$0x1] %v8737_v43  ;;  %7094 = vmatpush3.bf16.msra.mxu1 %v8540_v59 }
  0x2a   : > { %2674 = vst [vmem:[#allocation3 + $0x180] sm:$0x1] %v8737_v43  ;;  %2675 = vst [vmem:[#allocation3 + $0x29] sm:$0x1] %v8737_v43  ;;  %7095 = vmatprep.subr.bf16.mxu1 %v8544_v63 }
  0x2b   : > { %6984 = vmatpush3.bf16.msra.mxu0 %v8522_v24  ;;  %2676 = vst [vmem:[#allocation3 + $0x41] sm:$0x1] %v8737_v43  ;;  %2677 = vst [vmem:[#allocation3 + $0x59] sm:$0x1] %v8737_v43 }
  0x2c   : > { %6985 = vmatprep.subr.bf16.mxu0 %v8524_v27  ;;  %2678 = vst [vmem:[#allocation3 + $0x71] sm:$0x1] %v8737_v43  ;;  %2679 = vst [vmem:[#allocation3 + $0x89] sm:$0x1] %v8737_v43 }
  0x2d   : > { %2680 = vst [vmem:[#allocation3 + $0xa1] sm:$0x1] %v8737_v43  ;;  %2681 = vst [vmem:[#allocation3 + $0xb9] sm:$0x1] %v8737_v43  ;;  %7096 = vmatpush3.bf16.msra.mxu1 %v8545_v0 }
  0x2e   : > { %8306 = vmatmul.mubr.bf16.gmra.mrb[4].mxu0 %v8497_v23  ;;  %2682 = vst [vmem:[#allocation3 + $0xd1] sm:$0x1] %v8737_v43  ;;  %2683 = vst [vmem:[#allocation3 + $0xe9] sm:$0x1] %v8737_v43  ;;  %7097 = vmatprep.subr.bf16.mxu1 %v8546_v1  ;;  %v8559_v1 = vld [vmem:[%s10974_s3 + $0x188] sm:$0xff]  }
  0x2f   : > { %8309 = vmatprep.mubr.bf16.mxu0 %v8498_v25  ;;  %6986 = vmatpush3.bf16.msra.mxu0 %v8526_v29  ;;  %2684 = vst [vmem:[#allocation3 + $0x101] sm:$0x1] %v8737_v43  ;;  %2685 = vst [vmem:[#allocation3 + $0x119] sm:$0x1] %v8737_v43  ;;  %v9118_v25 = vld [vmem:[%s10974_s3 + $0x200] sm:$0xff]  }
  0x30   : > { %6987 = vmatprep.subr.bf16.mxu0 %v8528_v31  ;;  %2686 = vst [vmem:[#allocation3 + $0x131] sm:$0x1] %v8737_v43  ;;  %2687 = vst [vmem:[#allocation3 + $0x149] sm:$0x1] %v8737_v43 }
  0x31   : > { %2688 = vst [vmem:[#allocation3 + $0x161] sm:$0x1] %v8737_v43  ;;  %2689 = vst [vmem:[#allocation3 + $0x179] sm:$0x1] %v8737_v43  ;;  %7098 = vmatpush3.bf16.msra.mxu1 %v8547_v2 }
  0x32   : > { %2690 = vst [vmem:[#allocation3 + $0x191] sm:$0x1] %v8737_v43  ;;  %4576 = vst [vmem:[#allocation4] sm:$0xff] %v8737_v43  ;;  %7099 = vmatprep.subr.bf16.mxu1 %v8548_v3 }
  0x33   : > { %4577 = vst [vmem:[#allocation4 + $0x8] sm:$0xff] %v8737_v43  ;;  %4578 = vst [vmem:[#allocation4 + $0x10] sm:$0x3] %v8737_v43  ;;  %6988 = vmatpush3.bf16.msra.mxu0 %v8530_v45 }
  0x34   : > { %4580 = vst [vmem:[#allocation4 + $0x198] sm:$0xff] %v8737_v43  ;;  %4581 = vst [vmem:[#allocation4 + $0x1a0] sm:$0xff] %v8737_v43  ;;  %6989 = vmatprep.subr.bf16.mxu0 %v8532_v47 }
  0x35   : > { %4582 = vst [vmem:[#allocation4 + $0x1a8] sm:$0x3] %v8737_v43  ;;  %4584 = vst [vmem:[#allocation4 + $0x18] sm:$0x1] %v8737_v43  ;;  %7100 = vmatpush3.bf16.msra.mxu1 %v8549_v4  ;;  %v8562_v4 = vld [vmem:[%s10974_s3 + $0x1d0] sm:$0xff]  }
  0x36   : > { %8310 = vmatmul.mubr.bf16.gmra.mrb[8].mxu0 %v8499_v32  ;;  %4585 = vst [vmem:[#allocation4 + $0x30] sm:$0x1] %v8737_v43  ;;  %4586 = vst [vmem:[#allocation4 + $0x48] sm:$0x1] %v8737_v43  ;;  %7101 = vmatprep.subr.bf16.mxu1 %v8550_v5 }
  0x37   : > { %8313 = vmatprep.mubr.bf16.mxu0 %v8500_v33  ;;  %4587 = vst [vmem:[#allocation4 + $0x60] sm:$0x1] %v8737_v43  ;;  %4588 = vst [vmem:[#allocation4 + $0x78] sm:$0x1] %v8737_v43  ;;  %6990 = vmatpush3.bf16.msra.mxu0 %v8534_v49 }
  0x38   : > { %4589 = vst [vmem:[#allocation4 + $0x90] sm:$0x1] %v8737_v43  ;;  %4590 = vst [vmem:[#allocation4 + $0xa8] sm:$0x1] %v8737_v43  ;;  %6991 = vmatprep.subr.bf16.mxu0 %v8536_v54 }
  0x39   : > { %4591 = vst [vmem:[#allocation4 + $0xc0] sm:$0x1] %v8737_v43  ;;  %4592 = vst [vmem:[#allocation4 + $0xd8] sm:$0x1] %v8737_v43  ;;  %7102 = vmatpush3.bf16.msra.mxu1 %v8551_v6 }
  0x3a   : > { %4593 = vst [vmem:[#allocation4 + $0xf0] sm:$0x1] %v8737_v43  ;;  %4594 = vst [vmem:[#allocation4 + $0x108] sm:$0x1] %v8737_v43  ;;  %7103 = vmatprep.subr.bf16.mxu1 %v8552_v7 }
  0x3b   : > { %4595 = vst [vmem:[#allocation4 + $0x120] sm:$0x1] %v8737_v43  ;;  %4596 = vst [vmem:[#allocation4 + $0x138] sm:$0x1] %v8737_v43  ;;  %6992 = vmatpush3.bf16.msra.mxu0 %v8537_v55 }
  0x3c   : > { %4597 = vst [vmem:[#allocation4 + $0x150] sm:$0x1] %v8737_v43  ;;  %4598 = vst [vmem:[#allocation4 + $0x168] sm:$0x1] %v8737_v43  ;;  %6993 = vmatprep.subr.bf16.mxu0 %v8539_v58 }
  0x3d   : > { %4599 = vst [vmem:[#allocation4 + $0x180] sm:$0x1] %v8737_v43  ;;  %4600 = vst [vmem:[#allocation4 + $0x29] sm:$0x1] %v8737_v43  ;;  %7104 = vmatpush3.bf16.msra.mxu1 %v8553_v8 }
  0x3e   : > { %8314 = vmatmul.mubr.bf16.gmra.mrb[12].mxu0 %v8501_v34  ;;  %4601 = vst [vmem:[#allocation4 + $0x41] sm:$0x1] %v8737_v43  ;;  %4602 = vst [vmem:[#allocation4 + $0x59] sm:$0x1] %v8737_v43  ;;  %7105 = vmatprep.subr.bf16.mxu1 %v8554_v9 }
  0x3f   : > { %8317 = vmatprep.mubr.bf16.mxu0 %v8502_v35  ;;  %4603 = vst [vmem:[#allocation4 + $0x71] sm:$0x1] %v8737_v43  ;;  %4604 = vst [vmem:[#allocation4 + $0x89] sm:$0x1] %v8737_v43  ;;  %6994 = vmatpush3.bf16.msra.mxu0 %v8541_v60 }
  0x40   : > { %4605 = vst [vmem:[#allocation4 + $0xa1] sm:$0x1] %v8737_v43  ;;  %4606 = vst [vmem:[#allocation4 + $0xb9] sm:$0x1] %v8737_v43  ;;  %6995 = vmatprep.subr.bf16.mxu0 %v8542_v61 }
  0x41   : > { %4607 = vst [vmem:[#allocation4 + $0xd1] sm:$0x1] %v8737_v43  ;;  %4608 = vst [vmem:[#allocation4 + $0xe9] sm:$0x1] %v8737_v43  ;;  %7106 = vmatpush3.bf16.msra.mxu1 %v8555_v10 }
  0x42   : > { %4609 = vst [vmem:[#allocation4 + $0x101] sm:$0x1] %v8737_v43  ;;  %4610 = vst [vmem:[#allocation4 + $0x119] sm:$0x1] %v8737_v43  ;;  %7107 = vmatprep.subr.bf16.mxu1 %v8560_v12 }
  0x43   : > { %4611 = vst [vmem:[#allocation4 + $0x131] sm:$0x1] %v8737_v43  ;;  %4612 = vst [vmem:[#allocation4 + $0x149] sm:$0x1] %v8737_v43  ;;  %6996 = vmatpush3.bf16.msra.mxu0 %v8543_v62 }
  0x44   : > { %4613 = vst [vmem:[#allocation4 + $0x161] sm:$0x1] %v8737_v43  ;;  %4614 = vst [vmem:[#allocation4 + $0x179] sm:$0x1] %v8737_v43  ;;  %7205 = vmatprep.subr.bf16.mxu0 %v8556_v11 }
  0x45   : > { %4615 = vst [vmem:[#allocation4 + $0x191] sm:$0x1] %v8737_v43  ;;  %7108 = vmatpush3.bf16.msra.mxu1 %v8561_v13  ;;  %v8563_v13 = vld [vmem:[%s10974_s3 + $0x190] sm:$0xff]  }
  0x46   : > { %8318 = vmatmul.mubr.bf16.gmra.mrb[16].mxu0 %v8503_v36  ;;  %8333 = vmatprep.subr.bf16.mxu1 %v9118_v25 }
  0x47   : > { %8321 = vmatprep.mubr.bf16.mxu0 %v8504_v37 }
  0x4e   : > { %8322 = vmatmul.mubr.bf16.gmra.mrb[20].mxu0 %v8505_v38 }
  0x4f   : > { %8325 = vmatprep.mubr.bf16.mxu0 %v8506_v39 }
  0x56   : > { %8326 = vmatmul.mubr.bf16.gmra.mrb[24].mxu0 %v8507_v40  ;;  %v862_v40 = vld [vmem:[#allocation2 + $0x2] sm:$0xff] }
  0x57   : > { %8329 = vmatprep.mubr.bf16.mxu0 %v8508_v41  ;;  %v863_v41 = vld [vmem:[#allocation2 + $0xa] sm:$0xff] }
  0x58   : > { %v1089_v46 = vpack.c.bf16 %v863_v41, %v862_v40 }
  0x5e   : > { %8330 = vmatmul.mubr.bf16.gmra.mrb[28].mxu0 %v8509_v42 }
  0xf9   : > { %v8303_v15 = vpop.f32.mrb[0].mxu0 }
  0xfa   : > { %v576_v16 = vadd.f32 %v8303_v15, %v9109_v14  ;;  %v567_v17 = vpop.f32.mrb[1].mxu0 }
  0xfb   : > { %v568_v18 = vadd.f32 %v9109_v14, %v567_v17  ;;  %v8304_v19 = vpop.f32.mrb[2].mxu0 }
  0xfc   : > { %v696_v20 = vmax.f32 %v576_v16, 0.0  ;;  %v579_v21 = vadd.f32 %v8304_v19, %v9109_v14  ;;  %v570_v22 = vpop.f32.mrb[3].mxu0 }
  0xfd   : > { %v694_v23 = vmax.f32 %v568_v18, 0.0  ;;  %v571_v24 = vadd.f32 %v9109_v14, %v570_v22  ;;  %v8564_v18 = vld [vmem:[%s10974_s3 + $0x1d8] sm:$0xff]  }
  0xfe   : > { %768 = vst [vmem:[#allocation2 + $0x31] sm:$0xff] %v696_v20  ;;  %v697_v26 = vmax.f32 %v579_v21, 0.0 }
  0xff   : > { %766 = vst [vmem:[#allocation2 + $0x19] sm:$0xff] %v694_v23  ;;  %v695_v27 = vmax.f32 %v571_v24, 0.0 }
 0x100   : > { %769 = vst [vmem:[#allocation2 + $0x39] sm:$0xff] %v697_v26  ;;  %v1106_v28 = vpack.c.bf16 %v697_v26, %v696_v20 }
 0x101   : > { %767 = vst [vmem:[#allocation2 + $0x21] sm:$0xff] %v695_v27  ;;  %v8307_v29 = vpop.f32.mrb[4].mxu0  ;;  %v1097_v30 = vpack.c.bf16 %v695_v27, %v694_v23  ;;  %v8565_v27 = vld [vmem:[%s10974_s3 + $0x198] sm:$0xff]  }
 0x102   : > { %v592_v31 = vadd.f32 %v8307_v29, %v9109_v14  ;;  %v583_v32 = vpop.f32.mrb[5].mxu0  ;;  %v8566_v29 = vld [vmem:[%s10974_s3 + $0x1e0] sm:$0xff]  }
 0x103   : > { %v584_v33 = vadd.f32 %v9109_v14, %v583_v32  ;;  %v8308_v34 = vpop.f32.mrb[6].mxu0  ;;  %1854 = vmatprep.mubr.bf16.mxu1 %v1097_v30 }
 0x104   : > { %v700_v35 = vmax.f32 %v592_v31, 0.0  ;;  %v595_v36 = vadd.f32 %v8308_v34, %v9109_v14  ;;  %v586_v37 = vpop.f32.mrb[7].mxu0 }
 0x105   : > { %v698_v38 = vmax.f32 %v584_v33, 0.0  ;;  %v587_v39 = vadd.f32 %v9109_v14, %v586_v37  ;;  %v896_v53 = vld [vmem:[#allocation2 + $0x30] sm:$0xff] }
 0x106   : > { %772 = vst [vmem:[#allocation2 + $0x61] sm:$0xff] %v700_v35  ;;  %v701_v42 = vmax.f32 %v595_v36, 0.0  ;;  %v894_v44 = vld [vmem:[#allocation2 + $0x18] sm:$0xff] }
 0x107   : > { %770 = vst [vmem:[#allocation2 + $0x49] sm:$0xff] %v698_v38  ;;  %v9125_v43 = vmax.f32 %v587_v39, 0.0  ;;  %v897_v47 = vld [vmem:[#allocation2 + $0x38] sm:$0xff] }
 0x108   : > { %773 = vst [vmem:[#allocation2 + $0x69] sm:$0xff] %v701_v42  ;;  %v895_v45 = vld [vmem:[#allocation2 + $0x20] sm:$0xff]  ;;  %v9127_v48 = vpack.c.bf16 %v701_v42, %v700_v35  ;;  %v9138_v57 = vpack.c.bf16 %v897_v47, %v896_v53  ;;  %v866_v30 = vld [vmem:[#allocation2 + $0x32] sm:$0xff]  ;;  %v8568_v42 = vld [vmem:[%s10974_s3 + $0x1e8] sm:$0xff]  }
 0x109   : > { %771 = vst [vmem:[#allocation2 + $0x51] sm:$0xff] %v9125_v43  ;;  %v1090_v49 = vpack.c.bf16 %v895_v45, %v894_v44  ;;  %v8311_v50 = vpop.f32.mrb[8].mxu0  ;;  %v1115_v51 = vpack.c.bf16 %v9125_v43, %v698_v38  ;;  %v864_v5 = vld [vmem:[#allocation2 + $0x1a] sm:$0xff]  ;;  %v865_v6 = vld [vmem:[#allocation2 + $0x22] sm:$0xff] }
 0x10a   : > { %v608_v54 = vadd.f32 %v8311_v50, %v9109_v14  ;;  %v599_v55 = vpop.f32.mrb[9].mxu0  ;;  %v9163_v15 = vpack.c.bf16 %v865_v6, %v864_v5  ;;  %v867_v31 = vld [vmem:[#allocation2 + $0x3a] sm:$0xff]  ;;  %v8569_v53 = vld [vmem:[%s10974_s3 + $0x1a8] sm:$0xff]  }
 0x10b   : > { %2007 = vmatprep.mubr.bf16.mxu0 %v1090_v49  ;;  %1855 = vmatmul.mubr.bf16.gmra.mrb[4].mxu1 %v1090_v49  ;;  %v600_v58 = vadd.f32 %v9109_v14, %v599_v55  ;;  %v8312_v59 = vpop.f32.mrb[10].mxu0  ;;  %v8567_v38 = vld [vmem:[%s10974_s3 + $0x1a0] sm:$0xff]   ;;  %v9188_v39 = vpack.c.bf16 %v867_v31, %v866_v30  ;;  %v8573_v6 = vld [vmem:[%s10974_s3 + $0x1f8] sm:$0xff]  }
 0x10c   : > { %2008 = vmatmul.mubr.bf16.vlgmr.msra.gmra.mrb[32].mxu0 %v1089_v46  ;;  %1862 = vmatprep.mubr.bf16.mxu1 %v1106_v28  ;;  %v704_v60 = vmax.f32 %v608_v54, 0.0  ;;  %v611_v61 = vadd.f32 %v8312_v59, %v9109_v14  ;;  %v602_v62 = vpop.f32.mrb[11].mxu0 }
 0x10d   : > { %2015 = vmatprep.mubr.bf16.mxu0 %v9138_v57  ;;  %v702_v63 = vmax.f32 %v600_v58, 0.0  ;;  %v603_v0 = vadd.f32 %v9109_v14, %v602_v62  ;;  %7206 = vmatpush3.bf16.msra.mxu0 %v8557_v52  ;;  %v900_v33 = vld [vmem:[#allocation2 + $0x60] sm:$0xff] }
 0x10e   : > { %776 = vst [vmem:[#allocation2 + $0x91] sm:$0xff] %v704_v60  ;;  %v9147_v2 = vmax.f32 %v611_v61, 0.0  ;;  %v898_v3 = vld [vmem:[#allocation2 + $0x48] sm:$0xff]  ;;  %7207 = vmatprep.subr.bf16.mxu0 %v8558_v56 }
 0x10f   : > { %774 = vst [vmem:[#allocation2 + $0x79] sm:$0xff] %v702_v63  ;;  %v703_v7 = vmax.f32 %v603_v0, 0.0  ;;  %v901_v34 = vld [vmem:[#allocation2 + $0x68] sm:$0xff] }
 0x110   : > { %777 = vst [vmem:[#allocation2 + $0x99] sm:$0xff] %v9147_v2  ;;  %v899_v8 = vld [vmem:[#allocation2 + $0x50] sm:$0xff]  ;;  %v9154_v9 = vpack.c.bf16 %v9147_v2, %v704_v60  ;;  %v9195_v44 = vpack.c.bf16 %v901_v34, %v900_v33 }
 0x111   : > { %v9156_v10 = vpack.c.bf16 %v899_v8, %v898_v3  ;;  %775 = vst [vmem:[#allocation2 + $0x81] sm:$0xff] %v703_v7  ;;  %v8315_v11 = vpop.f32.mrb[12].mxu0  ;;  %v9158_v12 = vpack.c.bf16 %v703_v7, %v702_v63  ;;  %7208 = vmatpush3.bf16.msra.mxu0 %v8559_v1  ;;  %v868_v58 = vld [vmem:[#allocation2 + $0x4a] sm:$0xff]  ;;  %v869_v59 = vld [vmem:[#allocation2 + $0x52] sm:$0xff] }
 0x112   : > { %v624_v16 = vadd.f32 %v8315_v11, %v9109_v14  ;;  %v615_v17 = vpop.f32.mrb[13].mxu0  ;;  %7209 = vmatprep.subr.bf16.mxu0 %v8562_v4  ;;  %v8572_v1 = vld [vmem:[%s10974_s3 + $0x1b0] sm:$0xff]   ;;  %v9218_v3 = vpack.c.bf16 %v869_v59, %v868_v58 }
 0x113   : > { %1863 = vmatmul.mubr.bf16.gmra.mrb[8].mxu1 %v9138_v57  ;;  %v616_v19 = vadd.f32 %v9109_v14, %v615_v17  ;;  %v8316_v20 = vpop.f32.mrb[14].mxu0 }
 0x114   : > { %2016 = vmatmul.mubr.bf16.gmra.mrb[36].mxu0 %v9163_v15  ;;  %1870 = vmatprep.mubr.bf16.mxu1 %v1115_v51  ;;  %v708_v21 = vmax.f32 %v624_v16, 0.0  ;;  %v627_v22 = vadd.f32 %v8316_v20, %v9109_v14  ;;  %v618_v23 = vpop.f32.mrb[15].mxu0 }
 0x115   : > { %2023 = vmatprep.mubr.bf16.mxu0 %v9156_v10  ;;  %v706_v24 = vmax.f32 %v616_v19, 0.0  ;;  %v619_v26 = vadd.f32 %v9109_v14, %v618_v23  ;;  %7210 = vmatpush3.bf16.msra.mxu0 %v8563_v13  ;;  %v8574_v19 = vld [vmem:[%s10974_s3 + $0x1b8] sm:$0xff]  }
 0x116   : > { %780 = vst [vmem:[#allocation2 + $0xc1] sm:$0xff] %v708_v21  ;;  %v709_v28 = vmax.f32 %v627_v22, 0.0  ;;  %7211 = vmatprep.subr.bf16.mxu0 %v8564_v18  ;;  %v902_v54 = vld [vmem:[#allocation2 + $0x78] sm:$0xff]  ;;  %v871_v22 = vld [vmem:[#allocation2 + $0x6a] sm:$0xff] }
 0x117   : > { %778 = vst [vmem:[#allocation2 + $0xa9] sm:$0xff] %v706_v24  ;;  %v707_v32 = vmax.f32 %v619_v26, 0.0  ;;  %v905_v26 = vld [vmem:[#allocation2 + $0x98] sm:$0xff] }
 0x118   : > { %781 = vst [vmem:[#allocation2 + $0xc9] sm:$0xff] %v709_v28  ;;  %v9181_v35 = vpack.c.bf16 %v709_v28, %v708_v21  ;;  %v903_v55 = vld [vmem:[#allocation2 + $0x80] sm:$0xff] }
 0x119   : > { %779 = vst [vmem:[#allocation2 + $0xb1] sm:$0xff] %v707_v32  ;;  %v8319_v36 = vpop.f32.mrb[16].mxu0  ;;  %v9183_v37 = vpack.c.bf16 %v707_v32, %v706_v24  ;;  %7212 = vmatpush3.bf16.msra.mxu0 %v8565_v27  ;;  %v9211_v62 = vpack.c.bf16 %v903_v55, %v902_v54  ;;  %v870_v21 = vld [vmem:[#allocation2 + $0x62] sm:$0xff]  ;;  %v904_v24 = vld [vmem:[#allocation2 + $0x90] sm:$0xff] }
 0x11a   : > { %v640_v40 = vadd.f32 %v8319_v36, %v9109_v14  ;;  %v631_v41 = vpop.f32.mrb[17].mxu0  ;;  %7213 = vmatprep.subr.bf16.mxu0 %v8566_v29  ;;  %v9238_v30 = vpack.c.bf16 %v871_v22, %v870_v21  ;;  %v9242_v33 = vpack.c.bf16 %v905_v26, %v904_v24 }
 0x11b   : > { %1871 = vmatmul.mubr.bf16.gmra.mrb[12].mxu1 %v9156_v10  ;;  %v632_v45 = vadd.f32 %v9109_v14, %v631_v41  ;;  %v8320_v46 = vpop.f32.mrb[18].mxu0 }
 0x11c   : > { %2024 = vmatmul.mubr.bf16.gmra.mrb[40].mxu0 %v9188_v39  ;;  %1878 = vmatprep.mubr.bf16.mxu1 %v9127_v48  ;;  %v712_v47 = vmax.f32 %v640_v40, 0.0  ;;  %v643_v49 = vadd.f32 %v8320_v46, %v9109_v14  ;;  %v634_v50 = vpop.f32.mrb[19].mxu0  ;;  %v8571_v48 = vld [vmem:[%s10974_s3 + $0x1f0] sm:$0xff]  }
 0x11d   : > { %2031 = vmatprep.mubr.bf16.mxu0 %v9195_v44  ;;  %v710_v51 = vmax.f32 %v632_v45, 0.0  ;;  %v635_v52 = vadd.f32 %v9109_v14, %v634_v50  ;;  %7214 = vmatpush3.bf16.msra.mxu0 %v8567_v38  ;;  %v872_v50 = vld [vmem:[#allocation2 + $0x7a] sm:$0xff] }
 0x11e   : > { %784 = vst [vmem:[#allocation2 + $0xf1] sm:$0xff] %v712_v47  ;;  %v713_v56 = vmax.f32 %v643_v49, 0.0  ;;  %7215 = vmatprep.subr.bf16.mxu0 %v8568_v42  ;;  %v906_v46 = vld [vmem:[#allocation2 + $0xa8] sm:$0xff] }
 0x11f   : > { %782 = vst [vmem:[#allocation2 + $0xd9] sm:$0xff] %v710_v51  ;;  %v711_v60 = vmax.f32 %v635_v52, 0.0 }
 0x120   : > { %785 = vst [vmem:[#allocation2 + $0xf9] sm:$0xff] %v713_v56  ;;  %v9209_v61 = vpack.c.bf16 %v713_v56, %v712_v47  ;;  %v907_v47 = vld [vmem:[#allocation2 + $0xb0] sm:$0xff] }
 0x121   : > { %783 = vst [vmem:[#allocation2 + $0xe1] sm:$0xff] %v711_v60  ;;  %v8323_v63 = vpop.f32.mrb[20].mxu0  ;;  %v9213_v0 = vpack.c.bf16 %v711_v60, %v710_v51  ;;  %7216 = vmatpush3.bf16.msra.mxu0 %v8569_v53  ;;  %v873_v51 = vld [vmem:[#allocation2 + $0x82] sm:$0xff]  ;;  %v9252_v54 = vpack.c.bf16 %v907_v47, %v906_v46  ;;  %v876_v24 = vld [vmem:[#allocation2 + $0xaa] sm:$0xff]  ;;  %v877_v26 = vld [vmem:[#allocation2 + $0xb2] sm:$0xff] }
 0x122   : > { %v656_v4 = vadd.f32 %v8323_v63, %v9109_v14  ;;  %v647_v5 = vpop.f32.mrb[21].mxu0  ;;  %7217 = vmatprep.subr.bf16.mxu0 %v8571_v48  ;;  %v9256_v48 = vpack.c.bf16 %v873_v51, %v872_v50  ;;  %v6885_v51 = vpop.f32.mrb[0].mxu1 }
 0x123   : > { %1879 = vmatmul.mubr.bf16.gmra.mrb[16].mxu1 %v9195_v44  ;;  %v648_v7 = vadd.f32 %v9109_v14, %v647_v5  ;;  %v8324_v8 = vpop.f32.mrb[22].mxu0 }
 0x124   : > { %2032 = vmatmul.mubr.bf16.gmra.mrb[44].mxu0 %v9218_v3  ;;  %1886 = vmatprep.mubr.bf16.mxu1 %v9158_v12  ;;  %v716_v11 = vmax.f32 %v656_v4, 0.0  ;;  %v659_v13 = vadd.f32 %v8324_v8, %v9109_v14  ;;  %v650_v16 = vpop.f32.mrb[23].mxu0 }
 0x125   : > { %2039 = vmatprep.mubr.bf16.mxu0 %v9211_v62  ;;  %v714_v17 = vmax.f32 %v648_v7, 0.0  ;;  %v651_v18 = vadd.f32 %v9109_v14, %v650_v16  ;;  %7218 = vmatpush3.bf16.msra.mxu0 %v8572_v1 }
 0x126   : > { %788 = vst [vmem:[#allocation2 + $0x121] sm:$0xff] %v716_v11  ;;  %v717_v20 = vmax.f32 %v659_v13, 0.0  ;;  %7219 = vmatprep.subr.bf16.mxu0 %v8573_v6  ;;  %v875_v13 = vld [vmem:[#allocation2 + $0x9a] sm:$0xff] }
 0x127   : > { %786 = vst [vmem:[#allocation2 + $0x109] sm:$0xff] %v714_v17  ;;  %v715_v23 = vmax.f32 %v651_v18, 0.0  ;;  %v909_v18 = vld [vmem:[#allocation2 + $0xc8] sm:$0xff] }
 0x128   : > { %789 = vst [vmem:[#allocation2 + $0x129] sm:$0xff] %v717_v20  ;;  %v9234_v27 = vpack.c.bf16 %v717_v20, %v716_v11  ;;  %v874_v11 = vld [vmem:[#allocation2 + $0x92] sm:$0xff]  ;;  %v880_v46 = vld [vmem:[#allocation2 + $0xda] sm:$0xff]  ;;  %v881_v47 = vld [vmem:[#allocation2 + $0xe2] sm:$0xff] }
 0x129   : > { %787 = vst [vmem:[#allocation2 + $0x111] sm:$0xff] %v715_v23  ;;  %v8327_v28 = vpop.f32.mrb[24].mxu0  ;;  %v9236_v29 = vpack.c.bf16 %v715_v23, %v714_v17  ;;  %7220 = vmatpush3.bf16.msra.mxu0 %v8574_v19  ;;  %v908_v17 = vld [vmem:[#allocation2 + $0xc0] sm:$0xff]  ;;  %v9270_v21 = vpack.c.bf16 %v875_v13, %v874_v11  ;;  %v9296_v50 = vpack.c.bf16 %v881_v47, %v880_v46 }
 0x12a   : > { %v672_v31 = vadd.f32 %v8327_v28, %v9109_v14  ;;  %v663_v32 = vpop.f32.mrb[25].mxu0  ;;  %v9273_v22 = vpack.c.bf16 %v909_v18, %v908_v17  ;;  %v911_v23 = vld [vmem:[#allocation2 + $0xe0] sm:$0xff] }
 0x12b   : > { %1887 = vmatmul.mubr.bf16.gmra.mrb[20].mxu1 %v9211_v62  ;;  %v664_v34 = vadd.f32 %v9109_v14, %v663_v32  ;;  %v8328_v36 = vpop.f32.mrb[26].mxu0  ;;  %v878_v32 = vld [vmem:[#allocation2 + $0xc2] sm:$0xff] }
 0x12c   : > { %2040 = vmatmul.mubr.bf16.gmra.mrb[48].mxu0 %v9238_v30  ;;  %1894 = vmatprep.mubr.bf16.mxu1 %v9154_v9  ;;  %v720_v38 = vmax.f32 %v672_v31, 0.0  ;;  %v675_v40 = vadd.f32 %v8328_v36, %v9109_v14  ;;  %v666_v41 = vpop.f32.mrb[27].mxu0  ;;  %v9280_v31 = vpack.c.bf16 %v877_v26, %v876_v24  ;;  %v912_v36 = vld [vmem:[#allocation2 + $0xf0] sm:$0xff] }
 0x12d   : > { %2047 = vmatprep.mubr.bf16.mxu0 %v9242_v33  ;;  %v718_v42 = vmax.f32 %v664_v34, 0.0  ;;  %v667_v45 = vadd.f32 %v9109_v14, %v666_v41  ;;  %v879_v34 = vld [vmem:[#allocation2 + $0xca] sm:$0xff] }
 0x12e   : > { %792 = vst [vmem:[#allocation2 + $0x151] sm:$0xff] %v720_v38  ;;  %v721_v49 = vmax.f32 %v675_v40, 0.0  ;;  %v9286_v40 = vpack.c.bf16 %v879_v34, %v878_v32 }
 0x12f   : > { %790 = vst [vmem:[#allocation2 + $0x139] sm:$0xff] %v718_v42  ;;  %v719_v52 = vmax.f32 %v667_v45, 0.0 }
 0x130   : > { %793 = vst [vmem:[#allocation2 + $0x159] sm:$0xff] %v721_v49  ;;  %v9250_v53 = vpack.c.bf16 %v721_v49, %v720_v38  ;;  %v913_v38 = vld [vmem:[#allocation2 + $0xf8] sm:$0xff]  ;;  %v915_v45 = vld [vmem:[#allocation2 + $0x110] sm:$0xff] }
 0x131   : > { %791 = vst [vmem:[#allocation2 + $0x141] sm:$0xff] %v719_v52  ;;  %v8331_v55 = vpop.f32.mrb[28].mxu0  ;;  %v9254_v56 = vpack.c.bf16 %v719_v52, %v718_v42  ;;  %v9289_v41 = vpack.c.bf16 %v913_v38, %v912_v36  ;;  %v914_v42 = vld [vmem:[#allocation2 + $0x108] sm:$0xff]  ;;  %v6886_v52 = vpop.f32.mrb[1].mxu1 }
 0x132   : > { %v688_v58 = vadd.f32 %v8331_v55, %v9109_v14  ;;  %v679_v59 = vpop.f32.mrb[29].mxu0  ;;  %v9294_v49 = vpack.c.bf16 %v915_v45, %v914_v42  ;;  %v9302_v55 = vadd.f32 %v6886_v52, %v6885_v51  ;;  %v884_v13 = vld [vmem:[#allocation2 + $0x10a] sm:$0xff] }
 0x133   : > { %1895 = vmatmul.mubr.bf16.gmra.mrb[24].mxu1 %v9242_v33  ;;  %v680_v60 = vadd.f32 %v9109_v14, %v679_v59  ;;  %v8332_v63 = vpop.f32.mrb[30].mxu0 }
 0x134   : > { %2048 = vmatmul.mubr.bf16.gmra.mrb[52].mxu0 %v9256_v48  ;;  %1902 = vmatprep.mubr.bf16.mxu1 %v9183_v37  ;;  %v724_v1 = vmax.f32 %v688_v58, 0.0  ;;  %v691_v4 = vadd.f32 %v8332_v63, %v9109_v14  ;;  %v682_v5 = vpop.f32.mrb[31].mxu0  ;;  %v6888_v58 = vpop.f32.mrb[2].mxu1  ;;  %v883_v63 = vld [vmem:[#allocation2 + $0xfa] sm:$0xff] }
 0x135   : > { %2055 = vmatprep.mubr.bf16.mxu0 %v9252_v54  ;;  %v722_v6 = vmax.f32 %v680_v60, 0.0  ;;  %v683_v7 = vadd.f32 %v9109_v14, %v682_v5  ;;  %v910_v14 = vld [vmem:[#allocation2 + $0xd8] sm:$0xff]  ;;  %v6889_v59 = vpop.f32.mrb[3].mxu1  ;;  %v917_v5 = vld [vmem:[#allocation2 + $0x128] sm:$0xff]  ;;  %v920_v24 = vld [vmem:[#allocation2 + $0x150] sm:$0xff] }
 0x136   : > { %796 = vst [vmem:[#allocation2 + $0x181] sm:$0xff] %v724_v1  ;;  %v725_v8 = vmax.f32 %v691_v4, 0.0  ;;  %v9278_v28 = vpack.c.bf16 %v911_v23, %v910_v14  ;;  %v882_v60 = vld [vmem:[#allocation2 + $0xf2] sm:$0xff]  ;;  %v916_v4 = vld [vmem:[#allocation2 + $0x120] sm:$0xff]  ;;  %v887_v23 = vld [vmem:[#allocation2 + $0x12a] sm:$0xff] }
 0x137   : > { %794 = vst [vmem:[#allocation2 + $0x169] sm:$0xff] %v722_v6  ;;  %v723_v16 = vmax.f32 %v683_v7, 0.0  ;;  %v9309_v7 = vpack.c.bf16 %v917_v5, %v916_v4  ;;  %v886_v14 = vld [vmem:[#allocation2 + $0x122] sm:$0xff]  ;;  %v921_v26 = vld [vmem:[#allocation2 + $0x158] sm:$0xff] }
 0x138   : > { %797 = vst [vmem:[#allocation2 + $0x189] sm:$0xff] %v725_v8  ;;  %v9266_v19 = vpack.c.bf16 %v725_v8, %v724_v1  ;;  %v9304_v1 = vadd.f32 %v6889_v59, %v6888_v58  ;;  %v918_v8 = vld [vmem:[#allocation2 + $0x138] sm:$0xff]  ;;  %v919_v11 = vld [vmem:[#allocation2 + $0x140] sm:$0xff]  ;;  %v9322_v32 = vpack.c.bf16 %v887_v23, %v886_v14  ;;  %v9325_v34 = vpack.c.bf16 %v921_v26, %v920_v24  ;;  %v8575_v24 = vld [vmem:[%s10974_s3 + $0x208] sm:$0xff]  }
 0x139   : > { %795 = vst [vmem:[#allocation2 + $0x171] sm:$0xff] %v723_v16  ;;  %v9268_v20 = vpack.c.bf16 %v723_v16, %v722_v6  ;;  %v9306_v6 = vpack.c.bf16 %v883_v63, %v882_v60  ;;  %v885_v16 = vld [vmem:[#allocation2 + $0x112] sm:$0xff]  ;;  %v9314_v17 = vpack.c.bf16 %v919_v11, %v918_v8  ;;  %v888_v42 = vld [vmem:[#allocation2 + $0x13a] sm:$0xff]  ;;  %v889_v45 = vld [vmem:[#allocation2 + $0x142] sm:$0xff] }
 0x13a   : > { %v9316_v18 = vpack.c.bf16 %v885_v16, %v884_v13  ;;  %v9332_v47 = vpack.c.bf16 %v889_v45, %v888_v42  ;;  %v890_v51 = vld [vmem:[#allocation2 + $0x152] sm:$0xff]  ;;  %v891_v52 = vld [vmem:[#allocation2 + $0x15a] sm:$0xff]  ;;  %v1028_v45 = vld [vmem:[#allocation2 + $0x69] sm:$0xff] }
 0x13b   : > { %1903 = vmatmul.mubr.bf16.gmra.mrb[28].mxu1 %v9252_v54  ;;  %v9338_v60 = vpack.c.bf16 %v891_v52, %v890_v51  ;;  %v927_v4 = vld [vmem:[#allocation2 + $0x21] sm:$0xff]  ;;  %v926_v11 = vld [vmem:[#allocation2 + $0x19] sm:$0xff]  ;;  %v1023_v23 = vld [vmem:[#allocation2 + $0x31] sm:$0xff] }
 0x13c   : > { %2056 = vmatmul.mubr.bf16.gmra.mrb[56].mxu0 %v9270_v21  ;;  %1910 = vmatprep.mubr.bf16.mxu1 %v9181_v35  ;;  %v1024_v13 = vld [vmem:[#allocation2 + $0x39] sm:$0xff]  ;;  %v1091_v16 = vpack.c.bf16 %v927_v4, %v926_v11  ;;  %v8579_v51 = vld [vmem:[%s10974_s3 + $0x228] sm:$0xff]  }
 0x13d   : > { %2063 = vmatprep.mubr.bf16.mxu0 %v9273_v22  ;;  %v924_v58 = vld [vmem:[#allocation2 + $0x180] sm:$0xff]  ;;  %v1094_v26 = vpack.c.bf16 %v1024_v13, %v1023_v23 }
 0x13e   : > { %v922_v36 = vld [vmem:[#allocation2 + $0x168] sm:$0xff] }
 0x13f   : > { %v925_v59 = vld [vmem:[#allocation2 + $0x188] sm:$0xff] }
 0x140   : > { %v923_v38 = vld [vmem:[#allocation2 + $0x170] sm:$0xff]  ;;  %v9341_v63 = vpack.c.bf16 %v925_v59, %v924_v58  ;;  %v988_v11 = vld [vmem:[#allocation2 + $0x182] sm:$0xff] }
 0x141   : > { %v9330_v46 = vpack.c.bf16 %v923_v38, %v922_v36  ;;  %v892_v5 = vld [vmem:[#allocation2 + $0x16a] sm:$0xff]  ;;  %v893_v8 = vld [vmem:[#allocation2 + $0x172] sm:$0xff] }
 0x142   : > { %v9346_v14 = vpack.c.bf16 %v893_v8, %v892_v5  ;;  %v1025_v36 = vld [vmem:[#allocation2 + $0x49] sm:$0xff]  ;;  %v8577_v38 = vld [vmem:[%s10974_s3 + $0x218] sm:$0xff]  }
 0x143   : > { %1911 = vmatmul.mubr.bf16.gmra.mrb[32].mxu1 %v9273_v22  ;;  %v1103_v42 = vpack.c.bf16 %v9125_v43, %v1025_v36  ;;  %v989_v13 = vld [vmem:[#allocation2 + $0x18a] sm:$0xff] }
 0x144   : > { %2064 = vmatmul.mubr.bf16.gmra.mrb[60].mxu0 %v9280_v31  ;;  %1918 = vmatprep.mubr.bf16.mxu1 %v9213_v0 }
 0x145   : > { %2071 = vmatprep.mubr.bf16.mxu0 %v9278_v28 }
 0x14b   : > { %1919 = vmatmul.mubr.bf16.gmra.mrb[36].mxu1 %v9278_v28 }
 0x14c   : > { %2072 = vmatmul.mubr.bf16.gmra.mrb[64].mxu0 %v9286_v40  ;;  %1926 = vmatprep.mubr.bf16.mxu1 %v9209_v61 }
 0x14d   : > { %2079 = vmatprep.mubr.bf16.mxu0 %v9289_v41 }
 0x153   : > { %1927 = vmatmul.mubr.bf16.gmra.mrb[40].mxu1 %v9289_v41 }
 0x154   : > { %2080 = vmatmul.mubr.bf16.gmra.mrb[68].mxu0 %v9296_v50  ;;  %1934 = vmatprep.mubr.bf16.mxu1 %v9236_v29 }
 0x155   : > { %2087 = vmatprep.mubr.bf16.mxu0 %v9294_v49 }
 0x15b   : > { %1935 = vmatmul.mubr.bf16.gmra.mrb[44].mxu1 %v9294_v49 }
 0x15c   : > { %2088 = vmatmul.mubr.bf16.gmra.mrb[72].mxu0 %v9306_v6  ;;  %1942 = vmatprep.mubr.bf16.mxu1 %v9234_v27 }
 0x15d   : > { %2095 = vmatprep.mubr.bf16.mxu0 %v9309_v7 }
 0x163   : > { %1943 = vmatmul.mubr.bf16.gmra.mrb[48].mxu1 %v9309_v7 }
 0x164   : > { %2096 = vmatmul.mubr.bf16.gmra.mrb[76].mxu0 %v9316_v18  ;;  %1950 = vmatprep.mubr.bf16.mxu1 %v9254_v56 }
 0x165   : > { %2103 = vmatprep.mubr.bf16.mxu0 %v9314_v17 }
 0x16b   : > { %1951 = vmatmul.mubr.bf16.gmra.mrb[52].mxu1 %v9314_v17 }
 0x16c   : > { %2104 = vmatmul.mubr.bf16.gmra.mrb[80].mxu0 %v9322_v32  ;;  %1958 = vmatprep.mubr.bf16.mxu1 %v9250_v53 }
 0x16d   : > { %2111 = vmatprep.mubr.bf16.mxu0 %v9325_v34 }
 0x173   : > { %1959 = vmatmul.mubr.bf16.gmra.mrb[56].mxu1 %v9325_v34 }
 0x174   : > { %2112 = vmatmul.mubr.bf16.gmra.mrb[84].mxu0 %v9332_v47  ;;  %1966 = vmatprep.mubr.bf16.mxu1 %v9268_v20 }
 0x175   : > { %2119 = vmatprep.mubr.bf16.mxu0 %v9330_v46 }
 0x17b   : > { %1967 = vmatmul.mubr.bf16.gmra.mrb[60].mxu1 %v9330_v46 }
 0x17c   : > { %2120 = vmatmul.mubr.bf16.gmra.mrb[88].mxu0 %v9338_v60  ;;  %2168 = vmatprep.mubr.bf16.mxu1 %v9163_v15  ;;  %v8576_v15 = vld [vmem:[%s10974_s3 + $0x210] sm:$0xff]  }
 0x17d   : > { %2127 = vmatprep.mubr.bf16.mxu0 %v9341_v63 }
 0x183   : > { %2169 = vmatmul.mubr.bf16.vlgmr.msra.gmra.mrb[64].mxu1 %v1091_v16 }
 0x184   : > { %2128 = vmatmul.mubr.bf16.gmra.mrb[92].mxu0 %v9346_v14  ;;  %8334 = vmatpush3.bf16.msra.mxu1 %v9118_v25  ;;  %v8578_v25 = vld [vmem:[%s10974_s3 + $0x220] sm:$0xff]  }
 0x185   : > { %2176 = vmatprep.mubr.bf16.mxu1 %v9188_v39  ;;  %2329 = vmatprep.mubr.bf16.mxu0 %v1094_v26  ;;  %v1027_v39 = vld [vmem:[#allocation2 + $0x61] sm:$0xff] }
 0x186   : > { %8335 = vmatprep.subr.bf16.mxu1 %v8575_v24  ;;  %v1112_v43 = vpack.c.bf16 %v1028_v45, %v1027_v39 }
 0x188   : > { %8336 = vmatpush3.bf16.msra.mxu1 %v8575_v24 }
 0x189   : > { %8337 = vmatprep.subr.bf16.mxu1 %v8576_v15 }
 0x18b   : > { %2177 = vmatmul.mubr.bf16.gmra.mrb[68].mxu1 %v1094_v26 }
 0x18c   : > { %2330 = vmatmul.mubr.bf16.vlgmr.msra.gmra.mrb[96].mxu0 %v9138_v57  ;;  %2184 = vmatprep.mubr.bf16.mxu1 %v9218_v3  ;;  %v8580_v57 = vld [vmem:[%s10974_s3 + $0x230] sm:$0xff]   ;;  %v8581_v3 = vld [vmem:[%s10974_s3 + $0x238] sm:$0xff]  }
 0x18d   : > { %2337 = vmatprep.mubr.bf16.mxu0 %v1103_v42  ;;  %8338 = vmatpush3.bf16.msra.mxu1 %v8576_v15 }
 0x18e   : > { %8339 = vmatprep.subr.bf16.mxu1 %v8577_v38 }
 0x191   : > { %8340 = vmatpush3.bf16.msra.mxu1 %v8577_v38 }
 0x192   : > { %8341 = vmatprep.subr.bf16.mxu1 %v8578_v25 }
 0x193   : > { %2185 = vmatmul.mubr.bf16.gmra.mrb[72].mxu1 %v1103_v42  ;;  %v8584_v42 = vld [vmem:[%s10976_s5 + $0x48] sm:$0xff]  }
 0x194   : > { %2338 = vmatmul.mubr.bf16.gmra.mrb[100].mxu0 %v9156_v10  ;;  %2192 = vmatprep.mubr.bf16.mxu1 %v9238_v30  ;;  %v936_v10 = vld [vmem:[#allocation2 + $0x91] sm:$0xff] }
 0x195   : > { %2345 = vmatprep.mubr.bf16.mxu0 %v1112_v43  ;;  %8342 = vmatpush3.bf16.msra.mxu1 %v8578_v25  ;;  %v1136_v30 = vpack.c.bf16 %v9147_v2, %v936_v10  ;;  %v9415_v2 = vld [vmem:[%s10975_s4] ss:$0 sm:$0xff]  ;;  %v1054_v10 = vld [vmem:[#allocation2 + $0x1a1] sm:$0xff] }
 0x196   : > { %8343 = vmatprep.subr.bf16.mxu1 %v8579_v51 }
 0x199   : > { %8344 = vmatpush3.bf16.msra.mxu1 %v8579_v51  ;;  %v8585_v51 = vld [vmem:[%s10976_s5 + $0x8] sm:$0xff]  }
 0x19a   : > { %8345 = vmatprep.subr.bf16.mxu1 %v8580_v57 }
 0x19b   : > { %2193 = vmatmul.mubr.bf16.gmra.mrb[76].mxu1 %v1112_v43 }
 0x19c   : > { %2346 = vmatmul.mubr.bf16.gmra.mrb[104].mxu0 %v9195_v44  ;;  %2200 = vmatprep.mubr.bf16.mxu1 %v9256_v48  ;;  %v8582_v48 = vld [vmem:[%s10976_s5 + $0x40] sm:$0xff]  }
 0x19d   : > { %2353 = vmatprep.mubr.bf16.mxu0 %v9158_v12  ;;  %8346 = vmatpush3.bf16.msra.mxu1 %v8580_v57 }
 0x19e   : > { %8347 = vmatprep.subr.bf16.mxu1 %v8581_v3  ;;  %7341 = vmatprep.subr.bf16.mxu0 %v8582_v48 }
 0x1a1   : > { %8348 = vmatpush3.bf16.msra.mxu1 %v8581_v3  ;;  %v1053_v3 = vld [vmem:[#allocation2 + $0x199] sm:$0xff] }
 0x1a3   : > { %2201 = vmatmul.mubr.bf16.gmra.mrb[80].mxu1 %v9158_v12 }
 0x1a4   : > { %2354 = vmatmul.mubr.bf16.gmra.mrb[108].mxu0 %v9211_v62  ;;  %2208 = vmatprep.mubr.bf16.mxu1 %v9270_v21  ;;  %v1849_v62 = vadd.f32 %v9302_v55, %v9415_v2  ;;  %v1852_v21 = vadd.f32 %v9304_v1, %v9415_v2 }
 0x1a5   : > { %2361 = vmatprep.mubr.bf16.mxu0 %v9154_v9 }
 0x1ab   : > { %2209 = vmatmul.mubr.bf16.gmra.mrb[84].mxu1 %v1136_v30 }
 0x1ac   : > { %2362 = vmatmul.mubr.bf16.gmra.mrb[112].mxu0 %v9242_v33  ;;  %2216 = vmatprep.mubr.bf16.mxu1 %v9280_v31  ;;  %v8583_v31 = vld [vmem:[%s10976_s5] sm:$0xff]  }
 0x1ad   : > { %2369 = vmatprep.mubr.bf16.mxu0 %v9183_v37  ;;  %7342 = vmatpush3.bf16.msra.mxu0 %v8583_v31 }
 0x1ae   : > { %7343 = vmatprep.subr.bf16.mxu0 %v8584_v42 }
 0x1b1   : > { %7344 = vmatpush3.bf16.msra.mxu0 %v8585_v51 }
 0x1b3   : > { %2217 = vmatmul.mubr.bf16.gmra.mrb[88].mxu1 %v9183_v37 }
 0x1b4   : > { %2370 = vmatmul.mubr.bf16.gmra.mrb[116].mxu0 %v9252_v54  ;;  %2224 = vmatprep.mubr.bf16.mxu1 %v9286_v40 }
 0x1b5   : > { %2377 = vmatprep.mubr.bf16.mxu0 %v9181_v35 }
 0x1bb   : > { %2225 = vmatmul.mubr.bf16.gmra.mrb[92].mxu1 %v9181_v35 }
 0x1bc   : > { %2378 = vmatmul.mubr.bf16.gmra.mrb[120].mxu0 %v9273_v22  ;;  %2232 = vmatprep.mubr.bf16.mxu1 %v9296_v50 }
 0x1bd   : > { %2385 = vmatprep.mubr.bf16.mxu0 %v9213_v0 }
 0x1c3   : > { %2233 = vmatmul.mubr.bf16.gmra.mrb[96].mxu1 %v9213_v0 }
 0x1c4   : > { %2386 = vmatmul.mubr.bf16.gmra.mrb[124].mxu0 %v9278_v28  ;;  %2240 = vmatprep.mubr.bf16.mxu1 %v9306_v6 }
 0x1c5   : > { %2393 = vmatprep.mubr.bf16.mxu0 %v9209_v61 }
 0x1cb   : > { %2241 = vmatmul.mubr.bf16.gmra.mrb[100].mxu1 %v9209_v61 }
 0x1cc   : > { %2394 = vmatmul.mubr.bf16.gmra.mrb[128].mxu0 %v9289_v41  ;;  %2248 = vmatprep.mubr.bf16.mxu1 %v9316_v18 }
 0x1cd   : > { %2401 = vmatprep.mubr.bf16.mxu0 %v9236_v29 }
 0x1d3   : > { %2249 = vmatmul.mubr.bf16.gmra.mrb[104].mxu1 %v9236_v29 }
 0x1d4   : > { %2402 = vmatmul.mubr.bf16.gmra.mrb[132].mxu0 %v9294_v49  ;;  %2256 = vmatprep.mubr.bf16.mxu1 %v9322_v32 }
 0x1d5   : > { %2409 = vmatprep.mubr.bf16.mxu0 %v9234_v27 }
 0x1db   : > { %2257 = vmatmul.mubr.bf16.gmra.mrb[108].mxu1 %v9234_v27 }
 0x1dc   : > { %2410 = vmatmul.mubr.bf16.gmra.mrb[136].mxu0 %v9309_v7  ;;  %2264 = vmatprep.mubr.bf16.mxu1 %v9332_v47 }
 0x1dd   : > { %2417 = vmatprep.mubr.bf16.mxu0 %v9254_v56 }
 0x1de   : > { %v6891_v9 = vpop.f32.mrb[4].mxu1 }
 0x1df   : > { %v6997_v12 = vpop.f32.mrb[32].mxu0  ;;  %v6892_v35 = vpop.f32.mrb[5].mxu1 }
 0x1e0   : > { %v6893_v37 = vadd.f32 %v6892_v35, %v6891_v9  ;;  %v6998_v44 = vpop.f32.mrb[33].mxu0  ;;  %v6894_v61 = vpop.f32.mrb[6].mxu1 }
 0x1e1   : > { %v6999_v0 = vadd.f32 %v6998_v44, %v6997_v12  ;;  %v7000_v27 = vpop.f32.mrb[34].mxu0  ;;  %v6895_v29 = vpop.f32.mrb[7].mxu1  ;;  %v1056_v12 = vld [vmem:[#allocation2 + $0x3a] sm:$0xff] }
 0x1e2   : > { %v6896_v33 = vadd.f32 %v6895_v29, %v6894_v61  ;;  %v7001_v54 = vpop.f32.mrb[35].mxu0  ;;  %v1857_v6 = vadd.f32 %v6893_v37, %v9415_v2 }
 0x1e3   : > { %v9424_v22 = vadd.f32 %v6999_v0, %v1849_v62  ;;  %v7002_v28 = vadd.f32 %v7001_v54, %v7000_v27  ;;  %2265 = vmatmul.mubr.bf16.gmra.mrb[112].mxu1 %v9254_v56  ;;  %v1229_v27 = vpack.c.bf16 %v1054_v10, %v1053_v3 }
 0x1e4   : > { %2418 = vmatmul.mubr.bf16.gmra.mrb[140].mxu0 %v9314_v17  ;;  %2272 = vmatprep.mubr.bf16.mxu1 %v9338_v60  ;;  %v1860_v52 = vadd.f32 %v6896_v33, %v9415_v2 }
 0x1e5   : > { %v9432_v40 = vadd.f32 %v7002_v28, %v1852_v21  ;;  %2425 = vmatprep.mubr.bf16.mxu0 %v9250_v53 }
 0x1e6   : > { %v6897_v41 = vpop.f32.mrb[8].mxu1 }
 0x1e7   : > { %v7003_v49 = vpop.f32.mrb[36].mxu0  ;;  %v6898_v50 = vpop.f32.mrb[9].mxu1 }
 0x1e8   : > { %v6899_v55 = vadd.f32 %v6898_v50, %v6897_v41  ;;  %v7004_v1 = vpop.f32.mrb[37].mxu0  ;;  %v6900_v56 = vpop.f32.mrb[10].mxu1  ;;  %v1058_v50 = vld [vmem:[#allocation2 + $0x52] sm:$0xff] }
 0x1e9   : > { %v7005_v7 = vadd.f32 %v7004_v1, %v7003_v49  ;;  %v7006_v17 = vpop.f32.mrb[38].mxu0  ;;  %v6901_v18 = vpop.f32.mrb[11].mxu1  ;;  %v1057_v49 = vld [vmem:[#allocation2 + $0x4a] sm:$0xff] }
 0x1ea   : > { %v6902_v32 = vadd.f32 %v6901_v18, %v6900_v56  ;;  %v7007_v47 = vpop.f32.mrb[39].mxu0  ;;  %v1865_v26 = vadd.f32 %v6899_v55, %v9415_v2  ;;  %v1059_v56 = vld [vmem:[#allocation2 + $0x62] sm:$0xff] }
 0x1eb   : > { %v9437_v58 = vadd.f32 %v7005_v7, %v1857_v6  ;;  %v7008_v59 = vadd.f32 %v7007_v47, %v7006_v17  ;;  %2273 = vmatmul.mubr.bf16.gmra.mrb[116].mxu1 %v9250_v53  ;;  %v1060_v6 = vld [vmem:[#allocation2 + $0x6a] sm:$0xff] }
 0x1ec   : > { %2426 = vmatmul.mubr.bf16.gmra.mrb[144].mxu0 %v9325_v34  ;;  %2280 = vmatprep.mubr.bf16.mxu1 %v9346_v14  ;;  %v9446_v14 = vpack.c.bf16 %v989_v13, %v988_v11  ;;  %v1868_v25 = vadd.f32 %v6902_v32, %v9415_v2  ;;  %v8726_v32 = vld [vmem:[#allocation2] sm:$0xff]  ;;  %v1113_v11 = vpack.c.bf16 %v1060_v6, %v1059_v56  ;;  %v8586_v13 = vld [vmem:[%s10976_s5 + $0x50] sm:$0xff]  }
 0x1ed   : > { %v9442_v60 = vadd.f32 %v7008_v59, %v1860_v52  ;;  %2433 = vmatprep.mubr.bf16.mxu0 %v9268_v20  ;;  %v9471_v47 = vpack.c.bf16 %v8726_v32, %v8726_v32  ;;  %7345 = vmatprep.subr.bf16.mxu0 %v8586_v13  ;;  %v1069_v13 = vld [vmem:[#allocation2 + $0xda] sm:$0xff] }
 0x1ee   : > { %v6903_v4 = vpop.f32.mrb[12].mxu1 }
 0x1ef   : > { %v7009_v5 = vpop.f32.mrb[40].mxu0  ;;  %v6904_v8 = vpop.f32.mrb[13].mxu1 }
 0x1f0   : > { %v6905_v16 = vadd.f32 %v6904_v8, %v6903_v4  ;;  %v7010_v23 = vpop.f32.mrb[41].mxu0  ;;  %v6906_v24 = vpop.f32.mrb[14].mxu1  ;;  %v1104_v4 = vpack.c.bf16 %v1058_v50, %v1057_v49 }
 0x1f1   : > { %v7011_v15 = vadd.f32 %v7010_v23, %v7009_v5  ;;  %v7012_v53 = vpop.f32.mrb[42].mxu0  ;;  %v6907_v36 = vpop.f32.mrb[15].mxu1 }
 0x1f2   : > { %v6908_v34 = vadd.f32 %v6907_v36, %v6906_v24  ;;  %v7013_v38 = vpop.f32.mrb[43].mxu0  ;;  %v1873_v44 = vadd.f32 %v6905_v16, %v9415_v2  ;;  %v1061_v36 = vld [vmem:[#allocation2 + $0x7a] sm:$0xff] }
 0x1f3   : > { %v9452_v39 = vadd.f32 %v7011_v15, %v1865_v26  ;;  %v7014_v45 = vadd.f32 %v7013_v38, %v7012_v53  ;;  %2281 = vmatmul.mubr.bf16.gmra.mrb[120].mxu1 %v9268_v20  ;;  %v1055_v20 = vld [vmem:[#allocation2 + $0x32] sm:$0xff] }
 0x1f4   : > { %2434 = vmatmul.mubr.bf16.gmra.mrb[148].mxu0 %v9330_v46  ;;  %2288 = vmatprep.mubr.bf16.mxu1 %v9446_v14  ;;  %v1095_v54 = vpack.c.bf16 %v1056_v12, %v1055_v20  ;;  %v1876_v48 = vadd.f32 %v6908_v34, %v9415_v2  ;;  %v8587_v26 = vld [vmem:[%s10976_s5 + $0x10] sm:$0xff]   ;;  %v1062_v34 = vld [vmem:[#allocation2 + $0x82] sm:$0xff] }
 0x1f5   : > { %v9460_v43 = vadd.f32 %v7014_v45, %v1868_v25  ;;  %2441 = vmatprep.mubr.bf16.mxu0 %v9266_v19  ;;  %7346 = vmatpush3.bf16.msra.mxu0 %v8587_v26  ;;  %v1063_v25 = vld [vmem:[#allocation2 + $0x92] sm:$0xff]  ;;  %v1064_v45 = vld [vmem:[#allocation2 + $0x9a] sm:$0xff]  ;;  %v1122_v12 = vpack.c.bf16 %v1062_v34, %v1061_v36 }
 0x1f6   : > { %v6909_v57 = vpop.f32.mrb[16].mxu1  ;;  %v1072_v36 = vld [vmem:[#allocation2 + $0xfa] sm:$0xff] }
 0x1f7   : > { %v7015_v30 = vpop.f32.mrb[44].mxu0  ;;  %v6910_v9 = vpop.f32.mrb[17].mxu1 }
 0x1f8   : > { %v6911_v46 = vadd.f32 %v6910_v9, %v6909_v57  ;;  %v7016_v35 = vpop.f32.mrb[45].mxu0  ;;  %v6912_v37 = vpop.f32.mrb[18].mxu1 }
 0x1f9   : > { %v7017_v61 = vadd.f32 %v7016_v35, %v7015_v30  ;;  %v7018_v62 = vpop.f32.mrb[46].mxu0  ;;  %v6913_v0 = vpop.f32.mrb[19].mxu1 }
 0x1fa   : > { %v6914_v29 = vadd.f32 %v6913_v0, %v6912_v37  ;;  %v7019_v33 = vpop.f32.mrb[47].mxu0  ;;  %v1131_v37 = vpack.c.bf16 %v1064_v45, %v1063_v25 }
 0x1fb   : > { %v9465_v21 = vadd.f32 %v7017_v61, %v1873_v44  ;;  %v7020_v28 = vadd.f32 %v7019_v33, %v7018_v62  ;;  %2289 = vmatmul.mubr.bf16.gmra.mrb[124].mxu1 %v9266_v19  ;;  %v1881_v19 = vadd.f32 %v6911_v46, %v9415_v2  ;;  %v1066_v33 = vld [vmem:[#allocation2 + $0xb2] sm:$0xff] }
 0x1fc   : > { %2442 = vmatmul.mubr.bf16.gmra.mrb[152].mxu0 %v9341_v63  ;;  %8349 = vmatprep.mubr.bf16.mxu1 %v1095_v54  ;;  %v1884_v16 = vadd.f32 %v6914_v29, %v9415_v2  ;;  %v1065_v29 = vld [vmem:[#allocation2 + $0xaa] sm:$0xff] }
 0x1fd   : > { %v9469_v31 = vadd.f32 %v7020_v28, %v1876_v48  ;;  %2449 = vmatprep.mubr.bf16.mxu0 %v1229_v27  ;;  %v1067_v28 = vld [vmem:[#allocation2 + $0xc2] sm:$0xff] }
 0x1fe   : > { %v6915_v41 = vpop.f32.mrb[20].mxu1 }
 0x1ff   : > { %v7021_v55 = vpop.f32.mrb[48].mxu0  ;;  %v6916_v1 = vpop.f32.mrb[21].mxu1 }
 0x200   : > { %v6917_v7 = vadd.f32 %v6916_v1, %v6915_v41  ;;  %v7022_v17 = vpop.f32.mrb[49].mxu0  ;;  %v6918_v18 = vpop.f32.mrb[22].mxu1  ;;  %v1068_v41 = vld [vmem:[#allocation2 + $0xca] sm:$0xff] }
 0x201   : > { %v7023_v63 = vadd.f32 %v7022_v17, %v7021_v55  ;;  %v7024_v52 = vpop.f32.mrb[50].mxu0  ;;  %v6919_v59 = vpop.f32.mrb[23].mxu1  ;;  %v1140_v17 = vpack.c.bf16 %v1066_v33, %v1065_v29  ;;  %v1075_v33 = vld [vmem:[#allocation2 + $0x122] sm:$0xff] }
 0x202   : > { %v6920_v5 = vadd.f32 %v6919_v59, %v6918_v18  ;;  %v7025_v8 = vpop.f32.mrb[51].mxu0  ;;  %v1889_v10 = vadd.f32 %v6917_v7, %v9415_v2 }
 0x203   : > { %v9478_v23 = vadd.f32 %v7023_v63, %v1881_v19  ;;  %v7026_v24 = vadd.f32 %v7025_v8, %v7024_v52  ;;  %8350 = vmatmul.mubr.bf16.vlgmr.msra.gmra.mrb[128].mxu1 %v1104_v4  ;;  %v1149_v19 = vpack.c.bf16 %v1068_v41, %v1067_v28  ;;  %v8588_v63 = vld [vmem:[%s10976_s5 + $0x58] sm:$0xff]  }
 0x204   : > { %2450 = vmatmul.mubr.bf16.gmra.mrb[156].mxu0 %v9471_v47  ;;  %8353 = vmatprep.mubr.bf16.mxu1 %v1113_v11  ;;  %v1892_v44 = vadd.f32 %v6920_v5, %v9415_v2  ;;  %v8589_v5 = vld [vmem:[%s10976_s5 + $0x18] sm:$0xff]  }
 0x205   : > { %v9484_v15 = vadd.f32 %v7026_v24, %v1884_v16  ;;  %7347 = vmatprep.subr.bf16.mxu0 %v8588_v63  ;;  %v1070_v16 = vld [vmem:[#allocation2 + $0xe2] sm:$0xff] }
 0x206   : > { %v6921_v53 = vpop.f32.mrb[24].mxu1  ;;  %7348 = vmatpush3.bf16.msra.mxu0 %v8589_v5 }
 0x207   : > { %v7027_v38 = vpop.f32.mrb[52].mxu0  ;;  %v6922_v42 = vpop.f32.mrb[25].mxu1 }
 0x208   : > { %v6923_v51 = vadd.f32 %v6922_v42, %v6921_v53  ;;  %v7028_v57 = vpop.f32.mrb[53].mxu0  ;;  %v6924_v3 = vpop.f32.mrb[26].mxu1  ;;  %v1071_v53 = vld [vmem:[#allocation2 + $0xf2] sm:$0xff] }
 0x209   : > { %v7029_v30 = vadd.f32 %v7028_v57, %v7027_v38  ;;  %v7030_v9 = vpop.f32.mrb[54].mxu0  ;;  %v6925_v20 = vpop.f32.mrb[27].mxu1 }
 0x20a   : > { %v6926_v46 = vadd.f32 %v6925_v20, %v6924_v3  ;;  %v7031_v35 = vpop.f32.mrb[55].mxu0  ;;  %v1897_v1 = vadd.f32 %v6923_v51, %v9415_v2  ;;  %v1158_v3 = vpack.c.bf16 %v1070_v16, %v1069_v13  ;;  %v1078_v13 = vld [vmem:[#allocation2 + $0x142] sm:$0xff] }
 0x20b   : > { %v9488_v61 = vadd.f32 %v7029_v30, %v1889_v10  ;;  %v7032_v62 = vadd.f32 %v7031_v35, %v7030_v9  ;;  %8354 = vmatmul.mubr.bf16.gmra.mrb[132].mxu1 %v1122_v12  ;;  %v1167_v9 = vpack.c.bf16 %v1072_v36, %v1071_v53  ;;  %v1080_v53 = vld [vmem:[#allocation2 + $0x15a] sm:$0xff] }
 0x20c   : > { %8357 = vmatprep.mubr.bf16.mxu1 %v1131_v37  ;;  %v1900_v52 = vadd.f32 %v6926_v46, %v9415_v2 }
 0x20d   : > { %v9490_v0 = vadd.f32 %v7032_v62, %v1892_v44  ;;  %v1073_v44 = vld [vmem:[#allocation2 + $0x10a] sm:$0xff]  ;;  %v1074_v62 = vld [vmem:[#allocation2 + $0x112] sm:$0xff] }
 0x20e   : > { %v6927_v27 = vpop.f32.mrb[28].mxu1 }
 0x20f   : > { %v7033_v54 = vpop.f32.mrb[56].mxu0  ;;  %v6928_v48 = vpop.f32.mrb[29].mxu1 }
 0x210   : > { %v6929_v49 = vadd.f32 %v6928_v48, %v6927_v27  ;;  %v7034_v50 = vpop.f32.mrb[57].mxu0  ;;  %v6930_v55 = vpop.f32.mrb[30].mxu1 }
 0x211   : > { %v7035_v56 = vadd.f32 %v7034_v50, %v7033_v54  ;;  %v7036_v6 = vpop.f32.mrb[58].mxu0  ;;  %v6931_v7 = vpop.f32.mrb[31].mxu1  ;;  %v1076_v54 = vld [vmem:[#allocation2 + $0x12a] sm:$0xff] }
 0x212   : > { %v6932_v18 = vadd.f32 %v6931_v7, %v6930_v55  ;;  %v7037_v32 = vpop.f32.mrb[59].mxu0  ;;  %v1905_v25 = vadd.f32 %v6929_v49, %v9415_v2 }
 0x213   : > { %v9497_v59 = vadd.f32 %v7035_v56, %v1897_v1  ;;  %v7038_v4 = vadd.f32 %v7037_v32, %v7036_v6  ;;  %8358 = vmatmul.mubr.bf16.gmra.mrb[136].mxu1 %v1140_v17  ;;  %v1176_v56 = vpack.c.bf16 %v1074_v62, %v1073_v44  ;;  %v1185_v17 = vpack.c.bf16 %v1076_v54, %v1075_v33  ;;  %v1081_v62 = vld [vmem:[#allocation2 + $0x16a] sm:$0xff] }
 0x214   : > { %8361 = vmatprep.mubr.bf16.mxu1 %v1149_v19  ;;  %v1908_v20 = vadd.f32 %v6932_v18, %v9415_v2  ;;  %v8590_v18 = vld [vmem:[%s10976_s5 + $0x60] sm:$0xff]  }
 0x215   : > { %v9502_v8 = vadd.f32 %v7038_v4, %v1900_v52  ;;  %7349 = vmatprep.subr.bf16.mxu0 %v8590_v18  ;;  %v8591_v52 = vld [vmem:[%s10976_s5 + $0x20] sm:$0xff]  }
 0x216   : > { %v6933_v11 = vpop.f32.mrb[32].mxu1  ;;  %7350 = vmatpush3.bf16.msra.mxu0 %v8591_v52  ;;  %v1086_v52 = vld [vmem:[#allocation2 + $0x1a2] sm:$0xff] }
 0x217   : > { %v7039_v24 = vpop.f32.mrb[60].mxu0  ;;  %v6934_v26 = vpop.f32.mrb[33].mxu1 }
 0x218   : > { %v6935_v34 = vadd.f32 %v6934_v26, %v6933_v11  ;;  %v7040_v38 = vpop.f32.mrb[61].mxu0  ;;  %v6936_v42 = vpop.f32.mrb[34].mxu1  ;;  %v1077_v11 = vld [vmem:[#allocation2 + $0x13a] sm:$0xff]  ;;  %v1079_v26 = vld [vmem:[#allocation2 + $0x152] sm:$0xff] }
 0x219   : > { %v7041_v45 = vadd.f32 %v7040_v38, %v7039_v24  ;;  %v7042_v51 = vpop.f32.mrb[62].mxu0  ;;  %v6937_v57 = vpop.f32.mrb[35].mxu1 }
 0x21a   : > { %v6938_v10 = vadd.f32 %v6937_v57, %v6936_v42  ;;  %v7043_v30 = vpop.f32.mrb[63].mxu0  ;;  %v1913_v49 = vadd.f32 %v6935_v34, %v9415_v2  ;;  %v1194_v57 = vpack.c.bf16 %v1078_v13, %v1077_v11 }
 0x21b   : > { %v9506_v12 = vadd.f32 %v7041_v45, %v1905_v25  ;;  %v7044_v46 = vadd.f32 %v7043_v30, %v7042_v51  ;;  %8362 = vmatmul.mubr.bf16.gmra.mrb[140].mxu1 %v1158_v3  ;;  %v1203_v30 = vpack.c.bf16 %v1080_v53, %v1079_v26 }
 0x21c   : > { %8365 = vmatprep.mubr.bf16.mxu1 %v1167_v9  ;;  %v1916_v32 = vadd.f32 %v6938_v10, %v9415_v2 }
 0x21d   : > { %v9508_v35 = vadd.f32 %v7044_v46, %v1908_v20 }
 0x21e   : > { %v6939_v37 = vpop.f32.mrb[36].mxu1 }
 0x21f   : > { %v7045_v27 = vpop.f32.mrb[64].mxu0  ;;  %v6940_v29 = vpop.f32.mrb[37].mxu1 }
 0x220   : > { %v6941_v48 = vadd.f32 %v6940_v29, %v6939_v37  ;;  %v7046_v28 = vpop.f32.mrb[65].mxu0  ;;  %v6942_v41 = vpop.f32.mrb[38].mxu1 }
 0x221   : > { %v7047_v50 = vadd.f32 %v7046_v28, %v7045_v27  ;;  %v7048_v55 = vpop.f32.mrb[66].mxu0  ;;  %v6943_v1 = vpop.f32.mrb[39].mxu1  ;;  %v1082_v27 = vld [vmem:[#allocation2 + $0x172] sm:$0xff] }
 0x222   : > { %v6944_v6 = vadd.f32 %v6943_v1, %v6942_v41  ;;  %v7049_v7 = vpop.f32.mrb[67].mxu0  ;;  %v1921_v42 = vadd.f32 %v6941_v48, %v9415_v2  ;;  %v1212_v1 = vpack.c.bf16 %v1082_v27, %v1081_v62 }
 0x223   : > { %v9515_v19 = vadd.f32 %v7047_v50, %v1913_v49  ;;  %v7050_v63 = vadd.f32 %v7049_v7, %v7048_v55  ;;  %8366 = vmatmul.mubr.bf16.gmra.mrb[144].mxu1 %v1176_v56  ;;  %v8592_v7 = vld [vmem:[%s10976_s5 + $0x68] sm:$0xff]  }
 0x224   : > { %8369 = vmatprep.mubr.bf16.mxu1 %v1185_v17  ;;  %v1924_v9 = vadd.f32 %v6944_v6, %v9415_v2  ;;  %7351 = vmatprep.subr.bf16.mxu0 %v8592_v7 }
 0x225   : > { %v9520_v4 = vadd.f32 %v7050_v63, %v1916_v32  ;;  %v1085_v63 = vld [vmem:[#allocation2 + $0x19a] sm:$0xff] }
 0x226   : > { %v6945_v5 = vpop.f32.mrb[40].mxu1  ;;  %v1230_v26 = vpack.c.bf16 %v1086_v52, %v1085_v63 }
 0x227   : > { %v7051_v16 = vpop.f32.mrb[68].mxu0  ;;  %v6946_v24 = vpop.f32.mrb[41].mxu1 }
 0x228   : > { %v6947_v36 = vadd.f32 %v6946_v24, %v6945_v5  ;;  %v7052_v34 = vpop.f32.mrb[69].mxu0  ;;  %v6948_v38 = vpop.f32.mrb[42].mxu1  ;;  %v8593_v5 = vld [vmem:[%s10976_s5 + $0x28] sm:$0xff]  }
 0x229   : > { %v7053_v25 = vadd.f32 %v7052_v34, %v7051_v16  ;;  %v7054_v45 = vpop.f32.mrb[70].mxu0  ;;  %v6949_v51 = vpop.f32.mrb[43].mxu1  ;;  %7352 = vmatpush3.bf16.msra.mxu0 %v8593_v5 }
 0x22a   : > { %v6950_v3 = vadd.f32 %v6949_v51, %v6948_v38  ;;  %v7055_v10 = vpop.f32.mrb[71].mxu0  ;;  %v1929_v41 = vadd.f32 %v6947_v36, %v9415_v2 }
 0x22b   : > { %v9524_v20 = vadd.f32 %v7053_v25, %v1921_v42  ;;  %v7056_v46 = vadd.f32 %v7055_v10, %v7054_v45  ;;  %8370 = vmatmul.mubr.bf16.gmra.mrb[148].mxu1 %v1194_v57 }
 0x22c   : > { %8373 = vmatprep.mubr.bf16.mxu1 %v1203_v30  ;;  %v1932_v17 = vadd.f32 %v6950_v3, %v9415_v2 }
 0x22d   : > { %v9526_v37 = vadd.f32 %v7056_v46, %v1924_v9 }
 0x22e   : > { %v6951_v44 = vpop.f32.mrb[44].mxu1 }
 0x22f   : > { %v7057_v29 = vpop.f32.mrb[72].mxu0  ;;  %v6952_v33 = vpop.f32.mrb[45].mxu1 }
 0x230   : > { %v6953_v54 = vadd.f32 %v6952_v33, %v6951_v44  ;;  %v7058_v48 = vpop.f32.mrb[73].mxu0  ;;  %v6954_v28 = vpop.f32.mrb[46].mxu1 }
 0x231   : > { %v7059_v49 = vadd.f32 %v7058_v48, %v7057_v29  ;;  %v7060_v50 = vpop.f32.mrb[74].mxu0  ;;  %v6955_v55 = vpop.f32.mrb[47].mxu1 }
 0x232   : > { %v6956_v56 = vadd.f32 %v6955_v55, %v6954_v28  ;;  %v7061_v6 = vpop.f32.mrb[75].mxu0  ;;  %v1937_v38 = vadd.f32 %v6953_v54, %v9415_v2 }
 0x233   : > { %v9533_v18 = vadd.f32 %v7059_v49, %v1929_v41  ;;  %v7062_v32 = vadd.f32 %v7061_v6, %v7060_v50  ;;  %8374 = vmatmul.mubr.bf16.gmra.mrb[152].mxu1 %v1212_v1  ;;  %v8594_v50 = vld [vmem:[%s10976_s5 + $0x70] sm:$0xff]  }
 0x234   : > { %8377 = vmatprep.mubr.bf16.mxu1 %v9446_v14  ;;  %v1940_v57 = vadd.f32 %v6956_v56, %v9415_v2  ;;  %7353 = vmatprep.subr.bf16.mxu0 %v8594_v50  ;;  %v8595_v6 = vld [vmem:[%s10976_s5 + $0x30] sm:$0xff]   ;;  %v8600_v50 = vld [vmem:[%s10976_s5 + $0x78] sm:$0xff]  }
 0x235   : > { %v9539_v11 = vadd.f32 %v7062_v32, %v1932_v17  ;;  %7354 = vmatpush3.bf16.msra.mxu0 %v8595_v6 }
 0x236   : > { %v6957_v13 = vpop.f32.mrb[48].mxu1  ;;  %7355 = vmatprep.subr.bf16.mxu0 %v8600_v50 }
 0x237   : > { %v7063_v16 = vpop.f32.mrb[76].mxu0  ;;  %v6958_v24 = vpop.f32.mrb[49].mxu1 }
 0x238   : > { %v6959_v53 = vadd.f32 %v6958_v24, %v6957_v13  ;;  %v7064_v36 = vpop.f32.mrb[77].mxu0  ;;  %v6960_v34 = vpop.f32.mrb[50].mxu1 }
 0x239   : > { %v7065_v14 = vadd.f32 %v7064_v36, %v7063_v16  ;;  %v7066_v42 = vpop.f32.mrb[78].mxu0  ;;  %v6961_v25 = vpop.f32.mrb[51].mxu1 }
 0x23a   : > { %v6962_v45 = vadd.f32 %v6961_v25, %v6960_v34  ;;  %v7067_v51 = vpop.f32.mrb[79].mxu0  ;;  %v1945_v33 = vadd.f32 %v6959_v53, %v9415_v2 }
 0x23b   : > { %v9543_v3 = vadd.f32 %v7065_v14, %v1937_v38  ;;  %v7068_v10 = vadd.f32 %v7067_v51, %v7066_v42  ;;  %8378 = vmatmul.mubr.bf16.gmra.mrb[156].mxu1 %v1230_v26  ;;  %v8596_v38 = vld [vmem:[%s10976_s5 + $0xc0] sm:$0xff]   ;;  %v8598_v51 = vld [vmem:[%s10976_s5 + $0xc8] sm:$0xff]  }
 0x23c   : > { %v1948_v55 = vadd.f32 %v6962_v45, %v9415_v2  ;;  %v8597_v45 = vld [vmem:[%s10976_s5 + $0x80] sm:$0xff]   ;;  %7453 = vmatprep.subr.bf16.mxu1 %v8596_v38 }
 0x23d   : > { %v9545_v30 = vadd.f32 %v7068_v10, %v1940_v57  ;;  %7454 = vmatpush3.bf16.msra.mxu1 %v8597_v45 }
 0x23e   : > { %v6963_v9 = vpop.f32.mrb[52].mxu1  ;;  %7455 = vmatprep.subr.bf16.mxu1 %v8598_v51 }
 0x23f   : > { %v7069_v46 = vpop.f32.mrb[80].mxu0  ;;  %v6964_v44 = vpop.f32.mrb[53].mxu1 }
 0x240   : > { %v6965_v62 = vadd.f32 %v6964_v44, %v6963_v9  ;;  %v7070_v27 = vpop.f32.mrb[81].mxu0  ;;  %v6966_v29 = vpop.f32.mrb[54].mxu1  ;;  %v8599_v44 = vld [vmem:[%s10976_s5 + $0x88] sm:$0xff]  }
 0x241   : > { %v7071_v54 = vadd.f32 %v7070_v27, %v7069_v46  ;;  %v7072_v48 = vpop.f32.mrb[82].mxu0  ;;  %v6967_v28 = vpop.f32.mrb[55].mxu1  ;;  %7456 = vmatpush3.bf16.msra.mxu1 %v8599_v44 }
 0x242   : > { %v6968_v41 = vadd.f32 %v6967_v28, %v6966_v29  ;;  %v7073_v49 = vpop.f32.mrb[83].mxu0  ;;  %v1953_v16 = vadd.f32 %v6965_v62, %v9415_v2 }
 0x243   : > { %v9552_v1 = vadd.f32 %v7071_v54, %v1945_v33  ;;  %v7074_v56 = vadd.f32 %v7073_v49, %v7072_v48 }
 0x244   : > { %v1956_v14 = vadd.f32 %v6968_v41, %v9415_v2 }
 0x245   : > { %v9557_v7 = vadd.f32 %v7074_v56, %v1948_v55  ;;  %v8602_v55 = vld [vmem:[%s10976_s5 + $0xd0] sm:$0xff]  }
 0x246   : > { %v6969_v17 = vpop.f32.mrb[56].mxu1  ;;  %7457 = vmatprep.subr.bf16.mxu1 %v8602_v55  ;;  %v8609_v55 = vld [vmem:[%s10976_s5 + $0xa8] sm:$0xff]  }
 0x247   : > { %v7075_v32 = vpop.f32.mrb[84].mxu0  ;;  %v6970_v63 = vpop.f32.mrb[57].mxu1 }
 0x248   : > { %v6971_v52 = vadd.f32 %v6970_v63, %v6969_v17  ;;  %v7076_v5 = vpop.f32.mrb[85].mxu0  ;;  %v6972_v13 = vpop.f32.mrb[58].mxu1  ;;  %v8601_v63 = vld [vmem:[%s10976_s5 + $0x38] sm:$0xff]  }
 0x249   : > { %v7077_v24 = vadd.f32 %v7076_v5, %v7075_v32  ;;  %v7078_v26 = vpop.f32.mrb[86].mxu0  ;;  %v6973_v53 = vpop.f32.mrb[59].mxu1  ;;  %v8603_v32 = vld [vmem:[%s10976_s5 + $0x90] sm:$0xff]   ;;  %7356 = vmatpush3.bf16.msra.mxu0 %v8601_v63 }
 0x24a   : > { %v6974_v36 = vadd.f32 %v6973_v53, %v6972_v13  ;;  %v7079_v34 = vpop.f32.mrb[87].mxu0  ;;  %v1961_v33 = vadd.f32 %v6971_v52, %v9415_v2  ;;  %v8604_v52 = vld [vmem:[%s10976_s5 + $0xd8] sm:$0xff]   ;;  %7458 = vmatpush3.bf16.msra.mxu1 %v8603_v32 }
 0x24b   : > { %v9564_v42 = vadd.f32 %v7077_v24, %v1953_v16  ;;  %v7080_v25 = vadd.f32 %v7079_v34, %v7078_v26  ;;  %7459 = vmatprep.subr.bf16.mxu1 %v8604_v52  ;;  %v8605_v26 = vld [vmem:[%s10976_s5 + $0x98] sm:$0xff]  }
 0x24c   : > { %v1964_v56 = vadd.f32 %v6974_v36, %v9415_v2 }
 0x24d   : > { %v9572_v57 = vadd.f32 %v7080_v25, %v1956_v14 }
 0x24e   : > { %v6975_v10 = vpop.f32.mrb[60].mxu1  ;;  %7460 = vmatpush3.bf16.msra.mxu1 %v8605_v26  ;;  %v8611_v26 = vld [vmem:[%s10976_s5 + $0xf0] sm:$0xff]  }
 0x24f   : > { %v7081_v9 = vpop.f32.mrb[88].mxu0  ;;  %v6976_v46 = vpop.f32.mrb[61].mxu1 }
 0x250   : > { %v6977_v62 = vadd.f32 %v6976_v46, %v6975_v10  ;;  %v7082_v27 = vpop.f32.mrb[89].mxu0  ;;  %v6978_v29 = vpop.f32.mrb[62].mxu1  ;;  %v8606_v46 = vld [vmem:[%s10976_s5 + $0xe0] sm:$0xff]  }
 0x251   : > { %v7083_v54 = vadd.f32 %v7082_v27, %v7081_v9  ;;  %v7084_v48 = vpop.f32.mrb[90].mxu0  ;;  %v6979_v28 = vpop.f32.mrb[63].mxu1  ;;  %7461 = vmatprep.subr.bf16.mxu1 %v8606_v46 }
 0x252   : > { %v6980_v41 = vadd.f32 %v6979_v28, %v6978_v29  ;;  %v7085_v49 = vpop.f32.mrb[91].mxu0  ;;  %v1969_v38 = vadd.f32 %v6977_v62, %v9415_v2  ;;  %v8607_v62 = vld [vmem:[%s10976_s5 + $0xa0] sm:$0xff]  }
 0x253   : > { %v9585_v6 = vadd.f32 %v7083_v54, %v1961_v33  ;;  %v7086_v17 = vadd.f32 %v7085_v49, %v7084_v48  ;;  %v2755_v54 = vld [vmem:[#allocation3 + $0x1] sm:$0xff]  ;;  %7462 = vmatpush3.bf16.msra.mxu1 %v8607_v62 }
 0x254   : > { %v1972_v44 = vadd.f32 %v6980_v41, %v9415_v2  ;;  %v8608_v2 = vld [vmem:[%s10976_s5 + $0xe8] sm:$0xff]  }
 0x255   : > { %v9596_v5 = vadd.f32 %v7086_v17, %v1964_v56  ;;  %7463 = vmatprep.subr.bf16.mxu1 %v8608_v2 }
 0x256   : > { %v7109_v13 = vpop.f32.mrb[64].mxu1 }
 0x257   : > { %v7087_v16 = vpop.f32.mrb[92].mxu0  ;;  %v7110_v24 = vpop.f32.mrb[65].mxu1  ;;  %7464 = vmatpush3.bf16.msra.mxu1 %v8609_v55  ;;  %v8612_v55 = vld [vmem:[%s10976_s5 + $0x100] sm:$0xff]  }
 0x258   : > { %v7088_v53 = vpop.f32.mrb[93].mxu0  ;;  %v7111_v36 = vadd.f32 %v7110_v24, %v7109_v13  ;;  %v7112_v34 = vpop.f32.mrb[66].mxu1  ;;  %7465 = vmatprep.subr.bf16.mxu1 %v8611_v26 }
 0x259   : > { %v7089_v14 = vadd.f32 %v7088_v53, %v7087_v16  ;;  %v7090_v25 = vpop.f32.mrb[94].mxu0  ;;  %v7113_v45 = vpop.f32.mrb[67].mxu1 }
 0x25a   : > { %v2171_v51 = vadd.f32 %v7111_v36, %v9424_v22  ;;  %v7091_v10 = vpop.f32.mrb[95].mxu0  ;;  %v7114_v9 = vadd.f32 %v7113_v45, %v7112_v34  ;;  %v2756_v22 = vld [vmem:[#allocation3 + $0x9] sm:$0xff]  ;;  %v8613_v34 = vld [vmem:[%s10976_s5 + $0xb0] sm:$0xff]  }
 0x25b   : > { %v9607_v27 = vadd.f32 %v7089_v14, %v1969_v38  ;;  %v7092_v29 = vadd.f32 %v7091_v10, %v7090_v25  ;;  %v3013_v28 = vpack.c.bf16 %v2756_v22, %v2755_v54  ;;  %7466 = vmatpush3.bf16.msra.mxu1 %v8613_v34  ;;  %v8614_v25 = vld [vmem:[%s10976_s5 + $0xf8] sm:$0xff]  }
 0x25c   : > { %v2174_v33 = vadd.f32 %v7114_v9, %v9432_v40  ;;  %7467 = vmatprep.subr.bf16.mxu1 %v8614_v25  ;;  %v8617_v25 = vld [vmem:[%s10976_s5 + $0x108] sm:$0xff]  }
 0x25d   : > { %v9613_v48 = vadd.f32 %v7092_v29, %v1972_v44  ;;  %3771 = vmatprep.mubr.bf16.mxu0 %v3013_v28 }
 0x25e   : > { %v7115_v49 = vpop.f32.mrb[68].mxu1  ;;  %3772 = vmatmul.mubr.bf16.vlgmr.msra.gmra.mrb[160].mxu0 %v9471_v47 }
 0x25f   : > { %v7221_v41 = vpop.f32.mrb[96].mxu0  ;;  %v7116_v50 = vpop.f32.mrb[69].mxu1 }
 0x260   : > { %v7117_v40 = vadd.f32 %v7116_v50, %v7115_v49  ;;  %v7222_v56 = vpop.f32.mrb[97].mxu0  ;;  %v7118_v17 = vpop.f32.mrb[70].mxu1 }
 0x261   : > { %v7223_v32 = vadd.f32 %v7222_v56, %v7221_v41  ;;  %v7224_v63 = vpop.f32.mrb[98].mxu0  ;;  %v7119_v52 = vpop.f32.mrb[71].mxu1 }
 0x262   : > { %v2179_v13 = vadd.f32 %v7117_v40, %v9437_v58  ;;  %v7120_v16 = vadd.f32 %v7119_v52, %v7118_v17  ;;  %v7225_v24 = vpop.f32.mrb[99].mxu0  ;;  %v8610_v58 = vld [vmem:[%s10976_s5 + $0x140] sm:$0xff]  }
 0x263   : > { %v7226_v53 = vadd.f32 %v7225_v24, %v7224_v63  ;;  %v9626_v36 = vadd.f32 %v7223_v32, %v2171_v51  ;;  %7565 = vmatprep.subr.bf16.mxu0 %v8610_v58  ;;  %v8616_v58 = vld [vmem:[%s10976_s5 + $0x148] sm:$0xff]  }
 0x264   : > { %v2182_v47 = vadd.f32 %v7120_v16, %v9442_v60  ;;  %v8615_v60 = vld [vmem:[%s10976_s5 + $0xb8] sm:$0xff]   ;;  %7566 = vmatpush3.bf16.msra.mxu0 %v8612_v55 }
 0x265   : > { %v9632_v38 = vadd.f32 %v7226_v53, %v2174_v33  ;;  %7468 = vmatpush3.bf16.msra.mxu1 %v8615_v60  ;;  %7567 = vmatprep.subr.bf16.mxu0 %v8616_v58  ;;  %v8619_v58 = vld [vmem:[%s10976_s5 + $0x110] sm:$0xff]  }
 0x266   : > { %v7121_v14 = vpop.f32.mrb[72].mxu1 }
 0x267   : > { %v7227_v45 = vpop.f32.mrb[100].mxu0  ;;  %v7122_v51 = vpop.f32.mrb[73].mxu1 }
 0x268   : > { %v7123_v10 = vadd.f32 %v7122_v51, %v7121_v14  ;;  %v7228_v9 = vpop.f32.mrb[101].mxu0  ;;  %v7124_v46 = vpop.f32.mrb[74].mxu1  ;;  %7568 = vmatpush3.bf16.msra.mxu0 %v8617_v25 }
 0x269   : > { %v7229_v44 = vadd.f32 %v7228_v9, %v7227_v45  ;;  %v7230_v29 = vpop.f32.mrb[102].mxu0  ;;  %v7125_v62 = vpop.f32.mrb[75].mxu1 }
 0x26a   : > { %v2187_v33 = vadd.f32 %v7123_v10, %v9452_v39  ;;  %v7126_v54 = vadd.f32 %v7125_v62, %v7124_v46  ;;  %v7231_v22 = vpop.f32.mrb[103].mxu0 }
 0x26b   : > { %v7232_v28 = vadd.f32 %v7231_v22, %v7230_v29  ;;  %v9644_v49 = vadd.f32 %v7229_v44, %v2179_v13 }
 0x26c   : > { %v2190_v2 = vadd.f32 %v7126_v54, %v9460_v43 }
 0x26d   : > { %v9647_v41 = vadd.f32 %v7232_v28, %v2182_v47 }
 0x26e   : > { %v7127_v50 = vpop.f32.mrb[76].mxu1 }
 0x26f   : > { %v7233_v40 = vpop.f32.mrb[104].mxu0  ;;  %v7128_v56 = vpop.f32.mrb[77].mxu1 }
 0x270   : > { %v7129_v17 = vadd.f32 %v7128_v56, %v7127_v50  ;;  %v7234_v32 = vpop.f32.mrb[105].mxu0  ;;  %v7130_v63 = vpop.f32.mrb[78].mxu1 }
 0x271   : > { %v7235_v39 = vadd.f32 %v7234_v32, %v7233_v40  ;;  %v7236_v52 = vpop.f32.mrb[106].mxu0  ;;  %v7131_v16 = vpop.f32.mrb[79].mxu1 }
 0x272   : > { %v2195_v13 = vadd.f32 %v7129_v17, %v9465_v21  ;;  %v7132_v24 = vadd.f32 %v7131_v16, %v7130_v63  ;;  %v7237_v43 = vpop.f32.mrb[107].mxu0 }
 0x273   : > { %v7238_v26 = vadd.f32 %v7237_v43, %v7236_v52  ;;  %v9653_v53 = vadd.f32 %v7235_v39, %v2187_v33 }
 0x274   : > { %v2198_v34 = vadd.f32 %v7132_v24, %v9469_v31 }
 0x275   : > { %v9656_v47 = vadd.f32 %v7238_v26, %v2190_v2  ;;  %v8618_v26 = vld [vmem:[%s10976_s5 + $0x150] sm:$0xff]  }
 0x276   : > { %v7133_v14 = vpop.f32.mrb[80].mxu1  ;;  %7569 = vmatprep.subr.bf16.mxu0 %v8618_v26  ;;  %v8621_v26 = vld [vmem:[%s10976_s5 + $0x118] sm:$0xff]  }
 0x277   : > { %v7239_v45 = vpop.f32.mrb[108].mxu0  ;;  %v7134_v21 = vpop.f32.mrb[81].mxu1  ;;  %7570 = vmatpush3.bf16.msra.mxu0 %v8619_v58 }
 0x278   : > { %v7135_v51 = vadd.f32 %v7134_v21, %v7133_v14  ;;  %v7240_v60 = vpop.f32.mrb[109].mxu0  ;;  %v7136_v10 = vpop.f32.mrb[82].mxu1 }
 0x279   : > { %v7241_v9 = vadd.f32 %v7240_v60, %v7239_v45  ;;  %v7242_v31 = vpop.f32.mrb[110].mxu0  ;;  %v7137_v46 = vpop.f32.mrb[83].mxu1 }
 0x27a   : > { %v2203_v44 = vadd.f32 %v7135_v51, %v9478_v23  ;;  %v7138_v29 = vadd.f32 %v7137_v46, %v7136_v10  ;;  %v7243_v62 = vpop.f32.mrb[111].mxu0 }
 0x27b   : > { %v7244_v33 = vadd.f32 %v7243_v62, %v7242_v31  ;;  %v9665_v54 = vadd.f32 %v7241_v9, %v2195_v13 }
 0x27c   : > { %v2206_v22 = vadd.f32 %v7138_v29, %v9484_v15 }
 0x27d   : > { %v9668_v28 = vadd.f32 %v7244_v33, %v2198_v34 }
 0x27e   : > { %v7139_v2 = vpop.f32.mrb[84].mxu1 }
 0x27f   : > { %v7245_v50 = vpop.f32.mrb[112].mxu0  ;;  %v7140_v55 = vpop.f32.mrb[85].mxu1 }
 0x280   : > { %v7141_v40 = vadd.f32 %v7140_v55, %v7139_v2  ;;  %v7246_v56 = vpop.f32.mrb[113].mxu0  ;;  %v7142_v17 = vpop.f32.mrb[86].mxu1 }
 0x281   : > { %v7247_v32 = vadd.f32 %v7246_v56, %v7245_v50  ;;  %v7248_v63 = vpop.f32.mrb[114].mxu0  ;;  %v7143_v39 = vpop.f32.mrb[87].mxu1 }
 0x282   : > { %v2211_v23 = vadd.f32 %v7141_v40, %v9488_v61  ;;  %v7144_v52 = vadd.f32 %v7143_v39, %v7142_v17  ;;  %v7249_v16 = vpop.f32.mrb[115].mxu0 }
 0x283   : > { %v7250_v24 = vadd.f32 %v7249_v16, %v7248_v63  ;;  %v9671_v13 = vadd.f32 %v7247_v32, %v2203_v44 }
 0x284   : > { %v2214_v15 = vadd.f32 %v7144_v52, %v9490_v0 }
 0x285   : > { %v9674_v43 = vadd.f32 %v7250_v24, %v2206_v22  ;;  %v8620_v24 = vld [vmem:[%s10976_s5 + $0x158] sm:$0xff]  }
 0x286   : > { %v7145_v34 = vpop.f32.mrb[88].mxu1  ;;  %7571 = vmatprep.subr.bf16.mxu0 %v8620_v24 }
 0x287   : > { %v7251_v14 = vpop.f32.mrb[116].mxu0  ;;  %v7146_v61 = vpop.f32.mrb[89].mxu1  ;;  %7572 = vmatpush3.bf16.msra.mxu0 %v8621_v26 }
 0x288   : > { %v7147_v25 = vadd.f32 %v7146_v61, %v7145_v34  ;;  %v7252_v45 = vpop.f32.mrb[117].mxu0  ;;  %v7148_v21 = vpop.f32.mrb[90].mxu1 }
 0x289   : > { %v7253_v51 = vadd.f32 %v7252_v45, %v7251_v14  ;;  %v7254_v0 = vpop.f32.mrb[118].mxu0  ;;  %v7149_v60 = vpop.f32.mrb[91].mxu1 }
 0x28a   : > { %v2219_v10 = vadd.f32 %v7147_v25, %v9497_v59  ;;  %v7150_v9 = vadd.f32 %v7149_v60, %v7148_v21  ;;  %v7255_v31 = vpop.f32.mrb[119].mxu0  ;;  %v8622_v60 = vld [vmem:[%s10976_s5 + $0x160] sm:$0xff]  }
 0x28b   : > { %v7256_v46 = vadd.f32 %v7255_v31, %v7254_v0  ;;  %v9683_v44 = vadd.f32 %v7253_v51, %v2211_v23  ;;  %7573 = vmatprep.subr.bf16.mxu0 %v8622_v60 }
 0x28c   : > { %v2222_v29 = vadd.f32 %v7150_v9, %v9502_v8 }
 0x28d   : > { %v9686_v62 = vadd.f32 %v7256_v46, %v2214_v15 }
 0x28e   : > { %v7151_v33 = vpop.f32.mrb[92].mxu1 }
 0x28f   : > { %v7257_v22 = vpop.f32.mrb[120].mxu0  ;;  %v7152_v2 = vpop.f32.mrb[93].mxu1 }
 0x290   : > { %v7153_v50 = vadd.f32 %v7152_v2, %v7151_v33  ;;  %v7258_v55 = vpop.f32.mrb[121].mxu0  ;;  %v7154_v40 = vpop.f32.mrb[94].mxu1 }
 0x291   : > { %v7259_v56 = vadd.f32 %v7258_v55, %v7257_v22  ;;  %v7260_v17 = vpop.f32.mrb[122].mxu0  ;;  %v7155_v32 = vpop.f32.mrb[95].mxu1 }
 0x292   : > { %v2227_v59 = vadd.f32 %v7153_v50, %v9506_v12  ;;  %v7156_v63 = vadd.f32 %v7155_v32, %v7154_v40  ;;  %v7261_v39 = vpop.f32.mrb[123].mxu0 }
 0x293   : > { %v7262_v52 = vadd.f32 %v7261_v39, %v7260_v17  ;;  %v9689_v23 = vadd.f32 %v7259_v56, %v2219_v10  ;;  %v8623_v17 = vld [vmem:[%s10976_s5 + $0x120] sm:$0xff]  }
 0x294   : > { %v2230_v8 = vadd.f32 %v7156_v63, %v9508_v35  ;;  %7574 = vmatpush3.bf16.msra.mxu0 %v8623_v17 }
 0x295   : > { %v9692_v16 = vadd.f32 %v7262_v52, %v2222_v29 }
 0x296   : > { %v7157_v15 = vpop.f32.mrb[96].mxu1 }
 0x297   : > { %v7263_v34 = vpop.f32.mrb[124].mxu0  ;;  %v7158_v12 = vpop.f32.mrb[97].mxu1 }
 0x298   : > { %v7159_v58 = vadd.f32 %v7158_v12, %v7157_v15  ;;  %v7264_v14 = vpop.f32.mrb[125].mxu0  ;;  %v7160_v61 = vpop.f32.mrb[98].mxu1 }
 0x299   : > { %v7265_v25 = vadd.f32 %v7264_v14, %v7263_v34  ;;  %v7266_v35 = vpop.f32.mrb[126].mxu0  ;;  %v7161_v45 = vpop.f32.mrb[99].mxu1 }
 0x29a   : > { %v2235_v21 = vadd.f32 %v7159_v58, %v9515_v19  ;;  %v7162_v51 = vadd.f32 %v7161_v45, %v7160_v61  ;;  %v7267_v0 = vpop.f32.mrb[127].mxu0 }
 0x29b   : > { %v7268_v10 = vadd.f32 %v7267_v0, %v7266_v35  ;;  %v9704_v9 = vadd.f32 %v7265_v25, %v2227_v59 }
 0x29c   : > { %v2238_v31 = vadd.f32 %v7162_v51, %v9520_v4 }
 0x29d   : > { %v9707_v46 = vadd.f32 %v7268_v10, %v2230_v8 }
 0x29e   : > { %v7163_v29 = vpop.f32.mrb[100].mxu1 }
 0x29f   : > { %v7269_v33 = vpop.f32.mrb[128].mxu0  ;;  %v7164_v22 = vpop.f32.mrb[101].mxu1 }
 0x2a0   : > { %v7165_v2 = vadd.f32 %v7164_v22, %v7163_v29  ;;  %v7270_v50 = vpop.f32.mrb[129].mxu0  ;;  %v7166_v19 = vpop.f32.mrb[102].mxu1 }
 0x2a1   : > { %v7271_v55 = vadd.f32 %v7270_v50, %v7269_v33  ;;  %v7272_v40 = vpop.f32.mrb[130].mxu0  ;;  %v7167_v56 = vpop.f32.mrb[103].mxu1 }
 0x2a2   : > { %v2243_v32 = vadd.f32 %v7165_v2, %v9524_v20  ;;  %v7168_v59 = vadd.f32 %v7167_v56, %v7166_v19  ;;  %v7273_v4 = vpop.f32.mrb[131].mxu0 }
 0x2a3   : > { %v7274_v63 = vadd.f32 %v7273_v4, %v7272_v40  ;;  %v9713_v39 = vadd.f32 %v7271_v55, %v2235_v21  ;;  %v8624_v21 = vld [vmem:[%s10976_s5 + $0x168] sm:$0xff]  }
 0x2a4   : > { %v2246_v52 = vadd.f32 %v7168_v59, %v9526_v37  ;;  %7575 = vmatprep.subr.bf16.mxu0 %v8624_v21  ;;  %v8625_v55 = vld [vmem:[%s10976_s5 + $0x128] sm:$0xff]  }
 0x2a5   : > { %v9716_v8 = vadd.f32 %v7274_v63, %v2238_v31  ;;  %7576 = vmatpush3.bf16.msra.mxu0 %v8625_v55 }
 0x2a6   : > { %v7169_v24 = vpop.f32.mrb[104].mxu1 }
 0x2a7   : > { %v7275_v15 = vpop.f32.mrb[132].mxu0  ;;  %v7170_v26 = vpop.f32.mrb[105].mxu1 }
 0x2a8   : > { %v7171_v34 = vadd.f32 %v7170_v26, %v7169_v24  ;;  %v7276_v12 = vpop.f32.mrb[133].mxu0  ;;  %v7172_v58 = vpop.f32.mrb[106].mxu1 }
 0x2a9   : > { %v7277_v14 = vadd.f32 %v7276_v12, %v7275_v15  ;;  %v7278_v61 = vpop.f32.mrb[134].mxu0  ;;  %v7173_v25 = vpop.f32.mrb[107].mxu1 }
 0x2aa   : > { %v2251_v20 = vadd.f32 %v7171_v34, %v9533_v18  ;;  %v7174_v35 = vadd.f32 %v7173_v25, %v7172_v58  ;;  %v7279_v45 = vpop.f32.mrb[135].mxu0 }
 0x2ab   : > { %v7280_v37 = vadd.f32 %v7279_v45, %v7278_v61  ;;  %v9722_v51 = vadd.f32 %v7277_v14, %v2243_v32 }
 0x2ac   : > { %v2254_v0 = vadd.f32 %v7174_v35, %v9539_v11 }
 0x2ad   : > { %v9725_v60 = vadd.f32 %v7280_v37, %v2246_v52 }
 0x2ae   : > { %v7175_v10 = vpop.f32.mrb[108].mxu1 }
 0x2af   : > { %v7281_v31 = vpop.f32.mrb[136].mxu0  ;;  %v7176_v29 = vpop.f32.mrb[109].mxu1 }
 0x2b0   : > { %v7177_v33 = vadd.f32 %v7176_v29, %v7175_v10  ;;  %v7282_v22 = vpop.f32.mrb[137].mxu0  ;;  %v7178_v18 = vpop.f32.mrb[110].mxu1 }
 0x2b1   : > { %v7283_v2 = vadd.f32 %v7282_v22, %v7281_v31  ;;  %v7284_v50 = vpop.f32.mrb[138].mxu0  ;;  %v7179_v19 = vpop.f32.mrb[111].mxu1 }
 0x2b2   : > { %v2259_v40 = vadd.f32 %v7177_v33, %v9543_v3  ;;  %v7180_v56 = vadd.f32 %v7179_v19, %v7178_v18  ;;  %v7285_v11 = vpop.f32.mrb[139].mxu0 }
 0x2b3   : > { %v7286_v17 = vadd.f32 %v7285_v11, %v7284_v50  ;;  %v9731_v32 = vadd.f32 %v7283_v2, %v2251_v20  ;;  %v8626_v20 = vld [vmem:[%s10976_s5 + $0x170] sm:$0xff]  }
 0x2b4   : > { %v2262_v59 = vadd.f32 %v7180_v56, %v9545_v30  ;;  %7577 = vmatprep.subr.bf16.mxu0 %v8626_v20  ;;  %v8627_v2 = vld [vmem:[%s10976_s5 + $0x130] sm:$0xff]  }
 0x2b5   : > { %v9734_v4 = vadd.f32 %v7286_v17, %v2254_v0  ;;  %7578 = vmatpush3.bf16.msra.mxu0 %v8627_v2 }
 0x2b6   : > { %v7181_v63 = vpop.f32.mrb[112].mxu1 }
 0x2b7   : > { %v7287_v52 = vpop.f32.mrb[140].mxu0  ;;  %v7182_v24 = vpop.f32.mrb[113].mxu1 }
 0x2b8   : > { %v7183_v15 = vadd.f32 %v7182_v24, %v7181_v63  ;;  %v7288_v26 = vpop.f32.mrb[141].mxu0  ;;  %v7184_v34 = vpop.f32.mrb[114].mxu1 }
 0x2b9   : > { %v7289_v12 = vadd.f32 %v7288_v26, %v7287_v52  ;;  %v7290_v58 = vpop.f32.mrb[142].mxu0  ;;  %v7185_v14 = vpop.f32.mrb[115].mxu1 }
 0x2ba   : > { %v2267_v3 = vadd.f32 %v7183_v15, %v9552_v1  ;;  %v7186_v61 = vadd.f32 %v7185_v14, %v7184_v34  ;;  %v7291_v25 = vpop.f32.mrb[143].mxu0 }
 0x2bb   : > { %v7292_v30 = vadd.f32 %v7291_v25, %v7290_v58  ;;  %v9740_v35 = vadd.f32 %v7289_v12, %v2259_v40  ;;  %v8632_v25 = vld [vmem:[%s10976_s5 + $0x178] sm:$0xff]  }
 0x2bc   : > { %v2270_v45 = vadd.f32 %v7186_v61, %v9557_v7  ;;  %7579 = vmatprep.subr.bf16.mxu0 %v8632_v25 }
 0x2bd   : > { %v9743_v21 = vadd.f32 %v7292_v30, %v2262_v59 }
 0x2be   : > { %v7187_v37 = vpop.f32.mrb[116].mxu1 }
 0x2bf   : > { %v7293_v0 = vpop.f32.mrb[144].mxu0  ;;  %v7188_v10 = vpop.f32.mrb[117].mxu1 }
 0x2c0   : > { %v7189_v31 = vadd.f32 %v7188_v10, %v7187_v37  ;;  %v7294_v29 = vpop.f32.mrb[145].mxu0  ;;  %v7190_v1 = vpop.f32.mrb[118].mxu1 }
 0x2c1   : > { %v7295_v33 = vadd.f32 %v7294_v29, %v7293_v0  ;;  %v7296_v22 = vpop.f32.mrb[146].mxu0  ;;  %v7191_v18 = vpop.f32.mrb[119].mxu1 }
 0x2c2   : > { %v2275_v50 = vadd.f32 %v7189_v31, %v9564_v42  ;;  %v7192_v19 = vadd.f32 %v7191_v18, %v7190_v1  ;;  %v7297_v7 = vpop.f32.mrb[147].mxu0  ;;  %v8628_v42 = vld [vmem:[%s10976_s5 + $0x1c0] sm:$0xff]  }
 0x2c3   : > { %v7298_v55 = vadd.f32 %v7297_v7, %v7296_v22  ;;  %v9749_v40 = vadd.f32 %v7295_v33, %v2267_v3  ;;  %7677 = vmatprep.subr.bf16.mxu1 %v8628_v42  ;;  %v8633_v22 = vld [vmem:[%s10976_s5 + $0x138] sm:$0xff]  }
 0x2c4   : > { %v2278_v56 = vadd.f32 %v7192_v19, %v9572_v57  ;;  %7580 = vmatpush3.bf16.msra.mxu0 %v8633_v22 }
 0x2c5   : > { %v9752_v11 = vadd.f32 %v7298_v55, %v2270_v45 }
 0x2c6   : > { %v7193_v17 = vpop.f32.mrb[120].mxu1 }
 0x2c7   : > { %v7299_v59 = vpop.f32.mrb[148].mxu0  ;;  %v7194_v63 = vpop.f32.mrb[121].mxu1 }
 0x2c8   : > { %v7195_v52 = vadd.f32 %v7194_v63, %v7193_v17  ;;  %v7300_v24 = vpop.f32.mrb[149].mxu0  ;;  %v7196_v15 = vpop.f32.mrb[122].mxu1 }
 0x2c9   : > { %v7301_v26 = vadd.f32 %v7300_v24, %v7299_v59  ;;  %v7302_v34 = vpop.f32.mrb[150].mxu0  ;;  %v7197_v12 = vpop.f32.mrb[123].mxu1 }
 0x2ca   : > { %v2283_v58 = vadd.f32 %v7195_v52, %v9585_v6  ;;  %v7198_v14 = vadd.f32 %v7197_v12, %v7196_v15  ;;  %v7303_v3 = vpop.f32.mrb[151].mxu0 }
 0x2cb   : > { %v7304_v57 = vadd.f32 %v7303_v3, %v7302_v34  ;;  %v9758_v61 = vadd.f32 %v7301_v26, %v2275_v50 }
 0x2cc   : > { %v2286_v20 = vadd.f32 %v7198_v14, %v9596_v5 }
 0x2cd   : > { %v9764_v30 = vadd.f32 %v7304_v57, %v2278_v56 }
 0x2ce   : > { %v7199_v45 = vpop.f32.mrb[124].mxu1 }
 0x2cf   : > { %v7305_v37 = vpop.f32.mrb[152].mxu0  ;;  %v7200_v0 = vpop.f32.mrb[125].mxu1 }
 0x2d0   : > { %v7201_v10 = vadd.f32 %v7200_v0, %v7199_v45  ;;  %v7306_v6 = vpop.f32.mrb[153].mxu0  ;;  %v7202_v31 = vpop.f32.mrb[126].mxu1 }
 0x2d1   : > { %v7307_v29 = vadd.f32 %v7306_v6, %v7305_v37  ;;  %v7308_v1 = vpop.f32.mrb[154].mxu0  ;;  %v7203_v33 = vpop.f32.mrb[127].mxu1 }
 0x2d2   : > { %v2291_v18 = vadd.f32 %v7201_v10, %v9607_v27  ;;  %v7204_v2 = vadd.f32 %v7203_v33, %v7202_v31  ;;  %v7309_v5 = vpop.f32.mrb[155].mxu0 }
 0x2d3   : > { %v7310_v50 = vadd.f32 %v7309_v5, %v7308_v1  ;;  %v9770_v19 = vadd.f32 %v7307_v29, %v2283_v58 }
 0x2d4   : > { %v2294_v7 = vadd.f32 %v7204_v2, %v9613_v48  ;;  %v2788_v2 = vld [vmem:[#allocation3 + $0xa] sm:$0xff] }
 0x2d5   : > { %v9773_v55 = vadd.f32 %v7310_v50, %v2286_v20 }
 0x2d6   : > { %v8351_v56 = vpop.f32.mrb[128].mxu1 }
 0x2d7   : > { %v7311_v17 = vpop.f32.mrb[156].mxu0  ;;  %v2501_v59 = vadd.f32 %v8351_v56, %v9644_v49  ;;  %v2492_v63 = vpop.f32.mrb[129].mxu1 }
 0x2d8   : > { %v7312_v52 = vpop.f32.mrb[157].mxu0  ;;  %v2493_v24 = vadd.f32 %v2492_v63, %v9626_v36  ;;  %v8352_v15 = vpop.f32.mrb[130].mxu1  ;;  %v9784_v36 = vld [vmem:[%s10976_s5 + $0x200] sm:$0xff]  }
 0x2d9   : > { %v2621_v27 = vmax.f32 %v2501_v59, 0.0  ;;  %v7313_v26 = vadd.f32 %v7312_v52, %v7311_v17  ;;  %v7314_v34 = vpop.f32.mrb[158].mxu0  ;;  %v2504_v12 = vadd.f32 %v8352_v15, %v9647_v41  ;;  %v2495_v42 = vpop.f32.mrb[131].mxu1  ;;  %8381 = vmatprep.subr.bf16.mxu0 %v9784_v36 }
 0x2da   : > { %v2619_v58 = vmax.f32 %v2493_v24, 0.0  ;;  %v7315_v14 = vpop.f32.mrb[159].mxu0  ;;  %v2496_v48 = vadd.f32 %v2495_v42, %v9632_v38 }
 0x2db   : > { %2693 = vst [vmem:[#allocation3 + $0x31] sm:$0xff] %v2621_v27  ;;  %v2622_v3 = vmax.f32 %v2504_v12, 0.0  ;;  %v7316_v57 = vadd.f32 %v7315_v14, %v7314_v34  ;;  %v9779_v25 = vadd.f32 %v7313_v26, %v2291_v18  ;;  %v2787_v18 = vld [vmem:[#allocation3 + $0x2] sm:$0xff] }
 0x2dc   : > { %2691 = vst [vmem:[#allocation3 + $0x19] sm:$0xff] %v2619_v58  ;;  %v2620_v49 = vmax.f32 %v2496_v48, 0.0  ;;  %v3014_v56 = vpack.c.bf16 %v2788_v2, %v2787_v18 }
 0x2dd   : > { %2694 = vst [vmem:[#allocation3 + $0x39] sm:$0xff] %v2622_v3  ;;  %v3031_v20 = vpack.c.bf16 %v2622_v3, %v2621_v27  ;;  %v9786_v41 = vadd.f32 %v7316_v57, %v2294_v7  ;;  %v8630_v27 = vld [vmem:[%s10976_s5 + $0x1c8] sm:$0xff]  }
 0x2de   : > { %2692 = vst [vmem:[#allocation3 + $0x21] sm:$0xff] %v2620_v49  ;;  %v8355_v38 = vpop.f32.mrb[132].mxu1  ;;  %v3022_v45 = vpack.c.bf16 %v2620_v49, %v2619_v58 }
 0x2df   : > { %v2517_v37 = vadd.f32 %v8355_v38, %v9665_v54  ;;  %v2508_v0 = vpop.f32.mrb[133].mxu1 }
 0x2e0   : > { %v2509_v10 = vadd.f32 %v2508_v0, %v9653_v53  ;;  %v8356_v6 = vpop.f32.mrb[134].mxu1  ;;  %3779 = vmatprep.mubr.bf16.mxu0 %v3022_v45  ;;  %v8635_v0 = vld [vmem:[%s10976_s5 + $0x190] sm:$0xff]  }
 0x2e1   : > { %v2625_v31 = vmax.f32 %v2517_v37, 0.0  ;;  %v2520_v29 = vadd.f32 %v8356_v6, %v9668_v28  ;;  %v2511_v1 = vpop.f32.mrb[135].mxu1 }
 0x2e2   : > { %v2623_v33 = vmax.f32 %v2509_v10, 0.0  ;;  %v2512_v22 = vadd.f32 %v2511_v1, %v9656_v47  ;;  %v8629_v47 = vld [vmem:[%s10976_s5 + $0x180] sm:$0xff]   ;;  %v8636_v1 = vld [vmem:[%s10976_s5 + $0x1d8] sm:$0xff]  }
 0x2e3   : > { %2697 = vst [vmem:[#allocation3 + $0x61] sm:$0xff] %v2625_v31  ;;  %v2626_v5 = vmax.f32 %v2520_v29, 0.0  ;;  %v2819_v54 = vld [vmem:[#allocation3 + $0x18] sm:$0xff]  ;;  %v2821_v15 = vld [vmem:[#allocation3 + $0x30] sm:$0xff] }
 0x2e4   : > { %2695 = vst [vmem:[#allocation3 + $0x49] sm:$0xff] %v2623_v33  ;;  %v2624_v50 = vmax.f32 %v2512_v22, 0.0  ;;  %v2822_v53 = vld [vmem:[#allocation3 + $0x38] sm:$0xff] }
 0x2e5   : > { %2698 = vst [vmem:[#allocation3 + $0x69] sm:$0xff] %v2626_v5  ;;  %v2820_v7 = vld [vmem:[#allocation3 + $0x20] sm:$0xff]  ;;  %v9793_v17 = vpack.c.bf16 %v2626_v5, %v2625_v31  ;;  %v9803_v12 = vpack.c.bf16 %v2822_v53, %v2821_v15  ;;  %v2791_v53 = vld [vmem:[#allocation3 + $0x32] sm:$0xff] }
 0x2e6   : > { %2696 = vst [vmem:[#allocation3 + $0x51] sm:$0xff] %v2624_v50  ;;  %v8359_v59 = vpop.f32.mrb[136].mxu1  ;;  %v3015_v28 = vpack.c.bf16 %v2820_v7, %v2819_v54  ;;  %v3040_v63 = vpack.c.bf16 %v2624_v50, %v2623_v33  ;;  %v2789_v49 = vld [vmem:[#allocation3 + $0x1a] sm:$0xff] }
 0x2e7   : > { %v2533_v52 = vadd.f32 %v8359_v59, %v9683_v44  ;;  %v2524_v24 = vpop.f32.mrb[137].mxu1  ;;  %v2792_v59 = vld [vmem:[#allocation3 + $0x3a] sm:$0xff] }
 0x2e8   : > { %v2525_v26 = vadd.f32 %v2524_v24, %v9671_v13  ;;  %v8360_v34 = vpop.f32.mrb[138].mxu1  ;;  %3932 = vmatprep.mubr.bf16.mxu1 %v3015_v28  ;;  %3780 = vmatmul.mubr.bf16.gmra.mrb[164].mxu0 %v3015_v28  ;;  %v8631_v13 = vld [vmem:[%s10976_s5 + $0x188] sm:$0xff]  }
 0x2e9   : > { %v2629_v42 = vmax.f32 %v2533_v52, 0.0  ;;  %v2536_v58 = vadd.f32 %v8360_v34, %v9686_v62  ;;  %v2527_v14 = vpop.f32.mrb[139].mxu1  ;;  %3933 = vmatmul.mubr.bf16.vlgmr.msra.gmra.mrb[160].mxu1 %v3014_v56  ;;  %3787 = vmatprep.mubr.bf16.mxu0 %v3031_v20  ;;  %v8634_v62 = vld [vmem:[%s10976_s5 + $0x1d0] sm:$0xff]   ;;  %v8639_v52 = vld [vmem:[%s10976_s5 + $0x1a0] sm:$0xff]   ;;  %v8640_v34 = vld [vmem:[%s10976_s5 + $0x1e8] sm:$0xff]  }
 0x2ea   : > { %v2627_v44 = vmax.f32 %v2525_v26, 0.0  ;;  %v2528_v48 = vadd.f32 %v2527_v14, %v9674_v43  ;;  %3940 = vmatprep.mubr.bf16.mxu1 %v9803_v12  ;;  %7678 = vmatpush3.bf16.msra.mxu1 %v8629_v47  ;;  %v2790_v20 = vld [vmem:[#allocation3 + $0x22] sm:$0xff] }
 0x2eb   : > { %2701 = vst [vmem:[#allocation3 + $0x91] sm:$0xff] %v2629_v42  ;;  %v2630_v3 = vmax.f32 %v2536_v58, 0.0  ;;  %7679 = vmatprep.subr.bf16.mxu1 %v8630_v27  ;;  %v9822_v31 = vpack.c.bf16 %v2790_v20, %v2789_v49  ;;  %v2823_v29 = vld [vmem:[#allocation3 + $0x48] sm:$0xff]  ;;  %v9849_v27 = vpack.c.bf16 %v2792_v59, %v2791_v53  ;;  %v2825_v26 = vld [vmem:[#allocation3 + $0x60] sm:$0xff] }
 0x2ec   : > { %2699 = vst [vmem:[#allocation3 + $0x79] sm:$0xff] %v2627_v44  ;;  %v2628_v57 = vmax.f32 %v2528_v48, 0.0 }
 0x2ed   : > { %2702 = vst [vmem:[#allocation3 + $0x99] sm:$0xff] %v2630_v3  ;;  %v2824_v43 = vld [vmem:[#allocation3 + $0x50] sm:$0xff]  ;;  %v9814_v38 = vpack.c.bf16 %v2630_v3, %v2629_v42 }
 0x2ee   : > { %2700 = vst [vmem:[#allocation3 + $0x81] sm:$0xff] %v2628_v57  ;;  %v8363_v45 = vpop.f32.mrb[140].mxu1  ;;  %v9816_v37 = vpack.c.bf16 %v2628_v57, %v2627_v44  ;;  %7680 = vmatpush3.bf16.msra.mxu1 %v8631_v13  ;;  %v9829_v18 = vpack.c.bf16 %v2824_v43, %v2823_v29  ;;  %v2982_v57 = vld [vmem:[#allocation3 + $0x4a] sm:$0xff]  ;;  %v2983_v49 = vld [vmem:[#allocation3 + $0x52] sm:$0xff] }
 0x2ef   : > { %v2549_v10 = vadd.f32 %v8363_v45, %v9704_v9  ;;  %v2540_v6 = vpop.f32.mrb[141].mxu1  ;;  %7681 = vmatprep.subr.bf16.mxu1 %v8634_v62 }
 0x2f0   : > { %v2541_v33 = vadd.f32 %v2540_v6, %v9689_v23  ;;  %v8364_v22 = vpop.f32.mrb[142].mxu1  ;;  %3788 = vmatmul.mubr.bf16.gmra.mrb[168].mxu0 %v9803_v12  ;;  %v8637_v23 = vld [vmem:[%s10976_s5 + $0x198] sm:$0xff]  }
 0x2f1   : > { %v2633_v2 = vmax.f32 %v2549_v10, 0.0  ;;  %v2552_v5 = vadd.f32 %v8364_v22, %v9707_v46  ;;  %v2543_v9 = vpop.f32.mrb[143].mxu1  ;;  %3941 = vmatmul.mubr.bf16.gmra.mrb[164].mxu1 %v9822_v31  ;;  %3795 = vmatprep.mubr.bf16.mxu0 %v3040_v63  ;;  %v8638_v46 = vld [vmem:[%s10976_s5 + $0x1e0] sm:$0xff]   ;;  %v9876_v10 = vpack.c.bf16 %v2983_v49, %v2982_v57 }
 0x2f2   : > { %v2631_v50 = vmax.f32 %v2541_v33, 0.0  ;;  %v2544_v54 = vadd.f32 %v2543_v9, %v9692_v16  ;;  %3948 = vmatprep.mubr.bf16.mxu1 %v9829_v18  ;;  %7682 = vmatpush3.bf16.msra.mxu1 %v8635_v0  ;;  %v2826_v16 = vld [vmem:[#allocation3 + $0x68] sm:$0xff]  ;;  %v8644_v0 = vld [vmem:[%s10976_s5 + $0x1b0] sm:$0xff]  }
 0x2f3   : > { %2705 = vst [vmem:[#allocation3 + $0xc1] sm:$0xff] %v2633_v2  ;;  %v2634_v7 = vmax.f32 %v2552_v5, 0.0  ;;  %7683 = vmatprep.subr.bf16.mxu1 %v8636_v1  ;;  %v9856_v14 = vpack.c.bf16 %v2826_v16, %v2825_v26  ;;  %v2827_v1 = vld [vmem:[#allocation3 + $0x78] sm:$0xff]  ;;  %v8645_v33 = vld [vmem:[%s10976_s5 + $0x1f8] sm:$0xff]  }
 0x2f4   : > { %2703 = vst [vmem:[#allocation3 + $0xa9] sm:$0xff] %v2631_v50  ;;  %v2632_v56 = vmax.f32 %v2544_v54, 0.0  ;;  %v2830_v53 = vld [vmem:[#allocation3 + $0x98] sm:$0xff] }
 0x2f5   : > { %2706 = vst [vmem:[#allocation3 + $0xc9] sm:$0xff] %v2634_v7  ;;  %v9841_v28 = vpack.c.bf16 %v2634_v7, %v2633_v2 }
 0x2f6   : > { %2704 = vst [vmem:[#allocation3 + $0xb1] sm:$0xff] %v2632_v56  ;;  %v8367_v63 = vpop.f32.mrb[144].mxu1  ;;  %v9843_v47 = vpack.c.bf16 %v2632_v56, %v2631_v50  ;;  %7684 = vmatpush3.bf16.msra.mxu1 %v8637_v23  ;;  %v2796_v56 = vld [vmem:[#allocation3 + $0x6a] sm:$0xff] }
 0x2f7   : > { %v2565_v24 = vadd.f32 %v8367_v63, %v9722_v51  ;;  %v2556_v15 = vpop.f32.mrb[145].mxu1  ;;  %7685 = vmatprep.subr.bf16.mxu1 %v8638_v46  ;;  %v2795_v46 = vld [vmem:[#allocation3 + $0x62] sm:$0xff] }
 0x2f8   : > { %v2557_v42 = vadd.f32 %v2556_v15, %v9713_v39  ;;  %v8368_v58 = vpop.f32.mrb[146].mxu1  ;;  %3796 = vmatmul.mubr.bf16.gmra.mrb[172].mxu0 %v9829_v18  ;;  %v8641_v39 = vld [vmem:[%s10976_s5 + $0x1a8] sm:$0xff]  }
 0x2f9   : > { %v2637_v44 = vmax.f32 %v2565_v24, 0.0  ;;  %v2568_v48 = vadd.f32 %v8368_v58, %v9725_v60  ;;  %v2559_v51 = vpop.f32.mrb[147].mxu1  ;;  %3949 = vmatmul.mubr.bf16.gmra.mrb[168].mxu1 %v9849_v27  ;;  %3803 = vmatprep.mubr.bf16.mxu0 %v9793_v17  ;;  %v8643_v60 = vld [vmem:[%s10976_s5 + $0x1f0] sm:$0xff]   ;;  %v2829_v24 = vld [vmem:[#allocation3 + $0x90] sm:$0xff] }
 0x2fa   : > { %v2635_v13 = vmax.f32 %v2557_v42, 0.0  ;;  %v2560_v3 = vadd.f32 %v2559_v51, %v9716_v8  ;;  %3956 = vmatprep.mubr.bf16.mxu1 %v9856_v14  ;;  %7686 = vmatpush3.bf16.msra.mxu1 %v8639_v52  ;;  %v2828_v8 = vld [vmem:[#allocation3 + $0x80] sm:$0xff]  ;;  %v9899_v52 = vpack.c.bf16 %v2796_v56, %v2795_v46 }
 0x2fb   : > { %2709 = vst [vmem:[#allocation3 + $0xf1] sm:$0xff] %v2637_v44  ;;  %v2638_v62 = vmax.f32 %v2568_v48, 0.0  ;;  %7687 = vmatprep.subr.bf16.mxu1 %v8640_v34  ;;  %v9884_v5 = vpack.c.bf16 %v2828_v8, %v2827_v1  ;;  %v9903_v34 = vpack.c.bf16 %v2830_v53, %v2829_v24  ;;  %v2831_v49 = vld [vmem:[#allocation3 + $0xa8] sm:$0xff] }
 0x2fc   : > { %2707 = vst [vmem:[#allocation3 + $0xd9] sm:$0xff] %v2635_v13  ;;  %v2636_v17 = vmax.f32 %v2560_v3, 0.0  ;;  %v2798_v3 = vld [vmem:[#allocation3 + $0x82] sm:$0xff] }
 0x2fd   : > { %2710 = vst [vmem:[#allocation3 + $0xf9] sm:$0xff] %v2638_v62  ;;  %v9869_v20 = vpack.c.bf16 %v2638_v62, %v2637_v44  ;;  %v2803_v46 = vld [vmem:[#allocation3 + $0xc2] sm:$0xff] }
 0x2fe   : > { %2708 = vst [vmem:[#allocation3 + $0xe1] sm:$0xff] %v2636_v17  ;;  %v8371_v43 = vpop.f32.mrb[148].mxu1  ;;  %v9871_v45 = vpack.c.bf16 %v2636_v17, %v2635_v13  ;;  %7688 = vmatpush3.bf16.msra.mxu1 %v8641_v39  ;;  %v2797_v13 = vld [vmem:[#allocation3 + $0x7a] sm:$0xff]  ;;  %v2832_v39 = vld [vmem:[#allocation3 + $0xb0] sm:$0xff] }
 0x2ff   : > { %v2581_v6 = vadd.f32 %v8371_v43, %v9740_v35  ;;  %v2572_v29 = vpop.f32.mrb[149].mxu1  ;;  %7689 = vmatprep.subr.bf16.mxu1 %v8643_v60  ;;  %v9919_v43 = vpack.c.bf16 %v2832_v39, %v2831_v49 }
 0x300   : > { %v2573_v22 = vadd.f32 %v2572_v29, %v9731_v32  ;;  %v8372_v2 = vpop.f32.mrb[150].mxu1  ;;  %3804 = vmatmul.mubr.bf16.gmra.mrb[176].mxu0 %v9856_v14  ;;  %v8646_v32 = vld [vmem:[%s10976_s5 + $0x1b8] sm:$0xff]  }
 0x301   : > { %v2641_v9 = vmax.f32 %v2581_v6, 0.0  ;;  %v2584_v50 = vadd.f32 %v8372_v2, %v9743_v21  ;;  %v2575_v54 = vpop.f32.mrb[151].mxu1  ;;  %3957 = vmatmul.mubr.bf16.gmra.mrb[172].mxu1 %v9876_v10  ;;  %3811 = vmatprep.mubr.bf16.mxu0 %v9816_v37  ;;  %v2800_v2 = vld [vmem:[#allocation3 + $0x9a] sm:$0xff] }
 0x302   : > { %v2639_v35 = vmax.f32 %v2573_v22, 0.0  ;;  %v2576_v23 = vadd.f32 %v2575_v54, %v9734_v4  ;;  %3964 = vmatprep.mubr.bf16.mxu1 %v9884_v5  ;;  %7690 = vmatpush3.bf16.msra.mxu1 %v8644_v0  ;;  %v2799_v22 = vld [vmem:[#allocation3 + $0x92] sm:$0xff]  ;;  %v2833_v54 = vld [vmem:[#allocation3 + $0xc0] sm:$0xff] }
 0x303   : > { %2713 = vst [vmem:[#allocation3 + $0x121] sm:$0xff] %v2641_v9  ;;  %v2642_v7 = vmax.f32 %v2584_v50, 0.0  ;;  %7691 = vmatprep.subr.bf16.mxu1 %v8645_v33  ;;  %v9928_v50 = vpack.c.bf16 %v2800_v2, %v2799_v22 }
 0x304   : > { %2711 = vst [vmem:[#allocation3 + $0x109] sm:$0xff] %v2639_v35  ;;  %v2640_v21 = vmax.f32 %v2576_v23, 0.0  ;;  %v2838_v56 = vld [vmem:[#allocation3 + $0xf8] sm:$0xff] }
 0x305   : > { %2714 = vst [vmem:[#allocation3 + $0x129] sm:$0xff] %v2642_v7  ;;  %v9894_v37 = vpack.c.bf16 %v2642_v7, %v2641_v9  ;;  %v2834_v9 = vld [vmem:[#allocation3 + $0xc8] sm:$0xff]  ;;  %v2836_v23 = vld [vmem:[#allocation3 + $0xe0] sm:$0xff]  ;;  %v2835_v7 = vld [vmem:[#allocation3 + $0xd8] sm:$0xff] }
 0x306   : > { %2712 = vst [vmem:[#allocation3 + $0x111] sm:$0xff] %v2640_v21  ;;  %v8375_v4 = vpop.f32.mrb[152].mxu1  ;;  %v9896_v59 = vpack.c.bf16 %v2640_v21, %v2639_v35  ;;  %7692 = vmatpush3.bf16.msra.mxu1 %v8646_v32  ;;  %v2802_v35 = vld [vmem:[#allocation3 + $0xb2] sm:$0xff]  ;;  %v9939_v21 = vpack.c.bf16 %v2836_v23, %v2835_v7 }
 0x307   : > { %v2597_v16 = vadd.f32 %v8375_v4, %v9758_v61  ;;  %v2588_v63 = vpop.f32.mrb[153].mxu1  ;;  %v2837_v4 = vld [vmem:[#allocation3 + $0xf0] sm:$0xff] }
 0x308   : > { %v2589_v15 = vadd.f32 %v2588_v63, %v9749_v40  ;;  %v8376_v26 = vpop.f32.mrb[154].mxu1  ;;  %3812 = vmatmul.mubr.bf16.gmra.mrb[180].mxu0 %v9884_v5  ;;  %v2805_v63 = vld [vmem:[#allocation3 + $0xda] sm:$0xff] }
 0x309   : > { %v2645_v42 = vmax.f32 %v2597_v16, 0.0  ;;  %v2600_v58 = vadd.f32 %v8376_v26, %v9764_v30  ;;  %v2591_v44 = vpop.f32.mrb[155].mxu1  ;;  %3965 = vmatmul.mubr.bf16.gmra.mrb[176].mxu1 %v9899_v52  ;;  %3819 = vmatprep.mubr.bf16.mxu0 %v9814_v38  ;;  %v9947_v16 = vpack.c.bf16 %v2838_v56, %v2837_v4  ;;  %v2851_v4 = vld [vmem:[#allocation3 + $0x19] sm:$0xff] }
 0x30a   : > { %v2643_v61 = vmax.f32 %v2589_v15, 0.0  ;;  %v2592_v48 = vadd.f32 %v2591_v44, %v9752_v11  ;;  %3972 = vmatprep.mubr.bf16.mxu1 %v9903_v34  ;;  %v9915_v11 = vpack.c.bf16 %v2798_v3, %v2797_v13  ;;  %v2808_v44 = vld [vmem:[#allocation3 + $0xfa] sm:$0xff] }
 0x30b   : > { %2717 = vst [vmem:[#allocation3 + $0x151] sm:$0xff] %v2645_v42  ;;  %v2646_v40 = vmax.f32 %v2600_v58, 0.0  ;;  %v2839_v26 = vld [vmem:[#allocation3 + $0x108] sm:$0xff]  ;;  %v2841_v39 = vld [vmem:[#allocation3 + $0x120] sm:$0xff] }
 0x30c   : > { %2715 = vst [vmem:[#allocation3 + $0x139] sm:$0xff] %v2643_v61  ;;  %v2644_v51 = vmax.f32 %v2592_v48, 0.0  ;;  %v2842_v48 = vld [vmem:[#allocation3 + $0x128] sm:$0xff] }
 0x30d   : > { %2718 = vst [vmem:[#allocation3 + $0x159] sm:$0xff] %v2646_v40  ;;  %v9910_v62 = vpack.c.bf16 %v2646_v40, %v2645_v42  ;;  %v2840_v24 = vld [vmem:[#allocation3 + $0x110] sm:$0xff] }
 0x30e   : > { %2716 = vst [vmem:[#allocation3 + $0x141] sm:$0xff] %v2644_v51  ;;  %v8379_v30 = vpop.f32.mrb[156].mxu1  ;;  %v9912_v60 = vpack.c.bf16 %v2644_v51, %v2643_v61  ;;  %v9955_v42 = vpack.c.bf16 %v2840_v24, %v2839_v26  ;;  %v2948_v26 = vld [vmem:[#allocation3 + $0x31] sm:$0xff] }
 0x30f   : > { %v2613_v38 = vadd.f32 %v8379_v30, %v9779_v25  ;;  %v2604_v57 = vpop.f32.mrb[157].mxu1 }
 0x310   : > { %v2605_v17 = vadd.f32 %v2604_v57, %v9770_v19  ;;  %v8380_v8 = vpop.f32.mrb[158].mxu1  ;;  %3820 = vmatmul.mubr.bf16.gmra.mrb[184].mxu0 %v9903_v34  ;;  %v2810_v57 = vld [vmem:[#allocation3 + $0x112] sm:$0xff] }
 0x311   : > { %v2649_v0 = vmax.f32 %v2613_v38, 0.0  ;;  %v2616_v6 = vadd.f32 %v8380_v8, %v9786_v41  ;;  %v2607_v29 = vpop.f32.mrb[159].mxu1  ;;  %3973 = vmatmul.mubr.bf16.gmra.mrb[180].mxu1 %v9915_v11  ;;  %3827 = vmatprep.mubr.bf16.mxu0 %v9843_v47  ;;  %v9931_v47 = vpack.c.bf16 %v2834_v9, %v2833_v54  ;;  %v9967_v38 = vpack.c.bf16 %v2842_v48, %v2841_v39  ;;  %v2951_v48 = vld [vmem:[#allocation3 + $0x51] sm:$0xff]  ;;  %v8649_v39 = vld [vmem:[%s10976_s5 + $0x218] sm:$0xff]  }
 0x312   : > { %v2647_v25 = vmax.f32 %v2605_v17, 0.0  ;;  %v2608_v1 = vadd.f32 %v2607_v29, %v9773_v55  ;;  %3980 = vmatprep.mubr.bf16.mxu1 %v9919_v43  ;;  %v2801_v55 = vld [vmem:[#allocation3 + $0xaa] sm:$0xff] }
 0x313   : > { %2721 = vst [vmem:[#allocation3 + $0x181] sm:$0xff] %v2649_v0  ;;  %v2650_v19 = vmax.f32 %v2616_v6, 0.0  ;;  %v9936_v32 = vpack.c.bf16 %v2802_v35, %v2801_v55  ;;  %v2843_v8 = vld [vmem:[#allocation3 + $0x138] sm:$0xff]  ;;  %v2811_v6 = vld [vmem:[#allocation3 + $0x122] sm:$0xff] }
 0x314   : > { %2719 = vst [vmem:[#allocation3 + $0x169] sm:$0xff] %v2647_v25  ;;  %v2648_v33 = vmax.f32 %v2608_v1, 0.0  ;;  %v2846_v29 = vld [vmem:[#allocation3 + $0x158] sm:$0xff]  ;;  %v2845_v1 = vld [vmem:[#allocation3 + $0x150] sm:$0xff] }
 0x315   : > { %2722 = vst [vmem:[#allocation3 + $0x189] sm:$0xff] %v2650_v19  ;;  %v2844_v49 = vld [vmem:[#allocation3 + $0x140] sm:$0xff]  ;;  %v9983_v19 = vpack.c.bf16 %v2846_v29, %v2845_v1  ;;  %v2815_v55 = vld [vmem:[#allocation3 + $0x152] sm:$0xff]  ;;  %v8653_v29 = vld [vmem:[%s10976_s5 + $0x238] sm:$0xff]  }
 0x316   : > { %2720 = vst [vmem:[#allocation3 + $0x171] sm:$0xff] %v2648_v33  ;;  %v9926_v41 = vpack.c.bf16 %v2648_v33, %v2647_v25  ;;  %v9975_v0 = vpack.c.bf16 %v2844_v49, %v2843_v8  ;;  %v2813_v33 = vld [vmem:[#allocation3 + $0x13a] sm:$0xff] }
 0x317   : > { %v8651_v49 = vld [vmem:[%s10976_s5 + $0x228] sm:$0xff]  }
 0x318   : > { %3828 = vmatmul.mubr.bf16.gmra.mrb[188].mxu0 %v9919_v43 }
 0x319   : > { %3981 = vmatmul.mubr.bf16.gmra.mrb[184].mxu1 %v9928_v50  ;;  %3835 = vmatprep.mubr.bf16.mxu0 %v9841_v28  ;;  %v2804_v28 = vld [vmem:[#allocation3 + $0xca] sm:$0xff] }
 0x31a   : > { %3988 = vmatprep.mubr.bf16.mxu1 %v9931_v47  ;;  %v9944_v53 = vpack.c.bf16 %v2804_v28, %v2803_v46  ;;  %v2849_v7 = vld [vmem:[#allocation3 + $0x180] sm:$0xff] }
 0x31b   : > { %v2847_v9 = vld [vmem:[#allocation3 + $0x168] sm:$0xff] }
 0x31c   : > { %v2850_v35 = vld [vmem:[#allocation3 + $0x188] sm:$0xff] }
 0x31d   : > { %v2848_v22 = vld [vmem:[#allocation3 + $0x170] sm:$0xff]  ;;  %v9999_v46 = vpack.c.bf16 %v2850_v35, %v2849_v7  ;;  %v2852_v28 = vld [vmem:[#allocation3 + $0x21] sm:$0xff] }
 0x31e   : > { %v9991_v54 = vpack.c.bf16 %v2848_v22, %v2847_v9  ;;  %v2818_v56 = vld [vmem:[#allocation3 + $0x172] sm:$0xff]  ;;  %v2958_v22 = vld [vmem:[#allocation3 + $0xa9] sm:$0xff] }
 0x320   : > { %3836 = vmatmul.mubr.bf16.gmra.mrb[192].mxu0 %v9931_v47 }
 0x321   : > { %3989 = vmatmul.mubr.bf16.gmra.mrb[188].mxu1 %v9936_v32  ;;  %3843 = vmatprep.mubr.bf16.mxu0 %v9871_v45  ;;  %v2806_v45 = vld [vmem:[#allocation3 + $0xe2] sm:$0xff] }
 0x322   : > { %3996 = vmatprep.mubr.bf16.mxu1 %v9939_v21  ;;  %v9952_v15 = vpack.c.bf16 %v2806_v45, %v2805_v63  ;;  %v2949_v63 = vld [vmem:[#allocation3 + $0x39] sm:$0xff]  ;;  %v3016_v45 = vpack.c.bf16 %v2852_v28, %v2851_v4 }
 0x328   : > { %3844 = vmatmul.mubr.bf16.gmra.mrb[196].mxu0 %v9939_v21 }
 0x329   : > { %3997 = vmatmul.mubr.bf16.gmra.mrb[192].mxu1 %v9944_v53  ;;  %3851 = vmatprep.mubr.bf16.mxu0 %v9869_v20  ;;  %v2807_v20 = vld [vmem:[#allocation3 + $0xf2] sm:$0xff] }
 0x32a   : > { %4004 = vmatprep.mubr.bf16.mxu1 %v9947_v16  ;;  %v9962_v3 = vpack.c.bf16 %v2808_v44, %v2807_v20  ;;  %v3019_v20 = vpack.c.bf16 %v2949_v63, %v2948_v26  ;;  %v2887_v44 = vld [vmem:[#allocation3 + $0x4a] sm:$0xff] }
 0x330   : > { %3852 = vmatmul.mubr.bf16.gmra.mrb[200].mxu0 %v9947_v16 }
 0x331   : > { %4005 = vmatmul.mubr.bf16.gmra.mrb[196].mxu1 %v9952_v15  ;;  %3859 = vmatprep.mubr.bf16.mxu0 %v9896_v59  ;;  %v7357_v58 = vpop.f32.mrb[160].mxu0  ;;  %v2809_v59 = vld [vmem:[#allocation3 + $0x10a] sm:$0xff] }
 0x332   : > { %4012 = vmatprep.mubr.bf16.mxu1 %v9955_v42  ;;  %v7358_v61 = vpop.f32.mrb[161].mxu0  ;;  %v9972_v17 = vpack.c.bf16 %v2810_v57, %v2809_v59  ;;  %v2953_v59 = vld [vmem:[#allocation3 + $0x69] sm:$0xff]  ;;  %v2952_v57 = vld [vmem:[#allocation3 + $0x61] sm:$0xff] }
 0x333   : > { %v9960_v40 = vadd.f32 %v7358_v61, %v7357_v58  ;;  %v7360_v51 = vpop.f32.mrb[162].mxu0  ;;  %v8647_v58 = vld [vmem:[%s10976_s5 + $0x208] sm:$0xff]   ;;  %v3037_v8 = vpack.c.bf16 %v2953_v59, %v2952_v57 }
 0x334   : > { %v7361_v13 = vpop.f32.mrb[163].mxu0  ;;  %v2888_v61 = vld [vmem:[#allocation3 + $0x52] sm:$0xff] }
 0x335   : > { %v9964_v30 = vadd.f32 %v7361_v13, %v7360_v51  ;;  %v3035_v51 = vpack.c.bf16 %v2888_v61, %v2887_v44  ;;  %v2950_v13 = vld [vmem:[#allocation3 + $0x49] sm:$0xff]  ;;  %v2972_v44 = vld [vmem:[#allocation3 + $0x151] sm:$0xff] }
 0x336   : > { %v8654_v61 = vld [vmem:[%s10978_s7 + $0x40] sm:$0xff]  }
 0x337   : > { %7813 = vmatprep.subr.bf16.mxu1 %v8654_v61 }
 0x338   : > { %3860 = vmatmul.mubr.bf16.gmra.mrb[204].mxu0 %v9955_v42 }
 0x339   : > { %4013 = vmatmul.mubr.bf16.gmra.mrb[200].mxu1 %v9962_v3  ;;  %3867 = vmatprep.mubr.bf16.mxu0 %v9894_v37  ;;  %v2812_v37 = vld [vmem:[#allocation3 + $0x12a] sm:$0xff] }
 0x33a   : > { %4020 = vmatprep.mubr.bf16.mxu1 %v9967_v38  ;;  %v9980_v25 = vpack.c.bf16 %v2812_v37, %v2811_v6  ;;  %v2955_v6 = vld [vmem:[#allocation3 + $0x81] sm:$0xff]  ;;  %v2954_v37 = vld [vmem:[#allocation3 + $0x79] sm:$0xff] }
 0x33b   : > { %v3046_v1 = vpack.c.bf16 %v2955_v6, %v2954_v37 }
 0x340   : > { %3868 = vmatmul.mubr.bf16.gmra.mrb[208].mxu0 %v9967_v38 }
 0x341   : > { %4021 = vmatmul.mubr.bf16.gmra.mrb[204].mxu1 %v9972_v17  ;;  %3875 = vmatprep.mubr.bf16.mxu0 %v9912_v60  ;;  %v2814_v60 = vld [vmem:[#allocation3 + $0x142] sm:$0xff] }
 0x342   : > { %4028 = vmatprep.mubr.bf16.mxu1 %v9975_v0  ;;  %v9988_v2 = vpack.c.bf16 %v2814_v60, %v2813_v33  ;;  %v2959_v60 = vld [vmem:[#allocation3 + $0xb1] sm:$0xff] }
 0x343   : > { %v3064_v9 = vpack.c.bf16 %v2959_v60, %v2958_v22 }
 0x348   : > { %3876 = vmatmul.mubr.bf16.gmra.mrb[212].mxu0 %v9975_v0 }
 0x349   : > { %4029 = vmatmul.mubr.bf16.gmra.mrb[208].mxu1 %v9980_v25  ;;  %3883 = vmatprep.mubr.bf16.mxu0 %v9910_v62  ;;  %v2816_v62 = vld [vmem:[#allocation3 + $0x15a] sm:$0xff] }
 0x34a   : > { %4036 = vmatprep.mubr.bf16.mxu1 %v9983_v19  ;;  %v9996_v23 = vpack.c.bf16 %v2816_v62, %v2815_v55 }
 0x350   : > { %3884 = vmatmul.mubr.bf16.gmra.mrb[216].mxu0 %v9983_v19 }
 0x351   : > { %4037 = vmatmul.mubr.bf16.gmra.mrb[212].mxu1 %v9988_v2  ;;  %3891 = vmatprep.mubr.bf16.mxu0 %v9926_v41  ;;  %v2817_v41 = vld [vmem:[#allocation3 + $0x16a] sm:$0xff] }
 0x352   : > { %4044 = vmatprep.mubr.bf16.mxu1 %v9991_v54  ;;  %v10004_v24 = vpack.c.bf16 %v2818_v56, %v2817_v41 }
 0x358   : > { %3892 = vmatmul.mubr.bf16.gmra.mrb[220].mxu0 %v9991_v54 }
 0x359   : > { %4045 = vmatmul.mubr.bf16.gmra.mrb[216].mxu1 %v9996_v23  ;;  %4093 = vmatprep.mubr.bf16.mxu0 %v9822_v31  ;;  %v8648_v31 = vld [vmem:[%s10976_s5 + $0x210] sm:$0xff]  }
 0x35a   : > { %4052 = vmatprep.mubr.bf16.mxu1 %v9999_v46 }
 0x360   : > { %4094 = vmatmul.mubr.bf16.vlgmr.msra.gmra.mrb[224].mxu0 %v3016_v45  ;;  %v2973_v45 = vld [vmem:[#allocation3 + $0x159] sm:$0xff] }
 0x361   : > { %4053 = vmatmul.mubr.bf16.gmra.mrb[220].mxu1 %v10004_v24  ;;  %8382 = vmatpush3.bf16.msra.mxu0 %v9784_v36  ;;  %v3028_v36 = vpack.c.bf16 %v2951_v48, %v2950_v13  ;;  %v3127_v13 = vpack.c.bf16 %v2973_v45, %v2972_v44  ;;  %v2979_v45 = vld [vmem:[#allocation3 + $0x1a1] sm:$0xff] }
 0x362   : > { %4101 = vmatprep.mubr.bf16.mxu0 %v9849_v27  ;;  %4254 = vmatprep.mubr.bf16.mxu1 %v3019_v20  ;;  %v8650_v27 = vld [vmem:[%s10976_s5 + $0x220] sm:$0xff]  }
 0x363   : > { %8383 = vmatprep.subr.bf16.mxu0 %v8647_v58 }
 0x365   : > { %8384 = vmatpush3.bf16.msra.mxu0 %v8647_v58 }
 0x366   : > { %8385 = vmatprep.subr.bf16.mxu0 %v8648_v31 }
 0x368   : > { %4102 = vmatmul.mubr.bf16.gmra.mrb[228].mxu0 %v3019_v20 }
 0x369   : > { %4255 = vmatmul.mubr.bf16.vlgmr.msra.gmra.mrb[224].mxu1 %v9803_v12  ;;  %4109 = vmatprep.mubr.bf16.mxu0 %v3035_v51  ;;  %v8652_v12 = vld [vmem:[%s10976_s5 + $0x230] sm:$0xff]  }
 0x36a   : > { %4262 = vmatprep.mubr.bf16.mxu1 %v3028_v36  ;;  %8386 = vmatpush3.bf16.msra.mxu0 %v8648_v31 }
 0x36b   : > { %8387 = vmatprep.subr.bf16.mxu0 %v8649_v39 }
 0x36e   : > { %8388 = vmatpush3.bf16.msra.mxu0 %v8649_v39 }
 0x36f   : > { %8389 = vmatprep.subr.bf16.mxu0 %v8650_v27 }
 0x370   : > { %4110 = vmatmul.mubr.bf16.gmra.mrb[232].mxu0 %v3028_v36 }
 0x371   : > { %4263 = vmatmul.mubr.bf16.gmra.mrb[228].mxu1 %v9829_v18  ;;  %4117 = vmatprep.mubr.bf16.mxu0 %v9899_v52  ;;  %v2957_v18 = vld [vmem:[#allocation3 + $0x99] sm:$0xff]  ;;  %v2956_v52 = vld [vmem:[#allocation3 + $0x91] sm:$0xff] }
 0x372   : > { %4270 = vmatprep.mubr.bf16.mxu1 %v3037_v8  ;;  %8390 = vmatpush3.bf16.msra.mxu0 %v8650_v27  ;;  %v3055_v33 = vpack.c.bf16 %v2957_v18, %v2956_v52  ;;  %v2974_v18 = vld [vmem:[#allocation3 + $0x169] sm:$0xff] }
 0x373   : > { %8391 = vmatprep.subr.bf16.mxu0 %v8651_v49 }
 0x376   : > { %8392 = vmatpush3.bf16.msra.mxu0 %v8651_v49 }
 0x377   : > { %8393 = vmatprep.subr.bf16.mxu0 %v8652_v12 }
 0x378   : > { %4118 = vmatmul.mubr.bf16.gmra.mrb[236].mxu0 %v3037_v8 }
 0x379   : > { %4271 = vmatmul.mubr.bf16.gmra.mrb[232].mxu1 %v9856_v14  ;;  %4125 = vmatprep.mubr.bf16.mxu0 %v9915_v11  ;;  %v2961_v14 = vld [vmem:[#allocation3 + $0xc9] sm:$0xff]  ;;  %v2960_v11 = vld [vmem:[#allocation3 + $0xc1] sm:$0xff] }
 0x37a   : > { %4278 = vmatprep.mubr.bf16.mxu1 %v3046_v1  ;;  %8394 = vmatpush3.bf16.msra.mxu0 %v8652_v12  ;;  %v3073_v55 = vpack.c.bf16 %v2961_v14, %v2960_v11  ;;  %v2975_v12 = vld [vmem:[#allocation3 + $0x171] sm:$0xff] }
 0x37b   : > { %8395 = vmatprep.subr.bf16.mxu0 %v8653_v29  ;;  %v3136_v60 = vpack.c.bf16 %v2975_v12, %v2974_v18 }
 0x37e   : > { %8396 = vmatpush3.bf16.msra.mxu0 %v8653_v29 }
 0x380   : > { %4126 = vmatmul.mubr.bf16.gmra.mrb[240].mxu0 %v3046_v1 }
 0x381   : > { %4279 = vmatmul.mubr.bf16.gmra.mrb[236].mxu1 %v9884_v5  ;;  %4133 = vmatprep.mubr.bf16.mxu0 %v9928_v50  ;;  %v2963_v5 = vld [vmem:[#allocation3 + $0xe1] sm:$0xff]  ;;  %v2962_v50 = vld [vmem:[#allocation3 + $0xd9] sm:$0xff] }
 0x382   : > { %4286 = vmatprep.mubr.bf16.mxu1 %v3055_v33  ;;  %v3082_v62 = vpack.c.bf16 %v2963_v5, %v2962_v50  ;;  %v2913_v5 = vld [vmem:[#allocation3 + $0x182] sm:$0xff]  ;;  %v2914_v50 = vld [vmem:[#allocation3 + $0x18a] sm:$0xff] }
 0x388   : > { %4134 = vmatmul.mubr.bf16.gmra.mrb[244].mxu0 %v3055_v33 }
 0x389   : > { %4287 = vmatmul.mubr.bf16.gmra.mrb[240].mxu1 %v9903_v34  ;;  %4141 = vmatprep.mubr.bf16.mxu0 %v9936_v32  ;;  %v2965_v34 = vld [vmem:[#allocation3 + $0xf9] sm:$0xff]  ;;  %v2964_v32 = vld [vmem:[#allocation3 + $0xf1] sm:$0xff] }
 0x38a   : > { %4294 = vmatprep.mubr.bf16.mxu1 %v3064_v9  ;;  %v3091_v35 = vpack.c.bf16 %v2965_v34, %v2964_v32 }
 0x390   : > { %4142 = vmatmul.mubr.bf16.gmra.mrb[248].mxu0 %v3064_v9 }
 0x391   : > { %4295 = vmatmul.mubr.bf16.gmra.mrb[244].mxu1 %v9919_v43  ;;  %4149 = vmatprep.mubr.bf16.mxu0 %v9944_v53  ;;  %v2967_v43 = vld [vmem:[#allocation3 + $0x111] sm:$0xff]  ;;  %v2966_v53 = vld [vmem:[#allocation3 + $0x109] sm:$0xff] }
 0x392   : > { %4302 = vmatprep.mubr.bf16.mxu1 %v3073_v55  ;;  %v3100_v7 = vpack.c.bf16 %v2967_v43, %v2966_v53 }
 0x398   : > { %4150 = vmatmul.mubr.bf16.gmra.mrb[252].mxu0 %v3073_v55 }
 0x399   : > { %4303 = vmatmul.mubr.bf16.gmra.mrb[248].mxu1 %v9931_v47  ;;  %4157 = vmatprep.mubr.bf16.mxu0 %v9952_v15  ;;  %v2969_v47 = vld [vmem:[#allocation3 + $0x129] sm:$0xff]  ;;  %v2968_v15 = vld [vmem:[#allocation3 + $0x121] sm:$0xff] }
 0x39a   : > { %4310 = vmatprep.mubr.bf16.mxu1 %v3082_v62  ;;  %v3109_v28 = vpack.c.bf16 %v2969_v47, %v2968_v15 }
 0x3a0   : > { %4158 = vmatmul.mubr.bf16.gmra.mrb[0].mxu0 %v3082_v62 }
 0x3a1   : > { %4311 = vmatmul.mubr.bf16.gmra.mrb[252].mxu1 %v9939_v21  ;;  %4165 = vmatprep.mubr.bf16.mxu0 %v9962_v3  ;;  %v2971_v21 = vld [vmem:[#allocation3 + $0x141] sm:$0xff]  ;;  %v2970_v3 = vld [vmem:[#allocation3 + $0x139] sm:$0xff] }
 0x3a2   : > { %4318 = vmatprep.mubr.bf16.mxu1 %v3091_v35  ;;  %v3118_v41 = vpack.c.bf16 %v2971_v21, %v2970_v3  ;;  %v8656_v21 = vld [vmem:[%s10978_s7 + $0x48] sm:$0xff]  }
 0x3a8   : > { %4166 = vmatmul.mubr.bf16.gmra.mrb[4].mxu0 %v3091_v35  ;;  %v2977_v35 = vld [vmem:[#allocation3 + $0x189] sm:$0xff] }
 0x3a9   : > { %4319 = vmatmul.mubr.bf16.gmra.mrb[0].mxu1 %v9947_v16  ;;  %4173 = vmatprep.mubr.bf16.mxu0 %v9972_v17  ;;  %v10054_v16 = vld [vmem:[%s10977_s6] ss:$0 sm:$0xff] }
 0x3aa   : > { %4326 = vmatprep.mubr.bf16.mxu1 %v3100_v7  ;;  %v3774_v26 = vadd.f32 %v9960_v40, %v10054_v16  ;;  %v3777_v48 = vadd.f32 %v9964_v30, %v10054_v16  ;;  %v8655_v40 = vld [vmem:[%s10978_s7] sm:$0xff]  }
 0x3ab   : > { %7814 = vmatpush3.bf16.msra.mxu1 %v8655_v40 }
 0x3ac   : > { %7815 = vmatprep.subr.bf16.mxu1 %v8656_v21  ;;  %v2988_v21 = vld [vmem:[#allocation3 + $0x92] sm:$0xff] }
 0x3b0   : > { %4174 = vmatmul.mubr.bf16.gmra.mrb[8].mxu0 %v3100_v7 }
 0x3b1   : > { %4327 = vmatmul.mubr.bf16.gmra.mrb[4].mxu1 %v9955_v42  ;;  %4181 = vmatprep.mubr.bf16.mxu0 %v9980_v25 }
 0x3b2   : > { %4334 = vmatprep.mubr.bf16.mxu1 %v3109_v28 }
 0x3b8   : > { %4182 = vmatmul.mubr.bf16.gmra.mrb[12].mxu0 %v3109_v28  ;;  %v2976_v28 = vld [vmem:[#allocation3 + $0x181] sm:$0xff] }
 0x3b9   : > { %4335 = vmatmul.mubr.bf16.gmra.mrb[8].mxu1 %v9967_v38  ;;  %4189 = vmatprep.mubr.bf16.mxu0 %v9988_v2 }
 0x3ba   : > { %4342 = vmatprep.mubr.bf16.mxu1 %v3118_v41 }
 0x3bb   : > { %v7363_v17 = vpop.f32.mrb[164].mxu0 }
 0x3bc   : > { %v7469_v56 = vpop.f32.mrb[160].mxu1  ;;  %v7364_v42 = vpop.f32.mrb[165].mxu0 }
 0x3bd   : > { %v7365_v4 = vadd.f32 %v7364_v42, %v7363_v17  ;;  %v7470_v25 = vpop.f32.mrb[161].mxu1  ;;  %v7366_v63 = vpop.f32.mrb[166].mxu0  ;;  %v3145_v17 = vpack.c.bf16 %v2977_v35, %v2976_v28  ;;  %v8657_v42 = vld [vmem:[%s10978_s7 + $0x8] sm:$0xff]  }
 0x3be   : > { %v7471_v58 = vadd.f32 %v7470_v25, %v7469_v56  ;;  %v7472_v38 = vpop.f32.mrb[162].mxu1  ;;  %v7367_v20 = vpop.f32.mrb[167].mxu0  ;;  %7816 = vmatpush3.bf16.msra.mxu1 %v8657_v42 }
 0x3bf   : > { %v7368_v2 = vadd.f32 %v7367_v20, %v7366_v63  ;;  %v7473_v31 = vpop.f32.mrb[163].mxu1  ;;  %v2978_v63 = vld [vmem:[#allocation3 + $0x199] sm:$0xff] }
 0x3c0   : > { %v7474_v51 = vadd.f32 %v7473_v31, %v7472_v38  ;;  %4190 = vmatmul.mubr.bf16.gmra.mrb[16].mxu0 %v3118_v41  ;;  %v10063_v39 = vadd.f32 %v7471_v58, %v3774_v26  ;;  %v2980_v38 = vld [vmem:[#allocation3 + $0x32] sm:$0xff]  ;;  %v2981_v20 = vld [vmem:[#allocation3 + $0x3a] sm:$0xff] }
 0x3c1   : > { %4343 = vmatmul.mubr.bf16.gmra.mrb[12].mxu1 %v9975_v0  ;;  %4197 = vmatprep.mubr.bf16.mxu0 %v9996_v23  ;;  %v3782_v0 = vadd.f32 %v7365_v4, %v10054_v16  ;;  %v3785_v52 = vadd.f32 %v7368_v2, %v10054_v16 }
 0x3c2   : > { %4350 = vmatprep.mubr.bf16.mxu1 %v3127_v13  ;;  %v10070_v36 = vadd.f32 %v7474_v51, %v3777_v48 }
 0x3c3   : > { %v7369_v27 = vpop.f32.mrb[168].mxu0 }
 0x3c4   : > { %v7475_v30 = vpop.f32.mrb[164].mxu1  ;;  %v7370_v59 = vpop.f32.mrb[169].mxu0 }
 0x3c5   : > { %v7371_v57 = vadd.f32 %v7370_v59, %v7369_v27  ;;  %v7476_v49 = vpop.f32.mrb[165].mxu1  ;;  %v7372_v8 = vpop.f32.mrb[170].mxu0 }
 0x3c6   : > { %v7477_v6 = vadd.f32 %v7476_v49, %v7475_v30  ;;  %v7478_v23 = vpop.f32.mrb[166].mxu1  ;;  %v7373_v37 = vpop.f32.mrb[171].mxu0  ;;  %v3020_v30 = vpack.c.bf16 %v2981_v20, %v2980_v38 }
 0x3c7   : > { %v7374_v29 = vadd.f32 %v7373_v37, %v7372_v8  ;;  %v7479_v1 = vpop.f32.mrb[167].mxu1  ;;  %v3790_v43 = vadd.f32 %v7371_v57, %v10054_v16  ;;  %v2985_v37 = vld [vmem:[#allocation3 + $0x6a] sm:$0xff] }
 0x3c8   : > { %v7480_v33 = vadd.f32 %v7479_v1, %v7478_v23  ;;  %4198 = vmatmul.mubr.bf16.gmra.mrb[20].mxu0 %v3127_v13  ;;  %v10074_v22 = vadd.f32 %v7477_v6, %v3782_v0  ;;  %v3154_v13 = vpack.c.bf16 %v2979_v45, %v2978_v63  ;;  %v2984_v23 = vld [vmem:[#allocation3 + $0x62] sm:$0xff] }
 0x3c9   : > { %4351 = vmatmul.mubr.bf16.gmra.mrb[16].mxu1 %v9983_v19  ;;  %4205 = vmatprep.mubr.bf16.mxu0 %v10004_v24  ;;  %v10081_v24 = vpack.c.bf16 %v2914_v50, %v2913_v5  ;;  %v3793_v3 = vadd.f32 %v7374_v29, %v10054_v16  ;;  %v3038_v50 = vpack.c.bf16 %v2985_v37, %v2984_v23 }
 0x3ca   : > { %4358 = vmatprep.mubr.bf16.mxu1 %v3136_v60  ;;  %v10078_v9 = vadd.f32 %v7480_v33, %v3785_v52  ;;  %v8727_v52 = vld [vmem:[#allocation2] sm:$0xff] }
 0x3cb   : > { %v7375_v14 = vpop.f32.mrb[172].mxu0  ;;  %v10103_v33 = vpack.c.bf16 %v8727_v52, %v8727_v52 }
 0x3cc   : > { %v7481_v11 = vpop.f32.mrb[168].mxu1  ;;  %v7376_v55 = vpop.f32.mrb[173].mxu0 }
 0x3cd   : > { %v7377_v62 = vadd.f32 %v7376_v55, %v7375_v14  ;;  %v7482_v34 = vpop.f32.mrb[169].mxu1  ;;  %v7378_v32 = vpop.f32.mrb[174].mxu0 }
 0x3ce   : > { %v7483_v53 = vadd.f32 %v7482_v34, %v7481_v11  ;;  %v7484_v7 = vpop.f32.mrb[170].mxu1  ;;  %v7379_v47 = vpop.f32.mrb[175].mxu0 }
 0x3cf   : > { %v7380_v19 = vadd.f32 %v7379_v47, %v7378_v32  ;;  %v7485_v15 = vpop.f32.mrb[171].mxu1  ;;  %v3798_v44 = vadd.f32 %v7377_v62, %v10054_v16  ;;  %v8658_v62 = vld [vmem:[%s10978_s7 + $0x50] sm:$0xff]  }
 0x3d0   : > { %v7486_v41 = vadd.f32 %v7485_v15, %v7484_v7  ;;  %4206 = vmatmul.mubr.bf16.gmra.mrb[24].mxu0 %v3136_v60  ;;  %v10087_v56 = vadd.f32 %v7483_v53, %v3790_v43  ;;  %v8659_v43 = vld [vmem:[%s10978_s7 + $0x10] sm:$0xff]   ;;  %7817 = vmatprep.subr.bf16.mxu1 %v8658_v62 }
 0x3d1   : > { %4359 = vmatmul.mubr.bf16.gmra.mrb[20].mxu1 %v9991_v54  ;;  %4213 = vmatprep.mubr.bf16.mxu0 %v10081_v24  ;;  %v3801_v59 = vadd.f32 %v7380_v19, %v10054_v16  ;;  %v2986_v47 = vld [vmem:[#allocation3 + $0x7a] sm:$0xff]  ;;  %v2987_v19 = vld [vmem:[#allocation3 + $0x82] sm:$0xff] }
 0x3d2   : > { %4366 = vmatprep.mubr.bf16.mxu1 %v3145_v17  ;;  %v10094_v4 = vadd.f32 %v7486_v41, %v3793_v3  ;;  %7818 = vmatpush3.bf16.msra.mxu1 %v8659_v43  ;;  %v2994_v62 = vld [vmem:[#allocation3 + $0xda] sm:$0xff] }
 0x3d3   : > { %v7381_v25 = vpop.f32.mrb[176].mxu0 }
 0x3d4   : > { %v7487_v26 = vpop.f32.mrb[172].mxu1  ;;  %v7382_v58 = vpop.f32.mrb[177].mxu0 }
 0x3d5   : > { %v7383_v2 = vadd.f32 %v7382_v58, %v7381_v25  ;;  %v7488_v54 = vpop.f32.mrb[173].mxu1  ;;  %v7384_v31 = vpop.f32.mrb[178].mxu0 }
 0x3d6   : > { %v7489_v61 = vadd.f32 %v7488_v54, %v7487_v26  ;;  %v7490_v48 = vpop.f32.mrb[174].mxu1  ;;  %v7385_v51 = vpop.f32.mrb[179].mxu0  ;;  %v3047_v26 = vpack.c.bf16 %v2987_v19, %v2986_v47  ;;  %v2997_v47 = vld [vmem:[#allocation3 + $0xfa] sm:$0xff] }
 0x3d7   : > { %v7386_v40 = vadd.f32 %v7385_v51, %v7384_v31  ;;  %v7491_v27 = vpop.f32.mrb[175].mxu1  ;;  %v3806_v60 = vadd.f32 %v7383_v2, %v10054_v16  ;;  %v2991_v51 = vld [vmem:[#allocation3 + $0xb2] sm:$0xff] }
 0x3d8   : > { %v7492_v57 = vadd.f32 %v7491_v27, %v7490_v48  ;;  %4214 = vmatmul.mubr.bf16.gmra.mrb[28].mxu0 %v3145_v17  ;;  %v10098_v49 = vadd.f32 %v7489_v61, %v3798_v44  ;;  %v2990_v48 = vld [vmem:[#allocation3 + $0xaa] sm:$0xff]  ;;  %v2992_v27 = vld [vmem:[#allocation3 + $0xc2] sm:$0xff] }
 0x3d9   : > { %4367 = vmatmul.mubr.bf16.gmra.mrb[24].mxu1 %v9999_v46  ;;  %8397 = vmatprep.mubr.bf16.mxu0 %v3020_v30  ;;  %v3809_v34 = vadd.f32 %v7386_v40, %v10054_v16  ;;  %v2993_v30 = vld [vmem:[#allocation3 + $0xca] sm:$0xff] }
 0x3da   : > { %4374 = vmatprep.mubr.bf16.mxu1 %v3154_v13  ;;  %v10101_v8 = vadd.f32 %v7492_v57, %v3801_v59  ;;  %v3074_v52 = vpack.c.bf16 %v2993_v30, %v2992_v27 }
 0x3db   : > { %v7387_v12 = vpop.f32.mrb[180].mxu0 }
 0x3dc   : > { %v7493_v0 = vpop.f32.mrb[176].mxu1  ;;  %v7388_v6 = vpop.f32.mrb[181].mxu0 }
 0x3dd   : > { %v7389_v29 = vadd.f32 %v7388_v6, %v7387_v12  ;;  %v7494_v1 = vpop.f32.mrb[177].mxu1  ;;  %v7390_v18 = vpop.f32.mrb[182].mxu0 }
 0x3de   : > { %v7495_v14 = vadd.f32 %v7494_v1, %v7493_v0  ;;  %v7496_v11 = vpop.f32.mrb[178].mxu1  ;;  %v7391_v46 = vpop.f32.mrb[183].mxu0 }
 0x3df   : > { %v7392_v55 = vadd.f32 %v7391_v46, %v7390_v18  ;;  %v7497_v5 = vpop.f32.mrb[179].mxu1  ;;  %v3814_v42 = vadd.f32 %v7389_v29, %v10054_v16  ;;  %v3065_v29 = vpack.c.bf16 %v2991_v51, %v2990_v48  ;;  %v3000_v51 = vld [vmem:[#allocation3 + $0x122] sm:$0xff] }
 0x3e0   : > { %v7498_v32 = vadd.f32 %v7497_v5, %v7496_v11  ;;  %8398 = vmatmul.mubr.bf16.vlgmr.msra.gmra.mrb[32].mxu0 %v9876_v10  ;;  %v10111_v35 = vadd.f32 %v7495_v14, %v3806_v60  ;;  %v2989_v10 = vld [vmem:[#allocation3 + $0x9a] sm:$0xff]  ;;  %v8660_v60 = vld [vmem:[%s10978_s7 + $0x58] sm:$0xff]  }
 0x3e1   : > { %4375 = vmatmul.mubr.bf16.gmra.mrb[28].mxu1 %v10103_v33  ;;  %8401 = vmatprep.mubr.bf16.mxu0 %v3038_v50  ;;  %v3056_v20 = vpack.c.bf16 %v2989_v10, %v2988_v21  ;;  %v3817_v2 = vadd.f32 %v7392_v55, %v10054_v16  ;;  %v8661_v55 = vld [vmem:[%s10978_s7 + $0x18] sm:$0xff]  }
 0x3e2   : > { %v10117_v53 = vadd.f32 %v7498_v32, %v3809_v34  ;;  %7819 = vmatprep.subr.bf16.mxu1 %v8660_v60  ;;  %v2995_v34 = vld [vmem:[#allocation3 + $0xe2] sm:$0xff] }
 0x3e3   : > { %v7393_v7 = vpop.f32.mrb[184].mxu0  ;;  %7820 = vmatpush3.bf16.msra.mxu1 %v8661_v55 }
 0x3e4   : > { %v7499_v15 = vpop.f32.mrb[180].mxu1  ;;  %v7394_v28 = vpop.f32.mrb[185].mxu0 }
 0x3e5   : > { %v7395_v3 = vadd.f32 %v7394_v28, %v7393_v7  ;;  %v7500_v41 = vpop.f32.mrb[181].mxu1  ;;  %v7396_v17 = vpop.f32.mrb[186].mxu0  ;;  %v2996_v7 = vld [vmem:[#allocation3 + $0xf2] sm:$0xff] }
 0x3e6   : > { %v7501_v25 = vadd.f32 %v7500_v41, %v7499_v15  ;;  %v7502_v63 = vpop.f32.mrb[182].mxu1  ;;  %v7397_v45 = vpop.f32.mrb[187].mxu0 }
 0x3e7   : > { %v7398_v58 = vadd.f32 %v7397_v45, %v7396_v17  ;;  %v7503_v38 = vpop.f32.mrb[183].mxu1  ;;  %v3822_v0 = vadd.f32 %v7395_v3, %v10054_v16  ;;  %v3083_v17 = vpack.c.bf16 %v2995_v34, %v2994_v62  ;;  %v3003_v62 = vld [vmem:[#allocation3 + $0x142] sm:$0xff] }
 0x3e8   : > { %v7504_v54 = vadd.f32 %v7503_v38, %v7502_v63  ;;  %8402 = vmatmul.mubr.bf16.gmra.mrb[36].mxu0 %v3047_v26  ;;  %v10121_v31 = vadd.f32 %v7501_v25, %v3814_v42  ;;  %v3092_v63 = vpack.c.bf16 %v2997_v47, %v2996_v7  ;;  %v3005_v7 = vld [vmem:[#allocation3 + $0x15a] sm:$0xff] }
 0x3e9   : > { %8405 = vmatprep.mubr.bf16.mxu0 %v3056_v20  ;;  %v3825_v14 = vadd.f32 %v7398_v58, %v10054_v16 }
 0x3ea   : > { %v10123_v44 = vadd.f32 %v7504_v54, %v3817_v2  ;;  %v2998_v2 = vld [vmem:[#allocation3 + $0x10a] sm:$0xff]  ;;  %v2999_v54 = vld [vmem:[#allocation3 + $0x112] sm:$0xff] }
 0x3eb   : > { %v7399_v61 = vpop.f32.mrb[188].mxu0 }
 0x3ec   : > { %v7505_v13 = vpop.f32.mrb[184].mxu1  ;;  %v7400_v40 = vpop.f32.mrb[189].mxu0 }
 0x3ed   : > { %v7401_v59 = vadd.f32 %v7400_v40, %v7399_v61  ;;  %v7506_v57 = vpop.f32.mrb[185].mxu1  ;;  %v7402_v12 = vpop.f32.mrb[190].mxu0 }
 0x3ee   : > { %v7507_v6 = vadd.f32 %v7506_v57, %v7505_v13  ;;  %v7508_v23 = vpop.f32.mrb[186].mxu1  ;;  %v7403_v37 = vpop.f32.mrb[191].mxu0  ;;  %v3001_v13 = vld [vmem:[#allocation3 + $0x12a] sm:$0xff] }
 0x3ef   : > { %v7404_v1 = vadd.f32 %v7403_v37, %v7402_v12  ;;  %v7509_v18 = vpop.f32.mrb[187].mxu1  ;;  %v3830_v21 = vadd.f32 %v7401_v59, %v10054_v16 }
 0x3f0   : > { %v7510_v11 = vadd.f32 %v7509_v18, %v7508_v23  ;;  %8406 = vmatmul.mubr.bf16.gmra.mrb[40].mxu0 %v3065_v29  ;;  %v10130_v46 = vadd.f32 %v7507_v6, %v3822_v0  ;;  %v3101_v6 = vpack.c.bf16 %v2999_v54, %v2998_v2  ;;  %v3110_v29 = vpack.c.bf16 %v3001_v13, %v3000_v51  ;;  %v3006_v54 = vld [vmem:[#allocation3 + $0x16a] sm:$0xff] }
 0x3f1   : > { %8409 = vmatprep.mubr.bf16.mxu0 %v3074_v52  ;;  %v3833_v45 = vadd.f32 %v7404_v1, %v10054_v16  ;;  %v8662_v1 = vld [vmem:[%s10978_s7 + $0x60] sm:$0xff]  }
 0x3f2   : > { %v10135_v5 = vadd.f32 %v7510_v11, %v3825_v14  ;;  %7821 = vmatprep.subr.bf16.mxu1 %v8662_v1  ;;  %v8663_v14 = vld [vmem:[%s10978_s7 + $0x20] sm:$0xff]  }
 0x3f3   : > { %v7405_v50 = vpop.f32.mrb[192].mxu0  ;;  %7822 = vmatpush3.bf16.msra.mxu1 %v8663_v14  ;;  %v3011_v14 = vld [vmem:[#allocation3 + $0x1a2] sm:$0xff] }
 0x3f4   : > { %v7511_v32 = vpop.f32.mrb[188].mxu1  ;;  %v7406_v43 = vpop.f32.mrb[193].mxu0 }
 0x3f5   : > { %v7407_v19 = vadd.f32 %v7406_v43, %v7405_v50  ;;  %v7512_v15 = vpop.f32.mrb[189].mxu1  ;;  %v7408_v28 = vpop.f32.mrb[194].mxu0  ;;  %v3002_v50 = vld [vmem:[#allocation3 + $0x13a] sm:$0xff]  ;;  %v3004_v43 = vld [vmem:[#allocation3 + $0x152] sm:$0xff] }
 0x3f6   : > { %v7513_v10 = vadd.f32 %v7512_v15, %v7511_v32  ;;  %v7514_v3 = vpop.f32.mrb[190].mxu1  ;;  %v7409_v41 = vpop.f32.mrb[195].mxu0 }
 0x3f7   : > { %v7410_v42 = vadd.f32 %v7409_v41, %v7408_v28  ;;  %v7515_v25 = vpop.f32.mrb[191].mxu1  ;;  %v3838_v59 = vadd.f32 %v7407_v19, %v10054_v16  ;;  %v3119_v41 = vpack.c.bf16 %v3003_v62, %v3002_v50 }
 0x3f8   : > { %v7516_v26 = vadd.f32 %v7515_v25, %v7514_v3  ;;  %8410 = vmatmul.mubr.bf16.gmra.mrb[44].mxu0 %v3083_v17  ;;  %v10139_v58 = vadd.f32 %v7513_v10, %v3830_v21  ;;  %v3128_v25 = vpack.c.bf16 %v3005_v7, %v3004_v43 }
 0x3f9   : > { %8413 = vmatprep.mubr.bf16.mxu0 %v3092_v63  ;;  %v3841_v18 = vadd.f32 %v7410_v42, %v10054_v16 }
 0x3fa   : > { %v10141_v38 = vadd.f32 %v7516_v26, %v3833_v45 }
 0x3fb   : > { %v7411_v20 = vpop.f32.mrb[196].mxu0 }
 0x3fc   : > { %v7517_v61 = vpop.f32.mrb[192].mxu1  ;;  %v7412_v48 = vpop.f32.mrb[197].mxu0 }
 0x3fd   : > { %v7413_v40 = vadd.f32 %v7412_v48, %v7411_v20  ;;  %v7518_v27 = vpop.f32.mrb[193].mxu1  ;;  %v7414_v30 = vpop.f32.mrb[198].mxu0 }
 0x3fe   : > { %v7519_v57 = vadd.f32 %v7518_v27, %v7517_v61  ;;  %v7520_v12 = vpop.f32.mrb[194].mxu1  ;;  %v7415_v0 = vpop.f32.mrb[199].mxu0  ;;  %v3007_v61 = vld [vmem:[#allocation3 + $0x172] sm:$0xff] }
 0x3ff   : > { %v7416_v23 = vadd.f32 %v7415_v0, %v7414_v30  ;;  %v7521_v37 = vpop.f32.mrb[195].mxu1  ;;  %v3846_v28 = vadd.f32 %v7413_v40, %v10054_v16  ;;  %v3137_v0 = vpack.c.bf16 %v3007_v61, %v3006_v54 }
 0x400   : > { %v10148_v52 = vadd.f32 %v7519_v57, %v3838_v59  ;;  %v7522_v60 = vadd.f32 %v7521_v37, %v7520_v12  ;;  %8414 = vmatmul.mubr.bf16.gmra.mrb[48].mxu0 %v3101_v6  ;;  %v8664_v37 = vld [vmem:[%s10978_s7 + $0x68] sm:$0xff]  }
 0x401   : > { %8417 = vmatprep.mubr.bf16.mxu0 %v3110_v29  ;;  %v3849_v63 = vadd.f32 %v7416_v23, %v10054_v16  ;;  %7823 = vmatprep.subr.bf16.mxu1 %v8664_v37 }
 0x402   : > { %v10153_v11 = vadd.f32 %v7522_v60, %v3841_v18  ;;  %v3010_v60 = vld [vmem:[#allocation3 + $0x19a] sm:$0xff] }
 0x403   : > { %v7417_v55 = vpop.f32.mrb[200].mxu0  ;;  %v3155_v43 = vpack.c.bf16 %v3011_v14, %v3010_v60 }
 0x404   : > { %v7523_v34 = vpop.f32.mrb[196].mxu1  ;;  %v7418_v32 = vpop.f32.mrb[201].mxu0 }
 0x405   : > { %v7419_v47 = vadd.f32 %v7418_v32, %v7417_v55  ;;  %v7524_v19 = vpop.f32.mrb[197].mxu1  ;;  %v7420_v15 = vpop.f32.mrb[202].mxu0  ;;  %v8665_v55 = vld [vmem:[%s10978_s7 + $0x28] sm:$0xff]  }
 0x406   : > { %v7525_v21 = vadd.f32 %v7524_v19, %v7523_v34  ;;  %v7526_v10 = vpop.f32.mrb[198].mxu1  ;;  %v7421_v3 = vpop.f32.mrb[203].mxu0  ;;  %7824 = vmatpush3.bf16.msra.mxu1 %v8665_v55 }
 0x407   : > { %v7422_v17 = vadd.f32 %v7421_v3, %v7420_v15  ;;  %v7527_v42 = vpop.f32.mrb[199].mxu1  ;;  %v3854_v30 = vadd.f32 %v7419_v47, %v10054_v16 }
 0x408   : > { %v10157_v45 = vadd.f32 %v7525_v21, %v3846_v28  ;;  %v7528_v26 = vadd.f32 %v7527_v42, %v7526_v10  ;;  %8418 = vmatmul.mubr.bf16.gmra.mrb[52].mxu0 %v3119_v41 }
 0x409   : > { %8421 = vmatprep.mubr.bf16.mxu0 %v3128_v25  ;;  %v3857_v29 = vadd.f32 %v7422_v17, %v10054_v16 }
 0x40a   : > { %v10159_v20 = vadd.f32 %v7528_v26, %v3849_v63 }
 0x40b   : > { %v7423_v2 = vpop.f32.mrb[204].mxu0 }
 0x40c   : > { %v7529_v48 = vpop.f32.mrb[200].mxu1  ;;  %v7424_v51 = vpop.f32.mrb[205].mxu0 }
 0x40d   : > { %v7425_v13 = vadd.f32 %v7424_v51, %v7423_v2  ;;  %v7530_v40 = vpop.f32.mrb[201].mxu1  ;;  %v7426_v27 = vpop.f32.mrb[206].mxu0 }
 0x40e   : > { %v7531_v59 = vadd.f32 %v7530_v40, %v7529_v48  ;;  %v7532_v57 = vpop.f32.mrb[202].mxu1  ;;  %v7427_v12 = vpop.f32.mrb[207].mxu0 }
 0x40f   : > { %v7428_v6 = vadd.f32 %v7427_v12, %v7426_v27  ;;  %v7533_v23 = vpop.f32.mrb[203].mxu1  ;;  %v3862_v15 = vadd.f32 %v7425_v13, %v10054_v16 }
 0x410   : > { %v10166_v1 = vadd.f32 %v7531_v59, %v3854_v30  ;;  %v7534_v18 = vadd.f32 %v7533_v23, %v7532_v57  ;;  %8422 = vmatmul.mubr.bf16.gmra.mrb[56].mxu0 %v3137_v0  ;;  %v8666_v57 = vld [vmem:[%s10978_s7 + $0x70] sm:$0xff]  }
 0x411   : > { %8425 = vmatprep.mubr.bf16.mxu0 %v10081_v24  ;;  %v3865_v41 = vadd.f32 %v7428_v6, %v10054_v16  ;;  %7825 = vmatprep.subr.bf16.mxu1 %v8666_v57  ;;  %v8667_v23 = vld [vmem:[%s10978_s7 + $0x30] sm:$0xff]   ;;  %v8672_v57 = vld [vmem:[%s10978_s7 + $0x78] sm:$0xff]  }
 0x412   : > { %v10172_v50 = vadd.f32 %v7534_v18, %v3857_v29  ;;  %7826 = vmatpush3.bf16.msra.mxu1 %v8667_v23 }
 0x413   : > { %v7429_v62 = vpop.f32.mrb[208].mxu0  ;;  %7827 = vmatprep.subr.bf16.mxu1 %v8672_v57 }
 0x414   : > { %v7535_v34 = vpop.f32.mrb[204].mxu1  ;;  %v7430_v32 = vpop.f32.mrb[209].mxu0 }
 0x415   : > { %v7431_v7 = vadd.f32 %v7430_v32, %v7429_v62  ;;  %v7536_v47 = vpop.f32.mrb[205].mxu1  ;;  %v7432_v19 = vpop.f32.mrb[210].mxu0 }
 0x416   : > { %v7537_v24 = vadd.f32 %v7536_v47, %v7535_v34  ;;  %v7538_v28 = vpop.f32.mrb[206].mxu1  ;;  %v7433_v21 = vpop.f32.mrb[211].mxu0 }
 0x417   : > { %v7434_v10 = vadd.f32 %v7433_v21, %v7432_v19  ;;  %v7539_v3 = vpop.f32.mrb[207].mxu1  ;;  %v3870_v51 = vadd.f32 %v7431_v7, %v10054_v16 }
 0x418   : > { %v10176_v17 = vadd.f32 %v7537_v24, %v3862_v15  ;;  %v7540_v42 = vadd.f32 %v7539_v3, %v7538_v28  ;;  %8426 = vmatmul.mubr.bf16.gmra.mrb[60].mxu0 %v3155_v43  ;;  %v8668_v15 = vld [vmem:[%s10978_s7 + $0xc0] sm:$0xff]   ;;  %v8670_v3 = vld [vmem:[%s10978_s7 + $0xc8] sm:$0xff]  }
 0x419   : > { %v3873_v12 = vadd.f32 %v7434_v10, %v10054_v16  ;;  %v8669_v10 = vld [vmem:[%s10978_s7 + $0x80] sm:$0xff]   ;;  %7925 = vmatprep.subr.bf16.mxu0 %v8668_v15 }
 0x41a   : > { %v10178_v25 = vadd.f32 %v7540_v42, %v3865_v41  ;;  %7926 = vmatpush3.bf16.msra.mxu0 %v8669_v10 }
 0x41b   : > { %v7435_v63 = vpop.f32.mrb[212].mxu0  ;;  %7927 = vmatprep.subr.bf16.mxu0 %v8670_v3 }
 0x41c   : > { %v7541_v26 = vpop.f32.mrb[208].mxu1  ;;  %v7436_v2 = vpop.f32.mrb[213].mxu0 }
 0x41d   : > { %v7437_v54 = vadd.f32 %v7436_v2, %v7435_v63  ;;  %v7542_v61 = vpop.f32.mrb[209].mxu1  ;;  %v7438_v48 = vpop.f32.mrb[214].mxu0  ;;  %v8671_v2 = vld [vmem:[%s10978_s7 + $0x88] sm:$0xff]  }
 0x41e   : > { %v7543_v13 = vadd.f32 %v7542_v61, %v7541_v26  ;;  %v7544_v40 = vpop.f32.mrb[210].mxu1  ;;  %v7439_v27 = vpop.f32.mrb[215].mxu0  ;;  %7928 = vmatpush3.bf16.msra.mxu0 %v8671_v2 }
 0x41f   : > { %v7440_v30 = vadd.f32 %v7439_v27, %v7438_v48  ;;  %v7545_v59 = vpop.f32.mrb[211].mxu1  ;;  %v3878_v34 = vadd.f32 %v7437_v54, %v10054_v16 }
 0x420   : > { %v10185_v0 = vadd.f32 %v7543_v13, %v3870_v51  ;;  %v7546_v6 = vadd.f32 %v7545_v59, %v7544_v40 }
 0x421   : > { %v3881_v24 = vadd.f32 %v7440_v30, %v10054_v16 }
 0x422   : > { %v10190_v37 = vadd.f32 %v7546_v6, %v3873_v12  ;;  %v8674_v12 = vld [vmem:[%s10978_s7 + $0xd0] sm:$0xff]  }
 0x423   : > { %v7441_v29 = vpop.f32.mrb[216].mxu0  ;;  %7929 = vmatprep.subr.bf16.mxu0 %v8674_v12  ;;  %v8681_v12 = vld [vmem:[%s10978_s7 + $0xa8] sm:$0xff]  }
 0x424   : > { %v7547_v18 = vpop.f32.mrb[212].mxu1  ;;  %v7442_v60 = vpop.f32.mrb[217].mxu0 }
 0x425   : > { %v7443_v14 = vadd.f32 %v7442_v60, %v7441_v29  ;;  %v7548_v55 = vpop.f32.mrb[213].mxu1  ;;  %v7444_v62 = vpop.f32.mrb[218].mxu0  ;;  %v8673_v60 = vld [vmem:[%s10978_s7 + $0x38] sm:$0xff]  }
 0x426   : > { %v7549_v32 = vadd.f32 %v7548_v55, %v7547_v18  ;;  %v7550_v43 = vpop.f32.mrb[214].mxu1  ;;  %v7445_v7 = vpop.f32.mrb[219].mxu0  ;;  %v8675_v18 = vld [vmem:[%s10978_s7 + $0x90] sm:$0xff]   ;;  %7828 = vmatpush3.bf16.msra.mxu1 %v8673_v60 }
 0x427   : > { %v7446_v47 = vadd.f32 %v7445_v7, %v7444_v62  ;;  %v7551_v19 = vpop.f32.mrb[215].mxu1  ;;  %v3886_v51 = vadd.f32 %v7443_v14, %v10054_v16  ;;  %v8676_v14 = vld [vmem:[%s10978_s7 + $0xd8] sm:$0xff]   ;;  %7930 = vmatpush3.bf16.msra.mxu0 %v8675_v18 }
 0x428   : > { %v10197_v28 = vadd.f32 %v7549_v32, %v3878_v34  ;;  %v7552_v21 = vadd.f32 %v7551_v19, %v7550_v43  ;;  %7931 = vmatprep.subr.bf16.mxu0 %v8676_v14  ;;  %v8677_v43 = vld [vmem:[%s10978_s7 + $0x98] sm:$0xff]  }
 0x429   : > { %v3889_v6 = vadd.f32 %v7446_v47, %v10054_v16 }
 0x42a   : > { %v10205_v41 = vadd.f32 %v7552_v21, %v3881_v24 }
 0x42b   : > { %v7447_v42 = vpop.f32.mrb[220].mxu0  ;;  %7932 = vmatpush3.bf16.msra.mxu0 %v8677_v43  ;;  %v8683_v43 = vld [vmem:[%s10978_s7 + $0xf0] sm:$0xff]  }
 0x42c   : > { %v7553_v63 = vpop.f32.mrb[216].mxu1  ;;  %v7448_v26 = vpop.f32.mrb[221].mxu0 }
 0x42d   : > { %v7449_v54 = vadd.f32 %v7448_v26, %v7447_v42  ;;  %v7554_v61 = vpop.f32.mrb[217].mxu1  ;;  %v7450_v48 = vpop.f32.mrb[222].mxu0  ;;  %v8678_v26 = vld [vmem:[%s10978_s7 + $0xe0] sm:$0xff]  }
 0x42e   : > { %v7555_v13 = vadd.f32 %v7554_v61, %v7553_v63  ;;  %v7556_v40 = vpop.f32.mrb[218].mxu1  ;;  %v7451_v27 = vpop.f32.mrb[223].mxu0  ;;  %7933 = vmatprep.subr.bf16.mxu0 %v8678_v26 }
 0x42f   : > { %v7452_v30 = vadd.f32 %v7451_v27, %v7450_v48  ;;  %v7557_v59 = vpop.f32.mrb[219].mxu1  ;;  %v3894_v15 = vadd.f32 %v7449_v54, %v10054_v16  ;;  %v8679_v54 = vld [vmem:[%s10978_s7 + $0xa0] sm:$0xff]  }
 0x430   : > { %v10218_v23 = vadd.f32 %v7555_v13, %v3886_v51  ;;  %v7558_v29 = vadd.f32 %v7557_v59, %v7556_v40  ;;  %v4680_v13 = vld [vmem:[#allocation4 + $0x1] sm:$0xff]  ;;  %7934 = vmatpush3.bf16.msra.mxu0 %v8679_v54 }
 0x431   : > { %v3897_v2 = vadd.f32 %v7452_v30, %v10054_v16  ;;  %v8680_v16 = vld [vmem:[%s10978_s7 + $0xe8] sm:$0xff]  }
 0x432   : > { %v10229_v55 = vadd.f32 %v7558_v29, %v3889_v6  ;;  %7935 = vmatprep.subr.bf16.mxu0 %v8680_v16 }
 0x433   : > { %v7581_v62 = vpop.f32.mrb[224].mxu0 }
 0x434   : > { %v7559_v34 = vpop.f32.mrb[220].mxu1  ;;  %v7582_v32 = vpop.f32.mrb[225].mxu0  ;;  %7936 = vmatpush3.bf16.msra.mxu0 %v8681_v12  ;;  %v8684_v12 = vld [vmem:[%s10978_s7 + $0x100] sm:$0xff]  }
 0x435   : > { %v7560_v7 = vpop.f32.mrb[221].mxu1  ;;  %v7583_v47 = vadd.f32 %v7582_v32, %v7581_v62  ;;  %v7584_v19 = vpop.f32.mrb[226].mxu0  ;;  %7937 = vmatprep.subr.bf16.mxu0 %v8683_v43 }
 0x436   : > { %v7561_v24 = vadd.f32 %v7560_v7, %v7559_v34  ;;  %v7562_v21 = vpop.f32.mrb[222].mxu1  ;;  %v7585_v10 = vpop.f32.mrb[227].mxu0 }
 0x437   : > { %v4096_v3 = vadd.f32 %v7583_v47, %v10063_v39  ;;  %v7563_v42 = vpop.f32.mrb[223].mxu1  ;;  %v7586_v63 = vadd.f32 %v7585_v10, %v7584_v19  ;;  %v4681_v39 = vld [vmem:[#allocation4 + $0x9] sm:$0xff] }
 0x438   : > { %v10240_v61 = vadd.f32 %v7561_v24, %v3894_v15  ;;  %v7564_v48 = vadd.f32 %v7563_v42, %v7562_v21  ;;  %v4938_v27 = vpack.c.bf16 %v4681_v39, %v4680_v13  ;;  %v8685_v19 = vld [vmem:[%s10978_s7 + $0xb0] sm:$0xff]   ;;  %v8686_v21 = vld [vmem:[%s10978_s7 + $0xf8] sm:$0xff]  }
 0x439   : > { %v4099_v51 = vadd.f32 %v7586_v63, %v10070_v36  ;;  %7938 = vmatpush3.bf16.msra.mxu0 %v8685_v19 }
 0x43a   : > { %v10246_v40 = vadd.f32 %v7564_v48, %v3897_v2  ;;  %5696 = vmatprep.mubr.bf16.mxu1 %v4938_v27  ;;  %7939 = vmatprep.subr.bf16.mxu0 %v8686_v21  ;;  %v8689_v21 = vld [vmem:[%s10978_s7 + $0x108] sm:$0xff]  }
 0x43b   : > { %v7587_v59 = vpop.f32.mrb[228].mxu0  ;;  %5697 = vmatmul.mubr.bf16.vlgmr.msra.gmra.mrb[32].mxu1 %v10103_v33 }
 0x43c   : > { %v7693_v30 = vpop.f32.mrb[224].mxu1  ;;  %v7588_v57 = vpop.f32.mrb[229].mxu0 }
 0x43d   : > { %v7589_v36 = vadd.f32 %v7588_v57, %v7587_v59  ;;  %v7694_v6 = vpop.f32.mrb[225].mxu1  ;;  %v7590_v29 = vpop.f32.mrb[230].mxu0 }
 0x43e   : > { %v7695_v18 = vadd.f32 %v7694_v6, %v7693_v30  ;;  %v7696_v60 = vpop.f32.mrb[226].mxu1  ;;  %v7591_v14 = vpop.f32.mrb[231].mxu0 }
 0x43f   : > { %v4104_v62 = vadd.f32 %v7589_v36, %v10074_v22  ;;  %v7592_v34 = vadd.f32 %v7591_v14, %v7590_v29  ;;  %v7697_v32 = vpop.f32.mrb[227].mxu1  ;;  %v8682_v22 = vld [vmem:[%s10978_s7 + $0x140] sm:$0xff]  }
 0x440   : > { %v7698_v7 = vadd.f32 %v7697_v32, %v7696_v60  ;;  %v10259_v47 = vadd.f32 %v7695_v18, %v4096_v3  ;;  %8037 = vmatprep.subr.bf16.mxu1 %v8682_v22  ;;  %v8688_v22 = vld [vmem:[%s10978_s7 + $0x148] sm:$0xff]  }
 0x441   : > { %v4107_v33 = vadd.f32 %v7592_v34, %v10078_v9  ;;  %v8687_v9 = vld [vmem:[%s10978_s7 + $0xb8] sm:$0xff]   ;;  %8038 = vmatpush3.bf16.msra.mxu1 %v8684_v12 }
 0x442   : > { %v10265_v15 = vadd.f32 %v7698_v7, %v4099_v51  ;;  %7940 = vmatpush3.bf16.msra.mxu0 %v8687_v9  ;;  %8039 = vmatprep.subr.bf16.mxu1 %v8688_v22  ;;  %v8691_v22 = vld [vmem:[%s10978_s7 + $0x110] sm:$0xff]  }
 0x443   : > { %v7593_v24 = vpop.f32.mrb[232].mxu0 }
 0x444   : > { %v7699_v10 = vpop.f32.mrb[228].mxu1  ;;  %v7594_v3 = vpop.f32.mrb[233].mxu0 }
 0x445   : > { %v7595_v42 = vadd.f32 %v7594_v3, %v7593_v24  ;;  %v7700_v63 = vpop.f32.mrb[229].mxu1  ;;  %v7596_v26 = vpop.f32.mrb[234].mxu0  ;;  %8040 = vmatpush3.bf16.msra.mxu1 %v8689_v21 }
 0x446   : > { %v7701_v2 = vadd.f32 %v7700_v63, %v7699_v10  ;;  %v7702_v48 = vpop.f32.mrb[230].mxu1  ;;  %v7597_v54 = vpop.f32.mrb[235].mxu0 }
 0x447   : > { %v4112_v51 = vadd.f32 %v7595_v42, %v10087_v56  ;;  %v7598_v13 = vadd.f32 %v7597_v54, %v7596_v26  ;;  %v7703_v39 = vpop.f32.mrb[231].mxu1 }
 0x448   : > { %v7704_v27 = vadd.f32 %v7703_v39, %v7702_v48  ;;  %v10277_v59 = vadd.f32 %v7701_v2, %v4104_v62 }
 0x449   : > { %v4115_v16 = vadd.f32 %v7598_v13, %v10094_v4 }
 0x44a   : > { %v10280_v30 = vadd.f32 %v7704_v27, %v4107_v33 }
 0x44b   : > { %v7599_v57 = vpop.f32.mrb[236].mxu0 }
 0x44c   : > { %v7705_v36 = vpop.f32.mrb[232].mxu1  ;;  %v7600_v6 = vpop.f32.mrb[237].mxu0 }
 0x44d   : > { %v7601_v29 = vadd.f32 %v7600_v6, %v7599_v57  ;;  %v7706_v18 = vpop.f32.mrb[233].mxu1  ;;  %v7602_v60 = vpop.f32.mrb[238].mxu0 }
 0x44e   : > { %v7707_v56 = vadd.f32 %v7706_v18, %v7705_v36  ;;  %v7708_v14 = vpop.f32.mrb[234].mxu1  ;;  %v7603_v34 = vpop.f32.mrb[239].mxu0 }
 0x44f   : > { %v4120_v62 = vadd.f32 %v7601_v29, %v10098_v49  ;;  %v7604_v32 = vadd.f32 %v7603_v34, %v7602_v60  ;;  %v7709_v4 = vpop.f32.mrb[235].mxu1 }
 0x450   : > { %v7710_v43 = vadd.f32 %v7709_v4, %v7708_v14  ;;  %v10286_v7 = vadd.f32 %v7707_v56, %v4112_v51 }
 0x451   : > { %v4123_v19 = vadd.f32 %v7604_v32, %v10101_v8 }
 0x452   : > { %v10289_v33 = vadd.f32 %v7710_v43, %v4115_v16  ;;  %v8690_v43 = vld [vmem:[%s10978_s7 + $0x150] sm:$0xff]  }
 0x453   : > { %v7605_v24 = vpop.f32.mrb[240].mxu0  ;;  %8041 = vmatprep.subr.bf16.mxu1 %v8690_v43  ;;  %v8693_v43 = vld [vmem:[%s10978_s7 + $0x118] sm:$0xff]  }
 0x454   : > { %v7711_v10 = vpop.f32.mrb[236].mxu1  ;;  %v7606_v49 = vpop.f32.mrb[241].mxu0  ;;  %8042 = vmatpush3.bf16.msra.mxu1 %v8691_v22 }
 0x455   : > { %v7607_v3 = vadd.f32 %v7606_v49, %v7605_v24  ;;  %v7712_v9 = vpop.f32.mrb[237].mxu1  ;;  %v7608_v42 = vpop.f32.mrb[242].mxu0 }
 0x456   : > { %v7713_v63 = vadd.f32 %v7712_v9, %v7711_v10  ;;  %v7714_v8 = vpop.f32.mrb[238].mxu1  ;;  %v7609_v26 = vpop.f32.mrb[243].mxu0 }
 0x457   : > { %v4128_v2 = vadd.f32 %v7607_v3, %v10111_v35  ;;  %v7610_v48 = vadd.f32 %v7609_v26, %v7608_v42  ;;  %v7715_v54 = vpop.f32.mrb[239].mxu1 }
 0x458   : > { %v7716_v51 = vadd.f32 %v7715_v54, %v7714_v8  ;;  %v10298_v13 = vadd.f32 %v7713_v63, %v4120_v62 }
 0x459   : > { %v4131_v39 = vadd.f32 %v7610_v48, %v10117_v53 }
 0x45a   : > { %v10301_v27 = vadd.f32 %v7716_v51, %v4123_v19 }
 0x45b   : > { %v7611_v16 = vpop.f32.mrb[244].mxu0 }
 0x45c   : > { %v7717_v57 = vpop.f32.mrb[240].mxu1  ;;  %v7612_v12 = vpop.f32.mrb[245].mxu0 }
 0x45d   : > { %v7613_v36 = vadd.f32 %v7612_v12, %v7611_v16  ;;  %v7718_v6 = vpop.f32.mrb[241].mxu1  ;;  %v7614_v29 = vpop.f32.mrb[246].mxu0 }
 0x45e   : > { %v7719_v18 = vadd.f32 %v7718_v6, %v7717_v57  ;;  %v7720_v60 = vpop.f32.mrb[242].mxu1  ;;  %v7615_v56 = vpop.f32.mrb[247].mxu0 }
 0x45f   : > { %v4136_v35 = vadd.f32 %v7613_v36, %v10121_v31  ;;  %v7616_v14 = vadd.f32 %v7615_v56, %v7614_v29  ;;  %v7721_v34 = vpop.f32.mrb[243].mxu1 }
 0x460   : > { %v7722_v32 = vadd.f32 %v7721_v34, %v7720_v60  ;;  %v10304_v62 = vadd.f32 %v7719_v18, %v4128_v2 }
 0x461   : > { %v4139_v53 = vadd.f32 %v7616_v14, %v10123_v44 }
 0x462   : > { %v10307_v4 = vadd.f32 %v7722_v32, %v4131_v39  ;;  %v8692_v32 = vld [vmem:[%s10978_s7 + $0x158] sm:$0xff]  }
 0x463   : > { %v7617_v19 = vpop.f32.mrb[248].mxu0  ;;  %8043 = vmatprep.subr.bf16.mxu1 %v8692_v32 }
 0x464   : > { %v7723_v24 = vpop.f32.mrb[244].mxu1  ;;  %v7618_v31 = vpop.f32.mrb[249].mxu0  ;;  %8044 = vmatpush3.bf16.msra.mxu1 %v8693_v43 }
 0x465   : > { %v7619_v21 = vadd.f32 %v7618_v31, %v7617_v19  ;;  %v7724_v10 = vpop.f32.mrb[245].mxu1  ;;  %v7620_v49 = vpop.f32.mrb[250].mxu0 }
 0x466   : > { %v7725_v3 = vadd.f32 %v7724_v10, %v7723_v24  ;;  %v7726_v44 = vpop.f32.mrb[246].mxu1  ;;  %v7621_v9 = vpop.f32.mrb[251].mxu0 }
 0x467   : > { %v4144_v42 = vadd.f32 %v7619_v21, %v10130_v46  ;;  %v7622_v63 = vadd.f32 %v7621_v9, %v7620_v49  ;;  %v7727_v8 = vpop.f32.mrb[247].mxu1  ;;  %v8694_v9 = vld [vmem:[%s10978_s7 + $0x1c0] sm:$0xff]  }
 0x468   : > { %v7728_v26 = vadd.f32 %v7727_v8, %v7726_v44  ;;  %v10316_v2 = vadd.f32 %v7725_v3, %v4136_v35  ;;  %8149 = vmatprep.subr.bf16.mxu0 %v8694_v9 }
 0x469   : > { %v4147_v48 = vadd.f32 %v7622_v63, %v10135_v5 }
 0x46a   : > { %v10319_v54 = vadd.f32 %v7728_v26, %v4139_v53 }
 0x46b   : > { %v7623_v51 = vpop.f32.mrb[252].mxu0 }
 0x46c   : > { %v7729_v39 = vpop.f32.mrb[248].mxu1  ;;  %v7624_v16 = vpop.f32.mrb[253].mxu0 }
 0x46d   : > { %v7625_v57 = vadd.f32 %v7624_v16, %v7623_v51  ;;  %v7730_v12 = vpop.f32.mrb[249].mxu1  ;;  %v7626_v36 = vpop.f32.mrb[254].mxu0 }
 0x46e   : > { %v7731_v6 = vadd.f32 %v7730_v12, %v7729_v39  ;;  %v7732_v29 = vpop.f32.mrb[250].mxu1  ;;  %v7627_v18 = vpop.f32.mrb[255].mxu0 }
 0x46f   : > { %v4152_v46 = vadd.f32 %v7625_v57, %v10139_v58  ;;  %v7628_v60 = vadd.f32 %v7627_v18, %v7626_v36  ;;  %v7733_v56 = vpop.f32.mrb[251].mxu1  ;;  %v8697_v18 = vld [vmem:[%s10978_s7 + $0x120] sm:$0xff]  }
 0x470   : > { %v7734_v14 = vadd.f32 %v7733_v56, %v7732_v29  ;;  %v10322_v35 = vadd.f32 %v7731_v6, %v4144_v42  ;;  %v8696_v42 = vld [vmem:[%s10978_s7 + $0x160] sm:$0xff]  }
 0x471   : > { %v4155_v5 = vadd.f32 %v7628_v60, %v10141_v38  ;;  %8045 = vmatprep.subr.bf16.mxu1 %v8696_v42 }
 0x472   : > { %v10325_v34 = vadd.f32 %v7734_v14, %v4147_v48  ;;  %8046 = vmatpush3.bf16.msra.mxu1 %v8697_v18 }
 0x473   : > { %v7629_v53 = vpop.f32.mrb[0].mxu0 }
 0x474   : > { %v7735_v19 = vpop.f32.mrb[252].mxu1  ;;  %v7630_v58 = vpop.f32.mrb[1].mxu0 }
 0x475   : > { %v7631_v22 = vadd.f32 %v7630_v58, %v7629_v53  ;;  %v7736_v24 = vpop.f32.mrb[253].mxu1  ;;  %v7632_v31 = vpop.f32.mrb[2].mxu0 }
 0x476   : > { %v7737_v21 = vadd.f32 %v7736_v24, %v7735_v19  ;;  %v7738_v38 = vpop.f32.mrb[254].mxu1  ;;  %v7633_v10 = vpop.f32.mrb[3].mxu0 }
 0x477   : > { %v4160_v49 = vadd.f32 %v7631_v22, %v10148_v52  ;;  %v7634_v3 = vadd.f32 %v7633_v10, %v7632_v31  ;;  %v7739_v44 = vpop.f32.mrb[255].mxu1 }
 0x478   : > { %v7740_v63 = vadd.f32 %v7739_v44, %v7738_v38  ;;  %v10340_v8 = vadd.f32 %v7737_v21, %v4152_v46 }
 0x479   : > { %v4163_v26 = vadd.f32 %v7634_v3, %v10153_v11 }
 0x47a   : > { %v10343_v48 = vadd.f32 %v7740_v63, %v4155_v5 }
 0x47b   : > { %v7635_v52 = vpop.f32.mrb[4].mxu0 }
 0x47c   : > { %v7741_v51 = vpop.f32.mrb[0].mxu1  ;;  %v7636_v39 = vpop.f32.mrb[5].mxu0 }
 0x47d   : > { %v7637_v16 = vadd.f32 %v7636_v39, %v7635_v52  ;;  %v7742_v57 = vpop.f32.mrb[1].mxu1  ;;  %v7638_v12 = vpop.f32.mrb[6].mxu0 }
 0x47e   : > { %v7743_v36 = vadd.f32 %v7742_v57, %v7741_v51  ;;  %v7744_v6 = vpop.f32.mrb[2].mxu1  ;;  %v7639_v29 = vpop.f32.mrb[7].mxu0 }
 0x47f   : > { %v4168_v46 = vadd.f32 %v7637_v16, %v10157_v45  ;;  %v7640_v11 = vadd.f32 %v7639_v29, %v7638_v12  ;;  %v7745_v60 = vpop.f32.mrb[3].mxu1 }
 0x480   : > { %v7746_v56 = vadd.f32 %v7745_v60, %v7744_v6  ;;  %v10349_v14 = vadd.f32 %v7743_v36, %v4160_v49  ;;  %v8700_v49 = vld [vmem:[%s10978_s7 + $0x168] sm:$0xff]  }
 0x481   : > { %v4171_v5 = vadd.f32 %v7640_v11, %v10159_v20  ;;  %8047 = vmatprep.subr.bf16.mxu1 %v8700_v49  ;;  %v8701_v36 = vld [vmem:[%s10978_s7 + $0x128] sm:$0xff]  }
 0x482   : > { %v10352_v32 = vadd.f32 %v7746_v56, %v4163_v26  ;;  %8048 = vmatpush3.bf16.msra.mxu1 %v8701_v36 }
 0x483   : > { %v7641_v53 = vpop.f32.mrb[8].mxu0 }
 0x484   : > { %v7747_v43 = vpop.f32.mrb[4].mxu1  ;;  %v7642_v19 = vpop.f32.mrb[9].mxu0 }
 0x485   : > { %v7643_v58 = vadd.f32 %v7642_v19, %v7641_v53  ;;  %v7748_v22 = vpop.f32.mrb[5].mxu1  ;;  %v7644_v24 = vpop.f32.mrb[10].mxu0 }
 0x486   : > { %v7749_v31 = vadd.f32 %v7748_v22, %v7747_v43  ;;  %v7750_v21 = vpop.f32.mrb[6].mxu1  ;;  %v7645_v38 = vpop.f32.mrb[11].mxu0 }
 0x487   : > { %v4176_v45 = vadd.f32 %v7643_v58, %v10166_v1  ;;  %v7646_v10 = vadd.f32 %v7645_v38, %v7644_v24  ;;  %v7751_v3 = vpop.f32.mrb[7].mxu1 }
 0x488   : > { %v7752_v20 = vadd.f32 %v7751_v3, %v7750_v21  ;;  %v10358_v44 = vadd.f32 %v7749_v31, %v4168_v46 }
 0x489   : > { %v4179_v9 = vadd.f32 %v7646_v10, %v10172_v50 }
 0x48a   : > { %v10361_v42 = vadd.f32 %v7752_v20, %v4171_v5 }
 0x48b   : > { %v7647_v63 = vpop.f32.mrb[12].mxu0 }
 0x48c   : > { %v7753_v26 = vpop.f32.mrb[8].mxu1  ;;  %v7648_v52 = vpop.f32.mrb[13].mxu0 }
 0x48d   : > { %v7649_v51 = vadd.f32 %v7648_v52, %v7647_v63  ;;  %v7754_v39 = vpop.f32.mrb[9].mxu1  ;;  %v7650_v1 = vpop.f32.mrb[14].mxu0 }
 0x48e   : > { %v7755_v16 = vadd.f32 %v7754_v39, %v7753_v26  ;;  %v7756_v57 = vpop.f32.mrb[10].mxu1  ;;  %v7651_v12 = vpop.f32.mrb[15].mxu0 }
 0x48f   : > { %v4184_v6 = vadd.f32 %v7649_v51, %v10176_v17  ;;  %v7652_v29 = vadd.f32 %v7651_v12, %v7650_v1  ;;  %v7757_v50 = vpop.f32.mrb[11].mxu1 }
 0x490   : > { %v7758_v18 = vadd.f32 %v7757_v50, %v7756_v57  ;;  %v10367_v46 = vadd.f32 %v7755_v16, %v4176_v45  ;;  %v8704_v45 = vld [vmem:[%s10978_s7 + $0x170] sm:$0xff]  }
 0x491   : > { %v4187_v11 = vadd.f32 %v7652_v29, %v10178_v25  ;;  %8049 = vmatprep.subr.bf16.mxu1 %v8704_v45  ;;  %v8705_v16 = vld [vmem:[%s10978_s7 + $0x130] sm:$0xff]  }
 0x492   : > { %v10370_v60 = vadd.f32 %v7758_v18, %v4179_v9  ;;  %8050 = vmatpush3.bf16.msra.mxu1 %v8705_v16 }
 0x493   : > { %v7653_v56 = vpop.f32.mrb[16].mxu0 }
 0x494   : > { %v7759_v5 = vpop.f32.mrb[12].mxu1  ;;  %v7654_v53 = vpop.f32.mrb[17].mxu0 }
 0x495   : > { %v7655_v43 = vadd.f32 %v7654_v53, %v7653_v56  ;;  %v7760_v19 = vpop.f32.mrb[13].mxu1  ;;  %v7656_v58 = vpop.f32.mrb[18].mxu0 }
 0x496   : > { %v7761_v22 = vadd.f32 %v7760_v19, %v7759_v5  ;;  %v7762_v24 = vpop.f32.mrb[14].mxu1  ;;  %v7657_v31 = vpop.f32.mrb[19].mxu0 }
 0x497   : > { %v4192_v17 = vadd.f32 %v7655_v43, %v10185_v0  ;;  %v7658_v21 = vadd.f32 %v7657_v31, %v7656_v58  ;;  %v7763_v38 = vpop.f32.mrb[15].mxu1 }
 0x498   : > { %v7764_v25 = vadd.f32 %v7763_v38, %v7762_v24  ;;  %v10376_v10 = vadd.f32 %v7761_v22, %v4184_v6 }
 0x499   : > { %v4195_v3 = vadd.f32 %v7658_v21, %v10190_v37 }
 0x49a   : > { %v10379_v49 = vadd.f32 %v7764_v25, %v4187_v11 }
 0x49b   : > { %v7659_v20 = vpop.f32.mrb[20].mxu0 }
 0x49c   : > { %v7765_v9 = vpop.f32.mrb[16].mxu1  ;;  %v7660_v63 = vpop.f32.mrb[21].mxu0 }
 0x49d   : > { %v7661_v26 = vadd.f32 %v7660_v63, %v7659_v20  ;;  %v7766_v52 = vpop.f32.mrb[17].mxu1  ;;  %v7662_v0 = vpop.f32.mrb[22].mxu0 }
 0x49e   : > { %v7767_v51 = vadd.f32 %v7766_v52, %v7765_v9  ;;  %v7768_v39 = vpop.f32.mrb[18].mxu1  ;;  %v7663_v1 = vpop.f32.mrb[23].mxu0 }
 0x49f   : > { %v4200_v57 = vadd.f32 %v7661_v26, %v10197_v28  ;;  %v7664_v12 = vadd.f32 %v7663_v1, %v7662_v0  ;;  %v7769_v37 = vpop.f32.mrb[19].mxu1 }
 0x4a0   : > { %v7770_v36 = vadd.f32 %v7769_v37, %v7768_v39  ;;  %v10385_v6 = vadd.f32 %v7767_v51, %v4192_v17  ;;  %v8708_v17 = vld [vmem:[%s10978_s7 + $0x178] sm:$0xff]  }
 0x4a1   : > { %v4203_v29 = vadd.f32 %v7664_v12, %v10205_v41  ;;  %8051 = vmatprep.subr.bf16.mxu1 %v8708_v17  ;;  %v8709_v51 = vld [vmem:[%s10978_s7 + $0x138] sm:$0xff]  }
 0x4a2   : > { %v10388_v50 = vadd.f32 %v7770_v36, %v4195_v3  ;;  %8052 = vmatpush3.bf16.msra.mxu1 %v8709_v51 }
 0x4a3   : > { %v7665_v18 = vpop.f32.mrb[24].mxu0 }
 0x4a4   : > { %v7771_v11 = vpop.f32.mrb[20].mxu1  ;;  %v7666_v56 = vpop.f32.mrb[25].mxu0 }
 0x4a5   : > { %v7667_v5 = vadd.f32 %v7666_v56, %v7665_v18  ;;  %v7772_v53 = vpop.f32.mrb[21].mxu1  ;;  %v7668_v43 = vpop.f32.mrb[26].mxu0 }
 0x4a6   : > { %v7773_v19 = vadd.f32 %v7772_v53, %v7771_v11  ;;  %v7774_v58 = vpop.f32.mrb[22].mxu1  ;;  %v7669_v22 = vpop.f32.mrb[27].mxu0 }
 0x4a7   : > { %v4208_v28 = vadd.f32 %v7667_v5, %v10218_v23  ;;  %v7670_v24 = vadd.f32 %v7669_v22, %v7668_v43  ;;  %v7775_v31 = vpop.f32.mrb[23].mxu1 }
 0x4a8   : > { %v7776_v41 = vadd.f32 %v7775_v31, %v7774_v58  ;;  %v10394_v21 = vadd.f32 %v7773_v19, %v4200_v57 }
 0x4a9   : > { %v4211_v38 = vadd.f32 %v7670_v24, %v10229_v55 }
 0x4aa   : > { %v10397_v45 = vadd.f32 %v7776_v41, %v4203_v29 }
 0x4ab   : > { %v7671_v25 = vpop.f32.mrb[28].mxu0 }
 0x4ac   : > { %v7777_v3 = vpop.f32.mrb[24].mxu1  ;;  %v7672_v20 = vpop.f32.mrb[29].mxu0 }
 0x4ad   : > { %v7673_v9 = vadd.f32 %v7672_v20, %v7671_v25  ;;  %v7778_v63 = vpop.f32.mrb[25].mxu1  ;;  %v7674_v23 = vpop.f32.mrb[30].mxu0 }
 0x4ae   : > { %v7779_v26 = vadd.f32 %v7778_v63, %v7777_v3  ;;  %v7780_v52 = vpop.f32.mrb[26].mxu1  ;;  %v7675_v0 = vpop.f32.mrb[31].mxu0 }
 0x4af   : > { %v4216_v39 = vadd.f32 %v7673_v9, %v10240_v61  ;;  %v7676_v1 = vadd.f32 %v7675_v0, %v7674_v23  ;;  %v7781_v55 = vpop.f32.mrb[27].mxu1 }
 0x4b0   : > { %v7782_v16 = vadd.f32 %v7781_v55, %v7780_v52  ;;  %v10403_v57 = vadd.f32 %v7779_v26, %v4208_v28 }
 0x4b1   : > { %v4219_v12 = vadd.f32 %v7676_v1, %v10246_v40  ;;  %v4713_v1 = vld [vmem:[#allocation4 + $0xa] sm:$0xff] }
 0x4b2   : > { %v10406_v37 = vadd.f32 %v7782_v16, %v4211_v38 }
 0x4b3   : > { %v8399_v36 = vpop.f32.mrb[32].mxu0 }
 0x4b4   : > { %v7783_v29 = vpop.f32.mrb[28].mxu1  ;;  %v4426_v18 = vadd.f32 %v8399_v36, %v10277_v59  ;;  %v4417_v11 = vpop.f32.mrb[33].mxu0 }
 0x4b5   : > { %v7784_v56 = vpop.f32.mrb[29].mxu1  ;;  %v4418_v5 = vadd.f32 %v4417_v11, %v10259_v47  ;;  %v8400_v53 = vpop.f32.mrb[34].mxu0  ;;  %v10417_v47 = vld [vmem:[%s10978_s7 + $0x200] sm:$0xff]  }
 0x4b6   : > { %v4546_v61 = vmax.f32 %v4426_v18, 0.0  ;;  %v7785_v43 = vadd.f32 %v7784_v56, %v7783_v29  ;;  %v7786_v19 = vpop.f32.mrb[30].mxu1  ;;  %v4429_v58 = vadd.f32 %v8400_v53, %v10280_v30  ;;  %v4420_v22 = vpop.f32.mrb[35].mxu0  ;;  %8429 = vmatprep.subr.bf16.mxu1 %v10417_v47 }
 0x4b7   : > { %v4544_v28 = vmax.f32 %v4418_v5, 0.0  ;;  %v7787_v24 = vpop.f32.mrb[31].mxu1  ;;  %v4421_v40 = vadd.f32 %v4420_v22, %v10265_v15 }
 0x4b8   : > { %4618 = vst [vmem:[#allocation4 + $0x31] sm:$0xff] %v4546_v61  ;;  %v4547_v31 = vmax.f32 %v4429_v58, 0.0  ;;  %v7788_v17 = vadd.f32 %v7787_v24, %v7786_v19  ;;  %v10412_v41 = vadd.f32 %v7785_v43, %v4216_v39  ;;  %v4712_v39 = vld [vmem:[#allocation4 + $0x2] sm:$0xff] }
 0x4b9   : > { %4616 = vst [vmem:[#allocation4 + $0x19] sm:$0xff] %v4544_v28  ;;  %v4545_v59 = vmax.f32 %v4421_v40, 0.0  ;;  %v4939_v36 = vpack.c.bf16 %v4713_v1, %v4712_v39 }
 0x4ba   : > { %4619 = vst [vmem:[#allocation4 + $0x39] sm:$0xff] %v4547_v31  ;;  %v4956_v38 = vpack.c.bf16 %v4547_v31, %v4546_v61  ;;  %v10419_v30 = vadd.f32 %v7788_v17, %v4219_v12  ;;  %v8698_v61 = vld [vmem:[%s10978_s7 + $0x1c8] sm:$0xff]  }
 0x4bb   : > { %4617 = vst [vmem:[#allocation4 + $0x21] sm:$0xff] %v4545_v59  ;;  %v10422_v15 = vpack.c.bf16 %v4545_v59, %v4544_v28  ;;  %v8403_v25 = vpop.f32.mrb[36].mxu0  ;;  %v8699_v31 = vld [vmem:[%s10978_s7 + $0x188] sm:$0xff]  }
 0x4bc   : > { %v4442_v3 = vadd.f32 %v8403_v25, %v10298_v13  ;;  %v4433_v20 = vpop.f32.mrb[37].mxu0 }
 0x4bd   : > { %v4434_v9 = vadd.f32 %v4433_v20, %v10286_v7  ;;  %v8404_v63 = vpop.f32.mrb[38].mxu0  ;;  %5704 = vmatprep.mubr.bf16.mxu1 %v10422_v15 }
 0x4be   : > { %v4550_v23 = vmax.f32 %v4442_v3, 0.0  ;;  %v4445_v26 = vadd.f32 %v8404_v63, %v10301_v27  ;;  %v4436_v52 = vpop.f32.mrb[39].mxu0 }
 0x4bf   : > { %v4548_v0 = vmax.f32 %v4434_v9, 0.0  ;;  %v4437_v51 = vadd.f32 %v4436_v52, %v10289_v33  ;;  %v8695_v33 = vld [vmem:[%s10978_s7 + $0x180] sm:$0xff]   ;;  %v4841_v56 = vld [vmem:[#allocation4 + $0x30] sm:$0xff] }
 0x4c0   : > { %4622 = vst [vmem:[#allocation4 + $0x61] sm:$0xff] %v4550_v23  ;;  %v4551_v55 = vmax.f32 %v4445_v26, 0.0  ;;  %v4744_v12 = vld [vmem:[#allocation4 + $0x18] sm:$0xff]  ;;  %v8703_v9 = vld [vmem:[%s10978_s7 + $0x190] sm:$0xff]  }
 0x4c1   : > { %4620 = vst [vmem:[#allocation4 + $0x49] sm:$0xff] %v4548_v0  ;;  %v4549_v16 = vmax.f32 %v4437_v51, 0.0  ;;  %v4842_v13 = vld [vmem:[#allocation4 + $0x38] sm:$0xff] }
 0x4c2   : > { %4623 = vst [vmem:[#allocation4 + $0x69] sm:$0xff] %v4551_v55  ;;  %v4745_v7 = vld [vmem:[#allocation4 + $0x20] sm:$0xff]  ;;  %v10429_v29 = vpack.c.bf16 %v4551_v55, %v4550_v23  ;;  %v10438_v43 = vpack.c.bf16 %v4842_v13, %v4841_v56 }
 0x4c3   : > { %4621 = vst [vmem:[#allocation4 + $0x51] sm:$0xff] %v4549_v16  ;;  %v8407_v18 = vpop.f32.mrb[40].mxu0  ;;  %v4940_v27 = vpack.c.bf16 %v4745_v7, %v4744_v12  ;;  %v4965_v11 = vpack.c.bf16 %v4549_v16, %v4548_v0  ;;  %v4714_v59 = vld [vmem:[#allocation4 + $0x1a] sm:$0xff] }
 0x4c4   : > { %v4458_v5 = vadd.f32 %v8407_v18, %v10316_v2  ;;  %v4449_v53 = vpop.f32.mrb[41].mxu0  ;;  %v8706_v0 = vld [vmem:[%s10978_s7 + $0x1d8] sm:$0xff]  }
 0x4c5   : > { %v4450_v19 = vadd.f32 %v4449_v53, %v10304_v62  ;;  %v8408_v58 = vpop.f32.mrb[42].mxu0  ;;  %5857 = vmatprep.mubr.bf16.mxu0 %v4940_v27  ;;  %5705 = vmatmul.mubr.bf16.gmra.mrb[36].mxu1 %v4940_v27  ;;  %v4716_v18 = vld [vmem:[#allocation4 + $0x32] sm:$0xff]  ;;  %v4717_v27 = vld [vmem:[#allocation4 + $0x3a] sm:$0xff] }
 0x4c6   : > { %v4554_v22 = vmax.f32 %v4458_v5, 0.0  ;;  %v4461_v28 = vadd.f32 %v8408_v58, %v10319_v54  ;;  %v4452_v24 = vpop.f32.mrb[43].mxu0  ;;  %5858 = vmatmul.mubr.bf16.vlgmr.msra.gmra.mrb[64].mxu0 %v4939_v36  ;;  %5712 = vmatprep.mubr.bf16.mxu1 %v4956_v38  ;;  %v8702_v54 = vld [vmem:[%s10978_s7 + $0x1d0] sm:$0xff]   ;;  %v4715_v38 = vld [vmem:[#allocation4 + $0x22] sm:$0xff] }
 0x4c7   : > { %v4552_v40 = vmax.f32 %v4450_v19, 0.0  ;;  %v4453_v2 = vadd.f32 %v4452_v24, %v10307_v4  ;;  %5865 = vmatprep.mubr.bf16.mxu0 %v10438_v43  ;;  %8150 = vmatpush3.bf16.msra.mxu0 %v8695_v33  ;;  %v10458_v26 = vpack.c.bf16 %v4715_v38, %v4714_v59  ;;  %v8711_v5 = vld [vmem:[%s10978_s7 + $0x1a0] sm:$0xff]   ;;  %v10485_v19 = vpack.c.bf16 %v4717_v27, %v4716_v18 }
 0x4c8   : > { %4626 = vst [vmem:[#allocation4 + $0x91] sm:$0xff] %v4554_v22  ;;  %v4555_v62 = vmax.f32 %v4461_v28, 0.0  ;;  %8151 = vmatprep.subr.bf16.mxu0 %v8698_v61  ;;  %v4748_v52 = vld [vmem:[#allocation4 + $0x48] sm:$0xff]  ;;  %v4750_v58 = vld [vmem:[#allocation4 + $0x60] sm:$0xff] }
 0x4c9   : > { %4624 = vst [vmem:[#allocation4 + $0x79] sm:$0xff] %v4552_v40  ;;  %v4553_v17 = vmax.f32 %v4453_v2, 0.0  ;;  %v4721_v18 = vld [vmem:[#allocation4 + $0x6a] sm:$0xff] }
 0x4ca   : > { %4627 = vst [vmem:[#allocation4 + $0x99] sm:$0xff] %v4555_v62  ;;  %v4749_v4 = vld [vmem:[#allocation4 + $0x50] sm:$0xff]  ;;  %v10450_v25 = vpack.c.bf16 %v4555_v62, %v4554_v22  ;;  %v8712_v22 = vld [vmem:[%s10978_s7 + $0x1e8] sm:$0xff]  }
 0x4cb   : > { %4625 = vst [vmem:[#allocation4 + $0x81] sm:$0xff] %v4553_v17  ;;  %v8411_v3 = vpop.f32.mrb[44].mxu0  ;;  %v10452_v20 = vpack.c.bf16 %v4553_v17, %v4552_v40  ;;  %8152 = vmatpush3.bf16.msra.mxu0 %v8699_v31  ;;  %v10465_v1 = vpack.c.bf16 %v4749_v4, %v4748_v52  ;;  %v4907_v59 = vld [vmem:[#allocation4 + $0x4a] sm:$0xff]  ;;  %v4908_v38 = vld [vmem:[#allocation4 + $0x52] sm:$0xff] }
 0x4cc   : > { %v4474_v63 = vadd.f32 %v8411_v3, %v10340_v8  ;;  %v4465_v23 = vpop.f32.mrb[45].mxu0  ;;  %8153 = vmatprep.subr.bf16.mxu0 %v8702_v54 }
 0x4cd   : > { %v4466_v51 = vadd.f32 %v4465_v23, %v10322_v35  ;;  %v8412_v39 = vpop.f32.mrb[46].mxu0  ;;  %5713 = vmatmul.mubr.bf16.gmra.mrb[40].mxu1 %v10438_v43  ;;  %v8707_v35 = vld [vmem:[%s10978_s7 + $0x198] sm:$0xff]   ;;  %v10512_v23 = vpack.c.bf16 %v4908_v38, %v4907_v59 }
 0x4ce   : > { %v4558_v55 = vmax.f32 %v4474_v63, 0.0  ;;  %v4477_v16 = vadd.f32 %v8412_v39, %v10343_v48  ;;  %v4468_v8 = vpop.f32.mrb[47].mxu0  ;;  %5866 = vmatmul.mubr.bf16.gmra.mrb[68].mxu0 %v10458_v26  ;;  %5720 = vmatprep.mubr.bf16.mxu1 %v4965_v11  ;;  %v8710_v48 = vld [vmem:[%s10978_s7 + $0x1e0] sm:$0xff]   ;;  %v8716_v63 = vld [vmem:[%s10978_s7 + $0x1b0] sm:$0xff]   ;;  %v8717_v39 = vld [vmem:[%s10978_s7 + $0x1f8] sm:$0xff]  }
 0x4cf   : > { %v4556_v13 = vmax.f32 %v4466_v51, 0.0  ;;  %v4469_v12 = vadd.f32 %v4468_v8, %v10325_v34  ;;  %5873 = vmatprep.mubr.bf16.mxu0 %v10465_v1  ;;  %8154 = vmatpush3.bf16.msra.mxu0 %v8703_v9  ;;  %v4751_v34 = vld [vmem:[#allocation4 + $0x68] sm:$0xff] }
 0x4d0   : > { %4630 = vst [vmem:[#allocation4 + $0xc1] sm:$0xff] %v4558_v55  ;;  %v4559_v7 = vmax.f32 %v4477_v16, 0.0  ;;  %8155 = vmatprep.subr.bf16.mxu0 %v8706_v0  ;;  %v10492_v40 = vpack.c.bf16 %v4751_v34, %v4750_v58  ;;  %v4752_v51 = vld [vmem:[#allocation4 + $0x78] sm:$0xff] }
 0x4d1   : > { %4628 = vst [vmem:[#allocation4 + $0xa9] sm:$0xff] %v4556_v13  ;;  %v4557_v36 = vmax.f32 %v4469_v12, 0.0  ;;  %v4755_v27 = vld [vmem:[#allocation4 + $0x98] sm:$0xff] }
 0x4d2   : > { %4631 = vst [vmem:[#allocation4 + $0xc9] sm:$0xff] %v4559_v7  ;;  %v10477_v11 = vpack.c.bf16 %v4559_v7, %v4558_v55 }
 0x4d3   : > { %4629 = vst [vmem:[#allocation4 + $0xb1] sm:$0xff] %v4557_v36  ;;  %v8415_v33 = vpop.f32.mrb[48].mxu0  ;;  %v10479_v56 = vpack.c.bf16 %v4557_v36, %v4556_v13  ;;  %8156 = vmatpush3.bf16.msra.mxu0 %v8707_v35  ;;  %v4720_v36 = vld [vmem:[#allocation4 + $0x62] sm:$0xff] }
 0x4d4   : > { %v4490_v53 = vadd.f32 %v8415_v33, %v10358_v44  ;;  %v4481_v61 = vpop.f32.mrb[49].mxu0  ;;  %8157 = vmatprep.subr.bf16.mxu0 %v8710_v48 }
 0x4d5   : > { %v4482_v28 = vadd.f32 %v4481_v61, %v10349_v14  ;;  %v8416_v24 = vpop.f32.mrb[50].mxu0  ;;  %5721 = vmatmul.mubr.bf16.gmra.mrb[44].mxu1 %v10465_v1  ;;  %v8713_v14 = vld [vmem:[%s10978_s7 + $0x1a8] sm:$0xff]   ;;  %v4754_v61 = vld [vmem:[#allocation4 + $0x90] sm:$0xff] }
 0x4d6   : > { %v4562_v2 = vmax.f32 %v4490_v53, 0.0  ;;  %v4493_v31 = vadd.f32 %v8416_v24, %v10361_v42  ;;  %v4484_v44 = vpop.f32.mrb[51].mxu0  ;;  %5874 = vmatmul.mubr.bf16.gmra.mrb[72].mxu0 %v10485_v19  ;;  %5728 = vmatprep.mubr.bf16.mxu1 %v10429_v29  ;;  %v8715_v42 = vld [vmem:[%s10978_s7 + $0x1f0] sm:$0xff]   ;;  %v10535_v53 = vpack.c.bf16 %v4721_v18, %v4720_v36 }
 0x4d7   : > { %v4560_v62 = vmax.f32 %v4482_v28, 0.0  ;;  %v4485_v54 = vadd.f32 %v4484_v44, %v10352_v32  ;;  %5881 = vmatprep.mubr.bf16.mxu0 %v10492_v40  ;;  %8158 = vmatpush3.bf16.msra.mxu0 %v8711_v5  ;;  %v4753_v32 = vld [vmem:[#allocation4 + $0x80] sm:$0xff]  ;;  %v10539_v28 = vpack.c.bf16 %v4755_v27, %v4754_v61 }
 0x4d8   : > { %4634 = vst [vmem:[#allocation4 + $0xf1] sm:$0xff] %v4562_v2  ;;  %v4563_v17 = vmax.f32 %v4493_v31, 0.0  ;;  %8159 = vmatprep.subr.bf16.mxu0 %v8712_v22  ;;  %v10520_v8 = vpack.c.bf16 %v4753_v32, %v4752_v51 }
 0x4d9   : > { %4632 = vst [vmem:[#allocation4 + $0xd9] sm:$0xff] %v4560_v62  ;;  %v4561_v29 = vmax.f32 %v4485_v54, 0.0  ;;  %v4722_v54 = vld [vmem:[#allocation4 + $0x7a] sm:$0xff]  ;;  %v4728_v18 = vld [vmem:[#allocation4 + $0xc2] sm:$0xff] }
 0x4da   : > { %4635 = vst [vmem:[#allocation4 + $0xf9] sm:$0xff] %v4563_v17  ;;  %v10505_v4 = vpack.c.bf16 %v4563_v17, %v4562_v2  ;;  %v4757_v17 = vld [vmem:[#allocation4 + $0xb0] sm:$0xff] }
 0x4db   : > { %4633 = vst [vmem:[#allocation4 + $0xe1] sm:$0xff] %v4561_v29  ;;  %v8419_v3 = vpop.f32.mrb[52].mxu0  ;;  %v10507_v9 = vpack.c.bf16 %v4561_v29, %v4560_v62  ;;  %8160 = vmatpush3.bf16.msra.mxu0 %v8713_v14  ;;  %v4723_v14 = vld [vmem:[#allocation4 + $0x82] sm:$0xff] }
 0x4dc   : > { %v4506_v52 = vadd.f32 %v8419_v3, %v10376_v10  ;;  %v4497_v0 = vpop.f32.mrb[53].mxu0  ;;  %8161 = vmatprep.subr.bf16.mxu0 %v8715_v42  ;;  %v4756_v29 = vld [vmem:[#allocation4 + $0xa8] sm:$0xff] }
 0x4dd   : > { %v4498_v55 = vadd.f32 %v4497_v0, %v10367_v46  ;;  %v8420_v16 = vpop.f32.mrb[54].mxu0  ;;  %5729 = vmatmul.mubr.bf16.gmra.mrb[48].mxu1 %v10492_v40  ;;  %v8718_v46 = vld [vmem:[%s10978_s7 + $0x1b8] sm:$0xff]  }
 0x4de   : > { %v4566_v13 = vmax.f32 %v4506_v52, 0.0  ;;  %v4509_v12 = vadd.f32 %v8420_v16, %v10379_v49  ;;  %v4500_v35 = vpop.f32.mrb[55].mxu0  ;;  %5882 = vmatmul.mubr.bf16.gmra.mrb[76].mxu0 %v10512_v23  ;;  %5736 = vmatprep.mubr.bf16.mxu1 %v10452_v20  ;;  %v4724_v16 = vld [vmem:[#allocation4 + $0x92] sm:$0xff] }
 0x4df   : > { %v4564_v10 = vmax.f32 %v4498_v55, 0.0  ;;  %v4501_v7 = vadd.f32 %v4500_v35, %v10370_v60  ;;  %5889 = vmatprep.mubr.bf16.mxu0 %v10520_v8  ;;  %8162 = vmatpush3.bf16.msra.mxu0 %v8716_v63  ;;  %v10555_v63 = vpack.c.bf16 %v4757_v17, %v4756_v29 }
 0x4e0   : > { %4638 = vst [vmem:[#allocation4 + $0x121] sm:$0xff] %v4566_v13  ;;  %v4567_v48 = vmax.f32 %v4509_v12, 0.0  ;;  %8163 = vmatprep.subr.bf16.mxu0 %v8717_v39  ;;  %v4759_v12 = vld [vmem:[#allocation4 + $0xc8] sm:$0xff] }
 0x4e1   : > { %4636 = vst [vmem:[#allocation4 + $0x109] sm:$0xff] %v4564_v10  ;;  %v4565_v49 = vmax.f32 %v4501_v7, 0.0  ;;  %v4727_v7 = vld [vmem:[#allocation4 + $0xb2] sm:$0xff] }
 0x4e2   : > { %4639 = vst [vmem:[#allocation4 + $0x129] sm:$0xff] %v4567_v48  ;;  %v10530_v20 = vpack.c.bf16 %v4567_v48, %v4566_v13  ;;  %v4725_v13 = vld [vmem:[#allocation4 + $0x9a] sm:$0xff] }
 0x4e3   : > { %4637 = vst [vmem:[#allocation4 + $0x111] sm:$0xff] %v4565_v49  ;;  %v8423_v60 = vpop.f32.mrb[56].mxu0  ;;  %v10532_v34 = vpack.c.bf16 %v4565_v49, %v4564_v10  ;;  %8164 = vmatpush3.bf16.msra.mxu0 %v8718_v46  ;;  %v10564_v35 = vpack.c.bf16 %v4725_v13, %v4724_v16  ;;  %v4758_v10 = vld [vmem:[#allocation4 + $0xc0] sm:$0xff]  ;;  %v4760_v49 = vld [vmem:[#allocation4 + $0xd8] sm:$0xff] }
 0x4e4   : > { %v4522_v33 = vadd.f32 %v8423_v60, %v10394_v21  ;;  %v4513_v5 = vpop.f32.mrb[57].mxu0  ;;  %v4761_v46 = vld [vmem:[#allocation4 + $0xe0] sm:$0xff]  ;;  %v4763_v27 = vld [vmem:[#allocation4 + $0xf8] sm:$0xff] }
 0x4e5   : > { %v4514_v58 = vadd.f32 %v4513_v5, %v10385_v6  ;;  %v8424_v22 = vpop.f32.mrb[58].mxu0  ;;  %5737 = vmatmul.mubr.bf16.gmra.mrb[52].mxu1 %v10520_v8  ;;  %v10575_v36 = vpack.c.bf16 %v4761_v46, %v4760_v49  ;;  %v4730_v61 = vld [vmem:[#allocation4 + $0xda] sm:$0xff] }
 0x4e6   : > { %v4570_v24 = vmax.f32 %v4522_v33, 0.0  ;;  %v4525_v2 = vadd.f32 %v8424_v22, %v10397_v45  ;;  %v4516_v31 = vpop.f32.mrb[59].mxu0  ;;  %5890 = vmatmul.mubr.bf16.gmra.mrb[80].mxu0 %v10535_v53  ;;  %5744 = vmatprep.mubr.bf16.mxu1 %v10450_v25  ;;  %v4762_v33 = vld [vmem:[#allocation4 + $0xf0] sm:$0xff] }
 0x4e7   : > { %v4568_v21 = vmax.f32 %v4514_v58, 0.0  ;;  %v4517_v44 = vadd.f32 %v4516_v31, %v10388_v50  ;;  %5897 = vmatprep.mubr.bf16.mxu0 %v10539_v28  ;;  %v10551_v50 = vpack.c.bf16 %v4723_v14, %v4722_v54  ;;  %v10583_v5 = vpack.c.bf16 %v4763_v27, %v4762_v33  ;;  %v4874_v33 = vld [vmem:[#allocation4 + $0x39] sm:$0xff] }
 0x4e8   : > { %4642 = vst [vmem:[#allocation4 + $0x151] sm:$0xff] %v4570_v24  ;;  %v4571_v6 = vmax.f32 %v4525_v2, 0.0 }
 0x4e9   : > { %4640 = vst [vmem:[#allocation4 + $0x139] sm:$0xff] %v4568_v21  ;;  %v4569_v62 = vmax.f32 %v4517_v44, 0.0 }
 0x4ea   : > { %4643 = vst [vmem:[#allocation4 + $0x159] sm:$0xff] %v4571_v6  ;;  %v10546_v42 = vpack.c.bf16 %v4571_v6, %v4570_v24  ;;  %v4765_v58 = vld [vmem:[#allocation4 + $0x110] sm:$0xff]  ;;  %v4764_v24 = vld [vmem:[#allocation4 + $0x108] sm:$0xff] }
 0x4eb   : > { %4641 = vst [vmem:[#allocation4 + $0x141] sm:$0xff] %v4569_v62  ;;  %v8427_v45 = vpop.f32.mrb[60].mxu0  ;;  %v10548_v59 = vpack.c.bf16 %v4569_v62, %v4568_v21  ;;  %v10591_v2 = vpack.c.bf16 %v4765_v58, %v4764_v24  ;;  %v4733_v21 = vld [vmem:[#allocation4 + $0xfa] sm:$0xff]  ;;  %v4767_v6 = vld [vmem:[#allocation4 + $0x128] sm:$0xff]  ;;  %v4735_v29 = vld [vmem:[#allocation4 + $0x112] sm:$0xff] }
 0x4ec   : > { %v4538_v25 = vadd.f32 %v8427_v45, %v10412_v41  ;;  %v4529_v38 = vpop.f32.mrb[61].mxu0  ;;  %v4766_v45 = vld [vmem:[#allocation4 + $0x120] sm:$0xff]  ;;  %v8719_v58 = vld [vmem:[%s10978_s7 + $0x208] sm:$0xff]  }
 0x4ed   : > { %v4530_v32 = vadd.f32 %v4529_v38, %v10403_v57  ;;  %v8428_v3 = vpop.f32.mrb[62].mxu0  ;;  %5745 = vmatmul.mubr.bf16.gmra.mrb[56].mxu1 %v10539_v28  ;;  %v10603_v38 = vpack.c.bf16 %v4767_v6, %v4766_v45  ;;  %v8721_v6 = vld [vmem:[%s10978_s7 + $0x218] sm:$0xff]   ;;  %v8723_v45 = vld [vmem:[%s10978_s7 + $0x228] sm:$0xff]  }
 0x4ee   : > { %v4574_v52 = vmax.f32 %v4538_v25, 0.0  ;;  %v4541_v0 = vadd.f32 %v8428_v3, %v10419_v30  ;;  %v4532_v51 = vpop.f32.mrb[63].mxu0  ;;  %5898 = vmatmul.mubr.bf16.gmra.mrb[84].mxu0 %v10551_v50  ;;  %5752 = vmatprep.mubr.bf16.mxu1 %v10479_v56  ;;  %v10567_v56 = vpack.c.bf16 %v4759_v12, %v4758_v10 }
 0x4ef   : > { %v4572_v41 = vmax.f32 %v4530_v32, 0.0  ;;  %v4533_v39 = vadd.f32 %v4532_v51, %v10406_v37  ;;  %5905 = vmatprep.mubr.bf16.mxu0 %v10555_v63  ;;  %v4726_v37 = vld [vmem:[#allocation4 + $0xaa] sm:$0xff]  ;;  %v4736_v51 = vld [vmem:[#allocation4 + $0x122] sm:$0xff] }
 0x4f0   : > { %4646 = vst [vmem:[#allocation4 + $0x181] sm:$0xff] %v4574_v52  ;;  %v4575_v57 = vmax.f32 %v4541_v0, 0.0  ;;  %v10572_v48 = vpack.c.bf16 %v4727_v7, %v4726_v37  ;;  %v4768_v52 = vld [vmem:[#allocation4 + $0x138] sm:$0xff] }
 0x4f1   : > { %4644 = vst [vmem:[#allocation4 + $0x169] sm:$0xff] %v4572_v41  ;;  %v4573_v55 = vmax.f32 %v4533_v39, 0.0  ;;  %v4740_v7 = vld [vmem:[#allocation4 + $0x152] sm:$0xff] }
 0x4f2   : > { %4647 = vst [vmem:[#allocation4 + $0x189] sm:$0xff] %v4575_v57  ;;  %v4769_v32 = vld [vmem:[#allocation4 + $0x140] sm:$0xff]  ;;  %v4770_v57 = vld [vmem:[#allocation4 + $0x150] sm:$0xff] }
 0x4f3   : > { %4645 = vst [vmem:[#allocation4 + $0x171] sm:$0xff] %v4573_v55  ;;  %v10562_v30 = vpack.c.bf16 %v4573_v55, %v4572_v41  ;;  %v10611_v0 = vpack.c.bf16 %v4769_v32, %v4768_v52  ;;  %v4771_v41 = vld [vmem:[#allocation4 + $0x158] sm:$0xff] }
 0x4f4   : > { %v10619_v55 = vpack.c.bf16 %v4771_v41, %v4770_v57  ;;  %v4738_v16 = vld [vmem:[#allocation4 + $0x13a] sm:$0xff]  ;;  %v4884_v41 = vld [vmem:[#allocation4 + $0xb1] sm:$0xff]  ;;  %v4883_v57 = vld [vmem:[#allocation4 + $0xa9] sm:$0xff] }
 0x4f5   : > { %5753 = vmatmul.mubr.bf16.gmra.mrb[60].mxu1 %v10555_v63  ;;  %v4879_v32 = vld [vmem:[#allocation4 + $0x79] sm:$0xff] }
 0x4f6   : > { %5906 = vmatmul.mubr.bf16.gmra.mrb[88].mxu0 %v10564_v35  ;;  %5760 = vmatprep.mubr.bf16.mxu1 %v10477_v11  ;;  %v4729_v11 = vld [vmem:[#allocation4 + $0xca] sm:$0xff]  ;;  %v8725_v52 = vld [vmem:[%s10978_s7 + $0x238] sm:$0xff]  }
 0x4f7   : > { %5913 = vmatprep.mubr.bf16.mxu0 %v10567_v56  ;;  %v10580_v60 = vpack.c.bf16 %v4729_v11, %v4728_v18  ;;  %v4774_v18 = vld [vmem:[#allocation4 + $0x180] sm:$0xff] }
 0x4f8   : > { %v4772_v10 = vld [vmem:[#allocation4 + $0x168] sm:$0xff] }
 0x4f9   : > { %v4775_v46 = vld [vmem:[#allocation4 + $0x188] sm:$0xff] }
 0x4fa   : > { %v4773_v13 = vld [vmem:[#allocation4 + $0x170] sm:$0xff]  ;;  %v10635_v11 = vpack.c.bf16 %v4775_v46, %v4774_v18 }
 0x4fb   : > { %v10627_v37 = vpack.c.bf16 %v4773_v13, %v4772_v10  ;;  %v4742_v27 = vld [vmem:[#allocation4 + $0x16a] sm:$0xff] }
 0x4fd   : > { %5761 = vmatmul.mubr.bf16.gmra.mrb[64].mxu1 %v10567_v56 }
 0x4fe   : > { %5914 = vmatmul.mubr.bf16.gmra.mrb[92].mxu0 %v10572_v48  ;;  %5768 = vmatprep.mubr.bf16.mxu1 %v10507_v9  ;;  %v4731_v9 = vld [vmem:[#allocation4 + $0xe2] sm:$0xff] }
 0x4ff   : > { %5921 = vmatprep.mubr.bf16.mxu0 %v10575_v36  ;;  %v10588_v22 = vpack.c.bf16 %v4731_v9, %v4730_v61  ;;  %v4873_v9 = vld [vmem:[#allocation4 + $0x31] sm:$0xff] }
 0x500   : > { %v4944_v24 = vpack.c.bf16 %v4874_v33, %v4873_v9  ;;  %v4898_v33 = vld [vmem:[#allocation4 + $0x159] sm:$0xff] }
 0x505   : > { %5769 = vmatmul.mubr.bf16.gmra.mrb[68].mxu1 %v10575_v36 }
 0x506   : > { %5922 = vmatmul.mubr.bf16.gmra.mrb[96].mxu0 %v10580_v60  ;;  %5776 = vmatprep.mubr.bf16.mxu1 %v10505_v4  ;;  %v4732_v4 = vld [vmem:[#allocation4 + $0xf2] sm:$0xff] }
 0x507   : > { %5929 = vmatprep.mubr.bf16.mxu0 %v10583_v5  ;;  %v10598_v17 = vpack.c.bf16 %v4733_v21, %v4732_v4  ;;  %v4813_v4 = vld [vmem:[#allocation4 + $0x52] sm:$0xff] }
 0x508   : > { %v4876_v21 = vld [vmem:[#allocation4 + $0x51] sm:$0xff] }
 0x50d   : > { %5777 = vmatmul.mubr.bf16.gmra.mrb[72].mxu1 %v10583_v5 }
 0x50e   : > { %5930 = vmatmul.mubr.bf16.gmra.mrb[100].mxu0 %v10588_v22  ;;  %5784 = vmatprep.mubr.bf16.mxu1 %v10532_v34  ;;  %v7829_v31 = vpop.f32.mrb[32].mxu1  ;;  %v4734_v34 = vld [vmem:[#allocation4 + $0x10a] sm:$0xff] }
 0x50f   : > { %5937 = vmatprep.mubr.bf16.mxu0 %v10591_v2  ;;  %v7830_v44 = vpop.f32.mrb[33].mxu1  ;;  %v10608_v3 = vpack.c.bf16 %v4735_v29, %v4734_v34  ;;  %v4880_v29 = vld [vmem:[#allocation4 + $0x81] sm:$0xff] }
 0x510   : > { %v10596_v62 = vadd.f32 %v7830_v44, %v7829_v31  ;;  %v7832_v54 = vpop.f32.mrb[34].mxu1  ;;  %v4812_v31 = vld [vmem:[#allocation4 + $0x4a] sm:$0xff] }
 0x511   : > { %v7833_v14 = vpop.f32.mrb[35].mxu1  ;;  %v4960_v44 = vpack.c.bf16 %v4813_v4, %v4812_v31  ;;  %v4897_v31 = vld [vmem:[#allocation4 + $0x151] sm:$0xff] }
 0x512   : > { %v10600_v25 = vadd.f32 %v7833_v14, %v7832_v54  ;;  %v4878_v54 = vld [vmem:[#allocation4 + $0x69] sm:$0xff]  ;;  %v4877_v14 = vld [vmem:[#allocation4 + $0x61] sm:$0xff] }
 0x513   : > { %v4962_v34 = vpack.c.bf16 %v4878_v54, %v4877_v14 }
 0x515   : > { %5785 = vmatmul.mubr.bf16.gmra.mrb[76].mxu1 %v10591_v2 }
 0x516   : > { %5938 = vmatmul.mubr.bf16.gmra.mrb[104].mxu0 %v10598_v17  ;;  %5792 = vmatprep.mubr.bf16.mxu1 %v10530_v20  ;;  %v4737_v20 = vld [vmem:[#allocation4 + $0x12a] sm:$0xff] }
 0x517   : > { %5945 = vmatprep.mubr.bf16.mxu0 %v10603_v38  ;;  %v10616_v39 = vpack.c.bf16 %v4737_v20, %v4736_v51  ;;  %v4971_v51 = vpack.c.bf16 %v4880_v29, %v4879_v32 }
 0x51d   : > { %5793 = vmatmul.mubr.bf16.gmra.mrb[80].mxu1 %v10603_v38 }
 0x51e   : > { %5946 = vmatmul.mubr.bf16.gmra.mrb[108].mxu0 %v10608_v3  ;;  %5800 = vmatprep.mubr.bf16.mxu1 %v10548_v59  ;;  %v4739_v59 = vld [vmem:[#allocation4 + $0x142] sm:$0xff] }
 0x51f   : > { %5953 = vmatprep.mubr.bf16.mxu0 %v10611_v0  ;;  %v10624_v12 = vpack.c.bf16 %v4739_v59, %v4738_v16  ;;  %v4989_v16 = vpack.c.bf16 %v4884_v41, %v4883_v57 }
 0x525   : > { %5801 = vmatmul.mubr.bf16.gmra.mrb[84].mxu1 %v10611_v0 }
 0x526   : > { %5954 = vmatmul.mubr.bf16.gmra.mrb[112].mxu0 %v10616_v39  ;;  %5808 = vmatprep.mubr.bf16.mxu1 %v10546_v42  ;;  %v4741_v42 = vld [vmem:[#allocation4 + $0x15a] sm:$0xff] }
 0x527   : > { %5961 = vmatprep.mubr.bf16.mxu0 %v10619_v55  ;;  %v10632_v49 = vpack.c.bf16 %v4741_v42, %v4740_v7 }
 0x52d   : > { %5809 = vmatmul.mubr.bf16.gmra.mrb[88].mxu1 %v10619_v55 }
 0x52e   : > { %5962 = vmatmul.mubr.bf16.gmra.mrb[116].mxu0 %v10624_v12  ;;  %5816 = vmatprep.mubr.bf16.mxu1 %v10562_v30  ;;  %v4743_v30 = vld [vmem:[#allocation4 + $0x172] sm:$0xff] }
 0x52f   : > { %5969 = vmatprep.mubr.bf16.mxu0 %v10627_v37  ;;  %v10640_v61 = vpack.c.bf16 %v4743_v30, %v4742_v27 }
 0x535   : > { %5817 = vmatmul.mubr.bf16.gmra.mrb[92].mxu1 %v10627_v37 }
 0x536   : > { %5970 = vmatmul.mubr.bf16.gmra.mrb[120].mxu0 %v10632_v49  ;;  %6018 = vmatprep.mubr.bf16.mxu1 %v10458_v26  ;;  %v8720_v26 = vld [vmem:[%s10978_s7 + $0x210] sm:$0xff]  }
 0x537   : > { %5977 = vmatprep.mubr.bf16.mxu0 %v10635_v11 }
 0x53d   : > { %6019 = vmatmul.mubr.bf16.vlgmr.msra.gmra.mrb[96].mxu1 %v10422_v15  ;;  %v4875_v15 = vld [vmem:[#allocation4 + $0x49] sm:$0xff] }
 0x53e   : > { %5978 = vmatmul.mubr.bf16.gmra.mrb[124].mxu0 %v10640_v61  ;;  %8430 = vmatpush3.bf16.msra.mxu1 %v10417_v47  ;;  %v4953_v47 = vpack.c.bf16 %v4876_v21, %v4875_v15  ;;  %v5052_v15 = vpack.c.bf16 %v4898_v33, %v4897_v31  ;;  %v4906_v33 = vld [vmem:[#allocation4 + $0x3a] sm:$0xff] }
 0x53f   : > { %6026 = vmatprep.mubr.bf16.mxu1 %v10485_v19  ;;  %6179 = vmatprep.mubr.bf16.mxu0 %v4944_v24  ;;  %v8722_v19 = vld [vmem:[%s10978_s7 + $0x220] sm:$0xff]  }
 0x540   : > { %8431 = vmatprep.subr.bf16.mxu1 %v8719_v58 }
 0x542   : > { %8432 = vmatpush3.bf16.msra.mxu1 %v8719_v58 }
 0x543   : > { %8433 = vmatprep.subr.bf16.mxu1 %v8720_v26 }
 0x545   : > { %6027 = vmatmul.mubr.bf16.gmra.mrb[100].mxu1 %v4944_v24 }
 0x546   : > { %6180 = vmatmul.mubr.bf16.vlgmr.msra.gmra.mrb[128].mxu0 %v10438_v43  ;;  %6034 = vmatprep.mubr.bf16.mxu1 %v4960_v44  ;;  %v8724_v43 = vld [vmem:[%s10978_s7 + $0x230] sm:$0xff]  }
 0x547   : > { %6187 = vmatprep.mubr.bf16.mxu0 %v4953_v47  ;;  %8434 = vmatpush3.bf16.msra.mxu1 %v8720_v26 }
 0x548   : > { %8435 = vmatprep.subr.bf16.mxu1 %v8721_v6 }
 0x54b   : > { %8436 = vmatpush3.bf16.msra.mxu1 %v8721_v6 }
 0x54c   : > { %8437 = vmatprep.subr.bf16.mxu1 %v8722_v19 }
 0x54d   : > { %6035 = vmatmul.mubr.bf16.gmra.mrb[104].mxu1 %v4953_v47 }
 0x54e   : > { %6188 = vmatmul.mubr.bf16.gmra.mrb[132].mxu0 %v10465_v1  ;;  %6042 = vmatprep.mubr.bf16.mxu1 %v10535_v53  ;;  %v4882_v1 = vld [vmem:[#allocation4 + $0x99] sm:$0xff]  ;;  %v4881_v53 = vld [vmem:[#allocation4 + $0x91] sm:$0xff] }
 0x54f   : > { %6195 = vmatprep.mubr.bf16.mxu0 %v4962_v34  ;;  %8438 = vmatpush3.bf16.msra.mxu1 %v8722_v19  ;;  %v4980_v20 = vpack.c.bf16 %v4882_v1, %v4881_v53 }
 0x550   : > { %8439 = vmatprep.subr.bf16.mxu1 %v8723_v45 }
 0x553   : > { %8440 = vmatpush3.bf16.msra.mxu1 %v8723_v45 }
 0x554   : > { %8441 = vmatprep.subr.bf16.mxu1 %v8724_v43 }
 0x555   : > { %6043 = vmatmul.mubr.bf16.gmra.mrb[108].mxu1 %v4962_v34  ;;  %v4900_v34 = vld [vmem:[#allocation4 + $0x171] sm:$0xff] }
 0x556   : > { %6196 = vmatmul.mubr.bf16.gmra.mrb[136].mxu0 %v10492_v40  ;;  %6050 = vmatprep.mubr.bf16.mxu1 %v10551_v50  ;;  %v4886_v40 = vld [vmem:[#allocation4 + $0xc9] sm:$0xff]  ;;  %v4885_v50 = vld [vmem:[#allocation4 + $0xc1] sm:$0xff] }
 0x557   : > { %6203 = vmatprep.mubr.bf16.mxu0 %v4971_v51  ;;  %8442 = vmatpush3.bf16.msra.mxu1 %v8724_v43  ;;  %v4998_v59 = vpack.c.bf16 %v4886_v40, %v4885_v50  ;;  %v4838_v50 = vld [vmem:[#allocation4 + $0x182] sm:$0xff] }
 0x558   : > { %8443 = vmatprep.subr.bf16.mxu1 %v8725_v52 }
 0x55b   : > { %8444 = vmatpush3.bf16.msra.mxu1 %v8725_v52 }
 0x55d   : > { %6051 = vmatmul.mubr.bf16.gmra.mrb[112].mxu1 %v4971_v51 }
 0x55e   : > { %6204 = vmatmul.mubr.bf16.gmra.mrb[140].mxu0 %v10520_v8  ;;  %6058 = vmatprep.mubr.bf16.mxu1 %v10564_v35  ;;  %v4888_v8 = vld [vmem:[#allocation4 + $0xe1] sm:$0xff]  ;;  %v4887_v35 = vld [vmem:[#allocation4 + $0xd9] sm:$0xff] }
 0x55f   : > { %6211 = vmatprep.mubr.bf16.mxu0 %v4980_v20  ;;  %v5007_v13 = vpack.c.bf16 %v4888_v8, %v4887_v35 }
 0x565   : > { %6059 = vmatmul.mubr.bf16.gmra.mrb[116].mxu1 %v4980_v20 }
 0x566   : > { %6212 = vmatmul.mubr.bf16.gmra.mrb[144].mxu0 %v10539_v28  ;;  %6066 = vmatprep.mubr.bf16.mxu1 %v10572_v48  ;;  %v4890_v28 = vld [vmem:[#allocation4 + $0xf9] sm:$0xff]  ;;  %v4889_v48 = vld [vmem:[#allocation4 + $0xf1] sm:$0xff] }
 0x567   : > { %6219 = vmatprep.mubr.bf16.mxu0 %v4989_v16  ;;  %v5016_v10 = vpack.c.bf16 %v4890_v28, %v4889_v48  ;;  %v4902_v28 = vld [vmem:[#allocation4 + $0x189] sm:$0xff] }
 0x56d   : > { %6067 = vmatmul.mubr.bf16.gmra.mrb[120].mxu1 %v4989_v16 }
 0x56e   : > { %6220 = vmatmul.mubr.bf16.gmra.mrb[148].mxu0 %v10555_v63  ;;  %6074 = vmatprep.mubr.bf16.mxu1 %v10580_v60  ;;  %v4892_v63 = vld [vmem:[#allocation4 + $0x111] sm:$0xff]  ;;  %v4891_v60 = vld [vmem:[#allocation4 + $0x109] sm:$0xff] }
 0x56f   : > { %6227 = vmatprep.mubr.bf16.mxu0 %v4998_v59  ;;  %v5025_v7 = vpack.c.bf16 %v4892_v63, %v4891_v60 }
 0x575   : > { %6075 = vmatmul.mubr.bf16.gmra.mrb[124].mxu1 %v4998_v59  ;;  %v4839_v59 = vld [vmem:[#allocation4 + $0x18a] sm:$0xff] }
 0x576   : > { %6228 = vmatmul.mubr.bf16.gmra.mrb[152].mxu0 %v10567_v56  ;;  %6082 = vmatprep.mubr.bf16.mxu1 %v10588_v22  ;;  %v4894_v56 = vld [vmem:[#allocation4 + $0x129] sm:$0xff]  ;;  %v4893_v22 = vld [vmem:[#allocation4 + $0x121] sm:$0xff] }
 0x577   : > { %6235 = vmatprep.mubr.bf16.mxu0 %v5007_v13  ;;  %v5034_v42 = vpack.c.bf16 %v4894_v56, %v4893_v22  ;;  %v4901_v56 = vld [vmem:[#allocation4 + $0x181] sm:$0xff] }
 0x57d   : > { %6083 = vmatmul.mubr.bf16.gmra.mrb[128].mxu1 %v5007_v13 }
 0x57e   : > { %6236 = vmatmul.mubr.bf16.gmra.mrb[156].mxu0 %v10575_v36  ;;  %6090 = vmatprep.mubr.bf16.mxu1 %v10598_v17  ;;  %v4896_v36 = vld [vmem:[#allocation4 + $0x141] sm:$0xff]  ;;  %v4895_v17 = vld [vmem:[#allocation4 + $0x139] sm:$0xff] }
 0x57f   : > { %6243 = vmatprep.mubr.bf16.mxu0 %v5016_v10  ;;  %v5043_v46 = vpack.c.bf16 %v4896_v36, %v4895_v17  ;;  %v5070_v17 = vpack.c.bf16 %v4902_v28, %v4901_v56  ;;  %v4911_v28 = vld [vmem:[#allocation4 + $0x7a] sm:$0xff] }
 0x585   : > { %6091 = vmatmul.mubr.bf16.gmra.mrb[132].mxu1 %v5016_v10 }
 0x586   : > { %6244 = vmatmul.mubr.bf16.gmra.mrb[160].mxu0 %v10583_v5  ;;  %6098 = vmatprep.mubr.bf16.mxu1 %v10608_v3  ;;  %v10691_v5 = vld [vmem:[%s10979_s8] ss:$0 sm:$0xff] }
 0x587   : > { %6251 = vmatprep.mubr.bf16.mxu0 %v5025_v7  ;;  %v5699_v9 = vadd.f32 %v10596_v62, %v10691_v5  ;;  %v5702_v4 = vadd.f32 %v10600_v25, %v10691_v5 }
 0x58d   : > { %6099 = vmatmul.mubr.bf16.gmra.mrb[136].mxu1 %v5025_v7 }
 0x58e   : > { %6252 = vmatmul.mubr.bf16.gmra.mrb[164].mxu0 %v10591_v2  ;;  %6106 = vmatprep.mubr.bf16.mxu1 %v10616_v39 }
 0x58f   : > { %6259 = vmatprep.mubr.bf16.mxu0 %v5034_v42 }
 0x595   : > { %6107 = vmatmul.mubr.bf16.gmra.mrb[140].mxu1 %v5034_v42 }
 0x596   : > { %6260 = vmatmul.mubr.bf16.gmra.mrb[168].mxu0 %v10603_v38  ;;  %6114 = vmatprep.mubr.bf16.mxu1 %v10624_v12 }
 0x597   : > { %6267 = vmatprep.mubr.bf16.mxu0 %v5043_v46 }
 0x598   : > { %v7835_v3 = vpop.f32.mrb[36].mxu1 }
 0x599   : > { %v7941_v18 = vpop.f32.mrb[64].mxu0  ;;  %v7836_v2 = vpop.f32.mrb[37].mxu1 }
 0x59a   : > { %v7837_v27 = vadd.f32 %v7836_v2, %v7835_v3  ;;  %v7942_v39 = vpop.f32.mrb[65].mxu0  ;;  %v7838_v30 = vpop.f32.mrb[38].mxu1  ;;  %v4904_v2 = vld [vmem:[#allocation4 + $0x1a1] sm:$0xff] }
 0x59b   : > { %v7943_v58 = vadd.f32 %v7942_v39, %v7941_v18  ;;  %v7944_v38 = vpop.f32.mrb[66].mxu0  ;;  %v7839_v24 = vpop.f32.mrb[39].mxu1  ;;  %v4903_v18 = vld [vmem:[#allocation4 + $0x199] sm:$0xff] }
 0x59c   : > { %v7840_v12 = vadd.f32 %v7839_v24, %v7838_v30  ;;  %v7945_v26 = vpop.f32.mrb[67].mxu0  ;;  %v5707_v25 = vadd.f32 %v7837_v27, %v10691_v5  ;;  %v4905_v30 = vld [vmem:[#allocation4 + $0x32] sm:$0xff]  ;;  %v5079_v31 = vpack.c.bf16 %v4904_v2, %v4903_v18 }
 0x59d   : > { %v10697_v21 = vadd.f32 %v7943_v58, %v5699_v9  ;;  %v7946_v44 = vadd.f32 %v7945_v26, %v7944_v38  ;;  %6115 = vmatmul.mubr.bf16.gmra.mrb[144].mxu1 %v5043_v46 }
 0x59e   : > { %6268 = vmatmul.mubr.bf16.gmra.mrb[172].mxu0 %v10611_v0  ;;  %6122 = vmatprep.mubr.bf16.mxu1 %v10632_v49  ;;  %v4899_v0 = vld [vmem:[#allocation4 + $0x169] sm:$0xff]  ;;  %v5710_v49 = vadd.f32 %v7840_v12, %v10691_v5 }
 0x59f   : > { %v10701_v6 = vadd.f32 %v7946_v44, %v5702_v4  ;;  %6275 = vmatprep.mubr.bf16.mxu0 %v5052_v15  ;;  %v5061_v20 = vpack.c.bf16 %v4900_v34, %v4899_v0 }
 0x5a0   : > { %v7841_v62 = vpop.f32.mrb[40].mxu1 }
 0x5a1   : > { %v7947_v47 = vpop.f32.mrb[68].mxu0  ;;  %v7842_v19 = vpop.f32.mrb[41].mxu1 }
 0x5a2   : > { %v7843_v54 = vadd.f32 %v7842_v19, %v7841_v62  ;;  %v7948_v14 = vpop.f32.mrb[69].mxu0  ;;  %v7844_v45 = vpop.f32.mrb[42].mxu1 }
 0x5a3   : > { %v7949_v43 = vadd.f32 %v7948_v14, %v7947_v47  ;;  %v7950_v29 = vpop.f32.mrb[70].mxu0  ;;  %v7845_v32 = vpop.f32.mrb[43].mxu1 }
 0x5a4   : > { %v7846_v52 = vadd.f32 %v7845_v32, %v7844_v45  ;;  %v7951_v51 = vpop.f32.mrb[71].mxu0  ;;  %v5715_v48 = vadd.f32 %v7843_v54, %v10691_v5 }
 0x5a5   : > { %v10705_v1 = vadd.f32 %v7949_v43, %v5707_v25  ;;  %v7952_v53 = vadd.f32 %v7951_v51, %v7950_v29  ;;  %6123 = vmatmul.mubr.bf16.gmra.mrb[148].mxu1 %v5052_v15  ;;  %v4945_v15 = vpack.c.bf16 %v4906_v33, %v4905_v30  ;;  %v4909_v25 = vld [vmem:[#allocation4 + $0x62] sm:$0xff]  ;;  %v4910_v43 = vld [vmem:[#allocation4 + $0x6a] sm:$0xff] }
 0x5a6   : > { %6276 = vmatmul.mubr.bf16.gmra.mrb[176].mxu0 %v10619_v55  ;;  %6130 = vmatprep.mubr.bf16.mxu1 %v10640_v61  ;;  %v10712_v61 = vpack.c.bf16 %v4839_v59, %v4838_v50  ;;  %v5718_v22 = vadd.f32 %v7846_v52, %v10691_v5  ;;  %v8728_v51 = vld [vmem:[#allocation2] sm:$0xff] }
 0x5a7   : > { %v10709_v41 = vadd.f32 %v7952_v53, %v5710_v49  ;;  %6283 = vmatprep.mubr.bf16.mxu0 %v5061_v20  ;;  %v5078_v0 = vpack.c.bf16 %v8728_v51, %v8728_v51 }
 0x5a8   : > { %v7847_v57 = vpop.f32.mrb[44].mxu1 }
 0x5a9   : > { %v7953_v16 = vpop.f32.mrb[72].mxu0  ;;  %v7848_v40 = vpop.f32.mrb[45].mxu1 }
 0x5aa   : > { %v7849_v8 = vadd.f32 %v7848_v40, %v7847_v57  ;;  %v7954_v35 = vpop.f32.mrb[73].mxu0  ;;  %v7850_v13 = vpop.f32.mrb[46].mxu1  ;;  %v4963_v40 = vpack.c.bf16 %v4910_v43, %v4909_v25 }
 0x5ab   : > { %v7955_v10 = vadd.f32 %v7954_v35, %v7953_v16  ;;  %v7956_v63 = vpop.f32.mrb[74].mxu0  ;;  %v7851_v60 = vpop.f32.mrb[47].mxu1 }
 0x5ac   : > { %v7852_v55 = vadd.f32 %v7851_v60, %v7850_v13  ;;  %v7957_v7 = vpop.f32.mrb[75].mxu0  ;;  %v5723_v24 = vadd.f32 %v7849_v8, %v10691_v5  ;;  %v4913_v60 = vld [vmem:[#allocation4 + $0x92] sm:$0xff] }
 0x5ad   : > { %v10715_v42 = vadd.f32 %v7955_v10, %v5715_v48  ;;  %v7958_v36 = vadd.f32 %v7957_v7, %v7956_v63  ;;  %6131 = vmatmul.mubr.bf16.gmra.mrb[152].mxu1 %v5061_v20  ;;  %v4912_v48 = vld [vmem:[#allocation4 + $0x82] sm:$0xff] }
 0x5ae   : > { %6284 = vmatmul.mubr.bf16.gmra.mrb[180].mxu0 %v10627_v37  ;;  %6138 = vmatprep.mubr.bf16.mxu1 %v10712_v61  ;;  %v5726_v62 = vadd.f32 %v7852_v55, %v10691_v5  ;;  %v4914_v55 = vld [vmem:[#allocation4 + $0x9a] sm:$0xff] }
 0x5af   : > { %v10719_v46 = vadd.f32 %v7958_v36, %v5718_v22  ;;  %6291 = vmatprep.mubr.bf16.mxu0 %v5070_v17 }
 0x5b0   : > { %v7853_v3 = vpop.f32.mrb[48].mxu1 }
 0x5b1   : > { %v7959_v27 = vpop.f32.mrb[76].mxu0  ;;  %v7854_v39 = vpop.f32.mrb[49].mxu1 }
 0x5b2   : > { %v7855_v9 = vadd.f32 %v7854_v39, %v7853_v3  ;;  %v7960_v58 = vpop.f32.mrb[77].mxu0  ;;  %v7856_v38 = vpop.f32.mrb[50].mxu1  ;;  %v4981_v39 = vpack.c.bf16 %v4914_v55, %v4913_v60 }
 0x5b3   : > { %v7961_v12 = vadd.f32 %v7960_v58, %v7959_v27  ;;  %v7962_v26 = vpop.f32.mrb[78].mxu0  ;;  %v7857_v37 = vpop.f32.mrb[51].mxu1 }
 0x5b4   : > { %v7858_v4 = vadd.f32 %v7857_v37, %v7856_v38  ;;  %v7963_v44 = vpop.f32.mrb[79].mxu0  ;;  %v5731_v49 = vadd.f32 %v7855_v9, %v10691_v5 }
 0x5b5   : > { %v10723_v47 = vadd.f32 %v7961_v12, %v5723_v24  ;;  %v7964_v19 = vadd.f32 %v7963_v44, %v7962_v26  ;;  %6139 = vmatmul.mubr.bf16.gmra.mrb[156].mxu1 %v5070_v17  ;;  %v4915_v24 = vld [vmem:[#allocation4 + $0xaa] sm:$0xff]  ;;  %v4916_v12 = vld [vmem:[#allocation4 + $0xb2] sm:$0xff] }
 0x5b6   : > { %6292 = vmatmul.mubr.bf16.gmra.mrb[184].mxu0 %v10635_v11  ;;  %8445 = vmatprep.mubr.bf16.mxu1 %v4945_v15  ;;  %v5734_v50 = vadd.f32 %v7858_v4, %v10691_v5  ;;  %v4918_v4 = vld [vmem:[#allocation4 + $0xca] sm:$0xff]  ;;  %v4990_v25 = vpack.c.bf16 %v4916_v12, %v4915_v24 }
 0x5b7   : > { %v10726_v54 = vadd.f32 %v7964_v19, %v5726_v62  ;;  %6299 = vmatprep.mubr.bf16.mxu0 %v5079_v31  ;;  %v4917_v31 = vld [vmem:[#allocation4 + $0xc2] sm:$0xff] }
 0x5b8   : > { %v7859_v14 = vpop.f32.mrb[52].mxu1 }
 0x5b9   : > { %v7965_v45 = vpop.f32.mrb[80].mxu0  ;;  %v7860_v34 = vpop.f32.mrb[53].mxu1 }
 0x5ba   : > { %v7861_v29 = vadd.f32 %v7860_v34, %v7859_v14  ;;  %v7966_v32 = vpop.f32.mrb[81].mxu0  ;;  %v7862_v52 = vpop.f32.mrb[54].mxu1 }
 0x5bb   : > { %v7967_v53 = vadd.f32 %v7966_v32, %v7965_v45  ;;  %v7968_v20 = vpop.f32.mrb[82].mxu0  ;;  %v7863_v57 = vpop.f32.mrb[55].mxu1  ;;  %v4999_v32 = vpack.c.bf16 %v4918_v4, %v4917_v31 }
 0x5bc   : > { %v7864_v11 = vadd.f32 %v7863_v57, %v7862_v52  ;;  %v7969_v16 = vpop.f32.mrb[83].mxu0  ;;  %v5739_v36 = vadd.f32 %v7861_v29, %v10691_v5  ;;  %v4920_v57 = vld [vmem:[#allocation4 + $0xe2] sm:$0xff] }
 0x5bd   : > { %v10730_v59 = vadd.f32 %v7967_v53, %v5731_v49  ;;  %v7970_v8 = vadd.f32 %v7969_v16, %v7968_v20  ;;  %8446 = vmatmul.mubr.bf16.vlgmr.msra.gmra.mrb[160].mxu1 %v10512_v23  ;;  %v4972_v23 = vpack.c.bf16 %v4912_v48, %v4911_v28  ;;  %v4919_v20 = vld [vmem:[#allocation4 + $0xda] sm:$0xff] }
 0x5be   : > { %6300 = vmatmul.mubr.bf16.gmra.mrb[188].mxu0 %v5078_v0  ;;  %8449 = vmatprep.mubr.bf16.mxu1 %v4963_v40  ;;  %v5742_v30 = vadd.f32 %v7864_v11, %v10691_v5  ;;  %v4921_v40 = vld [vmem:[#allocation4 + $0xf2] sm:$0xff]  ;;  %v5008_v55 = vpack.c.bf16 %v4920_v57, %v4919_v20  ;;  %v4930_v57 = vld [vmem:[#allocation4 + $0x15a] sm:$0xff] }
 0x5bf   : > { %v10733_v35 = vadd.f32 %v7970_v8, %v5734_v50  ;;  %v4922_v50 = vld [vmem:[#allocation4 + $0xfa] sm:$0xff]  ;;  %v4929_v20 = vld [vmem:[#allocation4 + $0x152] sm:$0xff] }
 0x5c0   : > { %v7865_v13 = vpop.f32.mrb[56].mxu1 }
 0x5c1   : > { %v7971_v10 = vpop.f32.mrb[84].mxu0  ;;  %v7866_v63 = vpop.f32.mrb[57].mxu1 }
 0x5c2   : > { %v7867_v7 = vadd.f32 %v7866_v63, %v7865_v13  ;;  %v7972_v56 = vpop.f32.mrb[85].mxu0  ;;  %v7868_v22 = vpop.f32.mrb[58].mxu1 }
 0x5c3   : > { %v7973_v17 = vadd.f32 %v7972_v56, %v7971_v10  ;;  %v7974_v3 = vpop.f32.mrb[86].mxu0  ;;  %v7869_v18 = vpop.f32.mrb[59].mxu1 }
 0x5c4   : > { %v7870_v2 = vadd.f32 %v7869_v18, %v7868_v22  ;;  %v7975_v27 = vpop.f32.mrb[87].mxu0  ;;  %v5747_v19 = vadd.f32 %v7867_v7, %v10691_v5  ;;  %v5017_v22 = vpack.c.bf16 %v4922_v50, %v4921_v40 }
 0x5c5   : > { %v10737_v33 = vadd.f32 %v7973_v17, %v5739_v36  ;;  %v7976_v9 = vadd.f32 %v7975_v27, %v7974_v3  ;;  %8450 = vmatmul.mubr.bf16.gmra.mrb[164].mxu1 %v4972_v23  ;;  %v4924_v27 = vld [vmem:[#allocation4 + $0x112] sm:$0xff] }
 0x5c6   : > { %8453 = vmatprep.mubr.bf16.mxu1 %v4981_v39  ;;  %v5750_v52 = vadd.f32 %v7870_v2, %v10691_v5  ;;  %v4923_v2 = vld [vmem:[#allocation4 + $0x10a] sm:$0xff] }
 0x5c7   : > { %v10739_v58 = vadd.f32 %v7976_v9, %v5742_v30  ;;  %v4925_v9 = vld [vmem:[#allocation4 + $0x122] sm:$0xff] }
 0x5c8   : > { %v7871_v38 = vpop.f32.mrb[60].mxu1 }
 0x5c9   : > { %v7977_v26 = vpop.f32.mrb[88].mxu0  ;;  %v7872_v37 = vpop.f32.mrb[61].mxu1 }
 0x5ca   : > { %v7873_v44 = vadd.f32 %v7872_v37, %v7871_v38  ;;  %v7978_v15 = vpop.f32.mrb[89].mxu0  ;;  %v7874_v62 = vpop.f32.mrb[62].mxu1  ;;  %v4926_v38 = vld [vmem:[#allocation4 + $0x12a] sm:$0xff] }
 0x5cb   : > { %v7979_v14 = vadd.f32 %v7978_v15, %v7977_v26  ;;  %v7980_v45 = vpop.f32.mrb[90].mxu0  ;;  %v7875_v34 = vpop.f32.mrb[63].mxu1  ;;  %v5026_v15 = vpack.c.bf16 %v4924_v27, %v4923_v2 }
 0x5cc   : > { %v7876_v43 = vadd.f32 %v7875_v34, %v7874_v62  ;;  %v7981_v29 = vpop.f32.mrb[91].mxu0  ;;  %v5755_v48 = vadd.f32 %v7873_v44, %v10691_v5 }
 0x5cd   : > { %v10743_v51 = vadd.f32 %v7979_v14, %v5747_v19  ;;  %v7982_v0 = vadd.f32 %v7981_v29, %v7980_v45  ;;  %8454 = vmatmul.mubr.bf16.gmra.mrb[168].mxu1 %v4990_v25  ;;  %v5035_v14 = vpack.c.bf16 %v4926_v38, %v4925_v9 }
 0x5ce   : > { %8457 = vmatprep.mubr.bf16.mxu1 %v4999_v32  ;;  %v5758_v36 = vadd.f32 %v7876_v43, %v10691_v5  ;;  %v4927_v32 = vld [vmem:[#allocation4 + $0x13a] sm:$0xff] }
 0x5cf   : > { %v10745_v49 = vadd.f32 %v7982_v0, %v5750_v52  ;;  %v4928_v52 = vld [vmem:[#allocation4 + $0x142] sm:$0xff] }
 0x5d0   : > { %v7877_v53 = vpop.f32.mrb[64].mxu1 }
 0x5d1   : > { %v7983_v11 = vpop.f32.mrb[92].mxu0  ;;  %v7878_v16 = vpop.f32.mrb[65].mxu1 }
 0x5d2   : > { %v7879_v8 = vadd.f32 %v7878_v16, %v7877_v53  ;;  %v7984_v13 = vpop.f32.mrb[93].mxu0  ;;  %v7880_v28 = vpop.f32.mrb[66].mxu1 }
 0x5d3   : > { %v7985_v10 = vadd.f32 %v7984_v13, %v7983_v11  ;;  %v7986_v63 = vpop.f32.mrb[94].mxu0  ;;  %v7881_v60 = vpop.f32.mrb[67].mxu1 }
 0x5d4   : > { %v7882_v7 = vadd.f32 %v7881_v60, %v7880_v28  ;;  %v7987_v56 = vpop.f32.mrb[95].mxu0  ;;  %v5763_v37 = vadd.f32 %v7879_v8, %v10691_v5  ;;  %v5053_v60 = vpack.c.bf16 %v4930_v57, %v4929_v20 }
 0x5d5   : > { %v10749_v17 = vadd.f32 %v7985_v10, %v5755_v48  ;;  %v7988_v3 = vadd.f32 %v7987_v56, %v7986_v63  ;;  %8458 = vmatmul.mubr.bf16.gmra.mrb[172].mxu1 %v5008_v55  ;;  %v5044_v48 = vpack.c.bf16 %v4928_v52, %v4927_v32 }
 0x5d6   : > { %8461 = vmatprep.mubr.bf16.mxu1 %v5017_v22  ;;  %v5766_v45 = vadd.f32 %v7882_v7, %v10691_v5 }
 0x5d7   : > { %v10751_v18 = vadd.f32 %v7988_v3, %v5758_v36  ;;  %v4931_v3 = vld [vmem:[#allocation4 + $0x16a] sm:$0xff] }
 0x5d8   : > { %v7883_v23 = vpop.f32.mrb[68].mxu1 }
 0x5d9   : > { %v7989_v39 = vpop.f32.mrb[96].mxu0  ;;  %v7884_v30 = vpop.f32.mrb[69].mxu1 }
 0x5da   : > { %v7885_v24 = vadd.f32 %v7884_v30, %v7883_v23  ;;  %v7990_v12 = vpop.f32.mrb[97].mxu0  ;;  %v7886_v26 = vpop.f32.mrb[70].mxu1  ;;  %v4932_v23 = vld [vmem:[#allocation4 + $0x172] sm:$0xff] }
 0x5db   : > { %v7991_v31 = vadd.f32 %v7990_v12, %v7989_v39  ;;  %v7992_v4 = vpop.f32.mrb[98].mxu0  ;;  %v7887_v44 = vpop.f32.mrb[71].mxu1 }
 0x5dc   : > { %v7888_v62 = vadd.f32 %v7887_v44, %v7886_v26  ;;  %v7993_v19 = vpop.f32.mrb[99].mxu0  ;;  %v5771_v50 = vadd.f32 %v7885_v24, %v10691_v5 }
 0x5dd   : > { %v10755_v34 = vadd.f32 %v7991_v31, %v5763_v37  ;;  %v7994_v25 = vadd.f32 %v7993_v19, %v7992_v4  ;;  %8462 = vmatmul.mubr.bf16.gmra.mrb[176].mxu1 %v5026_v15  ;;  %v5062_v37 = vpack.c.bf16 %v4932_v23, %v4931_v3  ;;  %v4935_v19 = vld [vmem:[#allocation4 + $0x19a] sm:$0xff] }
 0x5de   : > { %8465 = vmatprep.mubr.bf16.mxu1 %v5035_v14  ;;  %v5774_v55 = vadd.f32 %v7888_v62, %v10691_v5  ;;  %v4936_v14 = vld [vmem:[#allocation4 + $0x1a2] sm:$0xff] }
 0x5df   : > { %v10757_v43 = vadd.f32 %v7994_v25, %v5766_v45  ;;  %v5080_v52 = vpack.c.bf16 %v4936_v14, %v4935_v19 }
 0x5e0   : > { %v7889_v29 = vpop.f32.mrb[72].mxu1 }
 0x5e1   : > { %v7995_v0 = vpop.f32.mrb[100].mxu0  ;;  %v7890_v53 = vpop.f32.mrb[73].mxu1 }
 0x5e2   : > { %v7891_v11 = vadd.f32 %v7890_v53, %v7889_v29  ;;  %v7996_v16 = vpop.f32.mrb[101].mxu0  ;;  %v7892_v40 = vpop.f32.mrb[74].mxu1 }
 0x5e3   : > { %v7997_v8 = vadd.f32 %v7996_v16, %v7995_v0  ;;  %v7998_v13 = vpop.f32.mrb[102].mxu0  ;;  %v7893_v28 = vpop.f32.mrb[75].mxu1 }
 0x5e4   : > { %v7894_v10 = vadd.f32 %v7893_v28, %v7892_v40  ;;  %v7999_v63 = vpop.f32.mrb[103].mxu0  ;;  %v5779_v38 = vadd.f32 %v7891_v11, %v10691_v5 }
 0x5e5   : > { %v10761_v7 = vadd.f32 %v7997_v8, %v5771_v50  ;;  %v8000_v56 = vadd.f32 %v7999_v63, %v7998_v13  ;;  %8466 = vmatmul.mubr.bf16.gmra.mrb[180].mxu1 %v5044_v48 }
 0x5e6   : > { %8469 = vmatprep.mubr.bf16.mxu1 %v5053_v60  ;;  %v5782_v44 = vadd.f32 %v7894_v10, %v10691_v5 }
 0x5e7   : > { %v10763_v22 = vadd.f32 %v8000_v56, %v5774_v55 }
 0x5e8   : > { %v7895_v36 = vpop.f32.mrb[76].mxu1 }
 0x5e9   : > { %v8001_v2 = vpop.f32.mrb[104].mxu0  ;;  %v7896_v27 = vpop.f32.mrb[77].mxu1 }
 0x5ea   : > { %v7897_v39 = vadd.f32 %v7896_v27, %v7895_v36  ;;  %v8002_v30 = vpop.f32.mrb[105].mxu0  ;;  %v7898_v9 = vpop.f32.mrb[78].mxu1 }
 0x5eb   : > { %v8003_v24 = vadd.f32 %v8002_v30, %v8001_v2  ;;  %v8004_v12 = vpop.f32.mrb[106].mxu0  ;;  %v7899_v26 = vpop.f32.mrb[79].mxu1 }
 0x5ec   : > { %v7900_v31 = vadd.f32 %v7899_v26, %v7898_v9  ;;  %v8005_v4 = vpop.f32.mrb[107].mxu0  ;;  %v5787_v57 = vadd.f32 %v7897_v39, %v10691_v5 }
 0x5ed   : > { %v10767_v15 = vadd.f32 %v8003_v24, %v5779_v38  ;;  %v8006_v62 = vadd.f32 %v8005_v4, %v8004_v12  ;;  %8470 = vmatmul.mubr.bf16.gmra.mrb[184].mxu1 %v5062_v37 }
 0x5ee   : > { %8473 = vmatprep.mubr.bf16.mxu1 %v10712_v61  ;;  %v5790_v61 = vadd.f32 %v7900_v31, %v10691_v5 }
 0x5ef   : > { %v10770_v45 = vadd.f32 %v8006_v62, %v5782_v44 }
 0x5f0   : > { %v7901_v25 = vpop.f32.mrb[80].mxu1 }
 0x5f1   : > { %v8007_v29 = vpop.f32.mrb[108].mxu0  ;;  %v7902_v32 = vpop.f32.mrb[81].mxu1 }
 0x5f2   : > { %v7903_v0 = vadd.f32 %v7902_v32, %v7901_v25  ;;  %v8008_v53 = vpop.f32.mrb[109].mxu0  ;;  %v7904_v20 = vpop.f32.mrb[82].mxu1 }
 0x5f3   : > { %v8009_v11 = vadd.f32 %v8008_v53, %v8007_v29  ;;  %v8010_v16 = vpop.f32.mrb[110].mxu0  ;;  %v7905_v40 = vpop.f32.mrb[83].mxu1 }
 0x5f4   : > { %v7906_v50 = vadd.f32 %v7905_v40, %v7904_v20  ;;  %v8011_v8 = vpop.f32.mrb[111].mxu0  ;;  %v5795_v3 = vadd.f32 %v7903_v0, %v10691_v5 }
 0x5f5   : > { %v10774_v13 = vadd.f32 %v8009_v11, %v5787_v57  ;;  %v8012_v28 = vadd.f32 %v8011_v8, %v8010_v16  ;;  %8474 = vmatmul.mubr.bf16.gmra.mrb[188].mxu1 %v5080_v52 }
 0x5f6   : > { %v5798_v9 = vadd.f32 %v7906_v50, %v10691_v5 }
 0x5f7   : > { %v10776_v48 = vadd.f32 %v8012_v28, %v5790_v61 }
 0x5f8   : > { %v7907_v10 = vpop.f32.mrb[84].mxu1 }
 0x5f9   : > { %v8013_v63 = vpop.f32.mrb[112].mxu0  ;;  %v7908_v60 = vpop.f32.mrb[85].mxu1 }
 0x5fa   : > { %v7909_v55 = vadd.f32 %v7908_v60, %v7907_v10  ;;  %v8014_v56 = vpop.f32.mrb[113].mxu0  ;;  %v7910_v36 = vpop.f32.mrb[86].mxu1 }
 0x5fb   : > { %v8015_v23 = vadd.f32 %v8014_v56, %v8013_v63  ;;  %v8016_v2 = vpop.f32.mrb[114].mxu0  ;;  %v7911_v27 = vpop.f32.mrb[87].mxu1 }
 0x5fc   : > { %v7912_v39 = vadd.f32 %v7911_v27, %v7910_v36  ;;  %v8017_v30 = vpop.f32.mrb[115].mxu0  ;;  %v5803_v19 = vadd.f32 %v7909_v55, %v10691_v5 }
 0x5fd   : > { %v10780_v38 = vadd.f32 %v8015_v23, %v5795_v3  ;;  %v8018_v24 = vadd.f32 %v8017_v30, %v8016_v2 }
 0x5fe   : > { %v5806_v0 = vadd.f32 %v7912_v39, %v10691_v5 }
 0x5ff   : > { %v10782_v12 = vadd.f32 %v8018_v24, %v5798_v9 }
 0x600   : > { %v7913_v26 = vpop.f32.mrb[88].mxu1 }
 0x601   : > { %v8019_v37 = vpop.f32.mrb[116].mxu0  ;;  %v7914_v31 = vpop.f32.mrb[89].mxu1 }
 0x602   : > { %v7915_v4 = vadd.f32 %v7914_v31, %v7913_v26  ;;  %v8020_v44 = vpop.f32.mrb[117].mxu0  ;;  %v7916_v62 = vpop.f32.mrb[90].mxu1 }
 0x603   : > { %v8021_v14 = vadd.f32 %v8020_v44, %v8019_v37  ;;  %v8022_v25 = vpop.f32.mrb[118].mxu0  ;;  %v7917_v29 = vpop.f32.mrb[91].mxu1 }
 0x604   : > { %v7918_v32 = vadd.f32 %v7917_v29, %v7916_v62  ;;  %v8023_v52 = vpop.f32.mrb[119].mxu0  ;;  %v5811_v28 = vadd.f32 %v7915_v4, %v10691_v5 }
 0x605   : > { %v10786_v53 = vadd.f32 %v8021_v14, %v5803_v19  ;;  %v8024_v20 = vadd.f32 %v8023_v52, %v8022_v25 }
 0x606   : > { %v5814_v36 = vadd.f32 %v7918_v32, %v10691_v5 }
 0x607   : > { %v10788_v57 = vadd.f32 %v8024_v20, %v5806_v0 }
 0x608   : > { %v7919_v11 = vpop.f32.mrb[92].mxu1 }
 0x609   : > { %v8025_v16 = vpop.f32.mrb[120].mxu0  ;;  %v7920_v40 = vpop.f32.mrb[93].mxu1 }
 0x60a   : > { %v7921_v50 = vadd.f32 %v7920_v40, %v7919_v11  ;;  %v8026_v8 = vpop.f32.mrb[121].mxu0  ;;  %v7922_v61 = vpop.f32.mrb[94].mxu1 }
 0x60b   : > { %v8027_v10 = vadd.f32 %v8026_v8, %v8025_v16  ;;  %v8028_v63 = vpop.f32.mrb[122].mxu0  ;;  %v7923_v60 = vpop.f32.mrb[95].mxu1 }
 0x60c   : > { %v7924_v55 = vadd.f32 %v7923_v60, %v7922_v61  ;;  %v8029_v56 = vpop.f32.mrb[123].mxu0  ;;  %v5819_v37 = vadd.f32 %v7921_v50, %v10691_v5 }
 0x60d   : > { %v10792_v3 = vadd.f32 %v8027_v10, %v5811_v28  ;;  %v8030_v23 = vadd.f32 %v8029_v56, %v8028_v63 }
 0x60e   : > { %v5822_v25 = vadd.f32 %v7924_v55, %v10691_v5 }
 0x60f   : > { %v10794_v2 = vadd.f32 %v8030_v23, %v5814_v36 }
 0x610   : > { %v8053_v27 = vpop.f32.mrb[96].mxu1 }
 0x611   : > { %v8031_v39 = vpop.f32.mrb[124].mxu0  ;;  %v8054_v30 = vpop.f32.mrb[97].mxu1 }
 0x612   : > { %v8032_v9 = vpop.f32.mrb[125].mxu0  ;;  %v8055_v24 = vadd.f32 %v8054_v30, %v8053_v27  ;;  %v8056_v26 = vpop.f32.mrb[98].mxu1 }
 0x613   : > { %v8033_v31 = vadd.f32 %v8032_v9, %v8031_v39  ;;  %v8034_v4 = vpop.f32.mrb[126].mxu0  ;;  %v8057_v44 = vpop.f32.mrb[99].mxu1 }
 0x614   : > { %v6021_v62 = vadd.f32 %v8055_v24, %v10697_v21  ;;  %v8035_v19 = vpop.f32.mrb[127].mxu0  ;;  %v8058_v14 = vadd.f32 %v8057_v44, %v8056_v26 }
 0x615   : > { %v10799_v29 = vadd.f32 %v8033_v31, %v5819_v37  ;;  %v8036_v32 = vadd.f32 %v8035_v19, %v8034_v4 }
 0x616   : > { %v6024_v52 = vadd.f32 %v8058_v14, %v10701_v6 }
 0x617   : > { %v10802_v0 = vadd.f32 %v8036_v32, %v5822_v25 }
 0x618   : > { %v8059_v20 = vpop.f32.mrb[100].mxu1 }
 0x619   : > { %v8165_v11 = vpop.f32.mrb[128].mxu0  ;;  %v8060_v16 = vpop.f32.mrb[101].mxu1 }
 0x61a   : > { %v8061_v40 = vadd.f32 %v8060_v16, %v8059_v20  ;;  %v8166_v50 = vpop.f32.mrb[129].mxu0  ;;  %v8062_v8 = vpop.f32.mrb[102].mxu1 }
 0x61b   : > { %v8167_v61 = vadd.f32 %v8166_v50, %v8165_v11  ;;  %v8168_v28 = vpop.f32.mrb[130].mxu0  ;;  %v8063_v21 = vpop.f32.mrb[103].mxu1 }
 0x61c   : > { %v6029_v10 = vadd.f32 %v8061_v40, %v10705_v1  ;;  %v8064_v63 = vadd.f32 %v8063_v21, %v8062_v8  ;;  %v8169_v5 = vpop.f32.mrb[131].mxu0 }
 0x61d   : > { %v8170_v60 = vadd.f32 %v8169_v5, %v8168_v28  ;;  %v10805_v55 = vadd.f32 %v8167_v61, %v6021_v62 }
 0x61e   : > { %v6032_v6 = vadd.f32 %v8064_v63, %v10709_v41 }
 0x61f   : > { %v10808_v56 = vadd.f32 %v8170_v60, %v6024_v52 }
 0x620   : > { %v8065_v36 = vpop.f32.mrb[104].mxu1 }
 0x621   : > { %v8171_v23 = vpop.f32.mrb[132].mxu0  ;;  %v8066_v27 = vpop.f32.mrb[105].mxu1 }
 0x622   : > { %v8067_v39 = vadd.f32 %v8066_v27, %v8065_v36  ;;  %v8172_v30 = vpop.f32.mrb[133].mxu0  ;;  %v8068_v9 = vpop.f32.mrb[106].mxu1 }
 0x623   : > { %v8173_v24 = vadd.f32 %v8172_v30, %v8171_v23  ;;  %v8174_v26 = vpop.f32.mrb[134].mxu0  ;;  %v8069_v37 = vpop.f32.mrb[107].mxu1 }
 0x624   : > { %v6037_v1 = vadd.f32 %v8067_v39, %v10715_v42  ;;  %v8070_v31 = vadd.f32 %v8069_v37, %v8068_v9  ;;  %v8175_v4 = vpop.f32.mrb[135].mxu0 }
 0x625   : > { %v8176_v44 = vadd.f32 %v8175_v4, %v8174_v26  ;;  %v10811_v62 = vadd.f32 %v8173_v24, %v6029_v10 }
 0x626   : > { %v6040_v41 = vadd.f32 %v8070_v31, %v10719_v46 }
 0x627   : > { %v10814_v19 = vadd.f32 %v8176_v44, %v6032_v6 }
 0x628   : > { %v8071_v14 = vpop.f32.mrb[108].mxu1 }
 0x629   : > { %v8177_v25 = vpop.f32.mrb[136].mxu0  ;;  %v8072_v32 = vpop.f32.mrb[109].mxu1 }
 0x62a   : > { %v8073_v52 = vadd.f32 %v8072_v32, %v8071_v14  ;;  %v8178_v20 = vpop.f32.mrb[137].mxu0  ;;  %v8074_v11 = vpop.f32.mrb[110].mxu1 }
 0x62b   : > { %v8179_v16 = vadd.f32 %v8178_v20, %v8177_v25  ;;  %v8180_v40 = vpop.f32.mrb[138].mxu0  ;;  %v8075_v50 = vpop.f32.mrb[111].mxu1 }
 0x62c   : > { %v6045_v42 = vadd.f32 %v8073_v52, %v10723_v47  ;;  %v8076_v8 = vadd.f32 %v8075_v50, %v8074_v11  ;;  %v8181_v61 = vpop.f32.mrb[139].mxu0 }
 0x62d   : > { %v8182_v28 = vadd.f32 %v8181_v61, %v8180_v40  ;;  %v10817_v21 = vadd.f32 %v8179_v16, %v6037_v1 }
 0x62e   : > { %v6048_v46 = vadd.f32 %v8076_v8, %v10726_v54 }
 0x62f   : > { %v10820_v10 = vadd.f32 %v8182_v28, %v6040_v41 }
 0x630   : > { %v8077_v63 = vpop.f32.mrb[112].mxu1 }
 0x631   : > { %v8183_v5 = vpop.f32.mrb[140].mxu0  ;;  %v8078_v60 = vpop.f32.mrb[113].mxu1 }
 0x632   : > { %v8079_v6 = vadd.f32 %v8078_v60, %v8077_v63  ;;  %v8184_v36 = vpop.f32.mrb[141].mxu0  ;;  %v8080_v23 = vpop.f32.mrb[114].mxu1 }
 0x633   : > { %v8185_v27 = vadd.f32 %v8184_v36, %v8183_v5  ;;  %v8186_v39 = vpop.f32.mrb[142].mxu0  ;;  %v8081_v30 = vpop.f32.mrb[115].mxu1 }
 0x634   : > { %v6053_v47 = vadd.f32 %v8079_v6, %v10730_v59  ;;  %v8082_v9 = vadd.f32 %v8081_v30, %v8080_v23  ;;  %v8187_v24 = vpop.f32.mrb[143].mxu0 }
 0x635   : > { %v8188_v26 = vadd.f32 %v8187_v24, %v8186_v39  ;;  %v10823_v37 = vadd.f32 %v8185_v27, %v6045_v42 }
 0x636   : > { %v6056_v54 = vadd.f32 %v8082_v9, %v10733_v35 }
 0x637   : > { %v10826_v1 = vadd.f32 %v8188_v26, %v6048_v46 }
 0x638   : > { %v8083_v31 = vpop.f32.mrb[116].mxu1 }
 0x639   : > { %v8189_v4 = vpop.f32.mrb[144].mxu0  ;;  %v8084_v44 = vpop.f32.mrb[117].mxu1 }
 0x63a   : > { %v8085_v41 = vadd.f32 %v8084_v44, %v8083_v31  ;;  %v8190_v14 = vpop.f32.mrb[145].mxu0  ;;  %v8086_v25 = vpop.f32.mrb[118].mxu1 }
 0x63b   : > { %v8191_v32 = vadd.f32 %v8190_v14, %v8189_v4  ;;  %v8192_v52 = vpop.f32.mrb[146].mxu0  ;;  %v8087_v20 = vpop.f32.mrb[119].mxu1 }
 0x63c   : > { %v6061_v59 = vadd.f32 %v8085_v41, %v10737_v33  ;;  %v8088_v11 = vadd.f32 %v8087_v20, %v8086_v25  ;;  %v8193_v16 = vpop.f32.mrb[147].mxu0 }
 0x63d   : > { %v8194_v40 = vadd.f32 %v8193_v16, %v8192_v52  ;;  %v10829_v50 = vadd.f32 %v8191_v32, %v6053_v47 }
 0x63e   : > { %v6064_v35 = vadd.f32 %v8088_v11, %v10739_v58 }
 0x63f   : > { %v10832_v42 = vadd.f32 %v8194_v40, %v6056_v54 }
 0x640   : > { %v8089_v8 = vpop.f32.mrb[120].mxu1 }
 0x641   : > { %v8195_v61 = vpop.f32.mrb[148].mxu0  ;;  %v8090_v28 = vpop.f32.mrb[121].mxu1 }
 0x642   : > { %v8091_v46 = vadd.f32 %v8090_v28, %v8089_v8  ;;  %v8196_v63 = vpop.f32.mrb[149].mxu0  ;;  %v8092_v5 = vpop.f32.mrb[122].mxu1 }
 0x643   : > { %v8197_v60 = vadd.f32 %v8196_v63, %v8195_v61  ;;  %v8198_v6 = vpop.f32.mrb[150].mxu0  ;;  %v8093_v36 = vpop.f32.mrb[123].mxu1 }
 0x644   : > { %v6069_v33 = vadd.f32 %v8091_v46, %v10743_v51  ;;  %v8094_v23 = vadd.f32 %v8093_v36, %v8092_v5  ;;  %v8199_v27 = vpop.f32.mrb[151].mxu0 }
 0x645   : > { %v8200_v39 = vadd.f32 %v8199_v27, %v8198_v6  ;;  %v10835_v30 = vadd.f32 %v8197_v60, %v6061_v59 }
 0x646   : > { %v6072_v58 = vadd.f32 %v8094_v23, %v10745_v49 }
 0x647   : > { %v10838_v47 = vadd.f32 %v8200_v39, %v6064_v35 }
 0x648   : > { %v8095_v9 = vpop.f32.mrb[124].mxu1 }
 0x649   : > { %v8201_v24 = vpop.f32.mrb[152].mxu0  ;;  %v8096_v26 = vpop.f32.mrb[125].mxu1 }
 0x64a   : > { %v8097_v54 = vadd.f32 %v8096_v26, %v8095_v9  ;;  %v8202_v31 = vpop.f32.mrb[153].mxu0  ;;  %v8098_v4 = vpop.f32.mrb[126].mxu1 }
 0x64b   : > { %v8203_v44 = vadd.f32 %v8202_v31, %v8201_v24  ;;  %v8204_v41 = vpop.f32.mrb[154].mxu0  ;;  %v8099_v14 = vpop.f32.mrb[127].mxu1 }
 0x64c   : > { %v6077_v51 = vadd.f32 %v8097_v54, %v10749_v17  ;;  %v8100_v25 = vadd.f32 %v8099_v14, %v8098_v4  ;;  %v8205_v32 = vpop.f32.mrb[155].mxu0 }
 0x64d   : > { %v8206_v52 = vadd.f32 %v8205_v32, %v8204_v41  ;;  %v10841_v20 = vadd.f32 %v8203_v44, %v6069_v33 }
 0x64e   : > { %v6080_v49 = vadd.f32 %v8100_v25, %v10751_v18 }
 0x64f   : > { %v10844_v59 = vadd.f32 %v8206_v52, %v6072_v58 }
 0x650   : > { %v8101_v11 = vpop.f32.mrb[128].mxu1 }
 0x651   : > { %v8207_v16 = vpop.f32.mrb[156].mxu0  ;;  %v8102_v40 = vpop.f32.mrb[129].mxu1 }
 0x652   : > { %v8103_v35 = vadd.f32 %v8102_v40, %v8101_v11  ;;  %v8208_v8 = vpop.f32.mrb[157].mxu0  ;;  %v8104_v61 = vpop.f32.mrb[130].mxu1 }
 0x653   : > { %v8209_v28 = vadd.f32 %v8208_v8, %v8207_v16  ;;  %v8210_v46 = vpop.f32.mrb[158].mxu0  ;;  %v8105_v63 = vpop.f32.mrb[131].mxu1 }
 0x654   : > { %v6085_v17 = vadd.f32 %v8103_v35, %v10755_v34  ;;  %v8106_v5 = vadd.f32 %v8105_v63, %v8104_v61  ;;  %v8211_v60 = vpop.f32.mrb[159].mxu0 }
 0x655   : > { %v8212_v6 = vadd.f32 %v8211_v60, %v8210_v46  ;;  %v10847_v36 = vadd.f32 %v8209_v28, %v6077_v51 }
 0x656   : > { %v6088_v18 = vadd.f32 %v8106_v5, %v10757_v43 }
 0x657   : > { %v10850_v33 = vadd.f32 %v8212_v6, %v6080_v49 }
 0x658   : > { %v8107_v23 = vpop.f32.mrb[132].mxu1 }
 0x659   : > { %v8213_v27 = vpop.f32.mrb[160].mxu0  ;;  %v8108_v39 = vpop.f32.mrb[133].mxu1 }
 0x65a   : > { %v8109_v58 = vadd.f32 %v8108_v39, %v8107_v23  ;;  %v8214_v9 = vpop.f32.mrb[161].mxu0  ;;  %v8110_v24 = vpop.f32.mrb[134].mxu1 }
 0x65b   : > { %v8215_v26 = vadd.f32 %v8214_v9, %v8213_v27  ;;  %v8216_v54 = vpop.f32.mrb[162].mxu0  ;;  %v8111_v31 = vpop.f32.mrb[135].mxu1 }
 0x65c   : > { %v6093_v34 = vadd.f32 %v8109_v58, %v10761_v7  ;;  %v8112_v4 = vadd.f32 %v8111_v31, %v8110_v24  ;;  %v8217_v44 = vpop.f32.mrb[163].mxu0 }
 0x65d   : > { %v8218_v41 = vadd.f32 %v8217_v44, %v8216_v54  ;;  %v10853_v14 = vadd.f32 %v8215_v26, %v6085_v17 }
 0x65e   : > { %v6096_v43 = vadd.f32 %v8112_v4, %v10763_v22 }
 0x65f   : > { %v10856_v51 = vadd.f32 %v8218_v41, %v6088_v18 }
 0x660   : > { %v8113_v25 = vpop.f32.mrb[136].mxu1 }
 0x661   : > { %v8219_v32 = vpop.f32.mrb[164].mxu0  ;;  %v8114_v52 = vpop.f32.mrb[137].mxu1 }
 0x662   : > { %v8115_v49 = vadd.f32 %v8114_v52, %v8113_v25  ;;  %v8220_v11 = vpop.f32.mrb[165].mxu0  ;;  %v8116_v16 = vpop.f32.mrb[138].mxu1 }
 0x663   : > { %v8221_v40 = vadd.f32 %v8220_v11, %v8219_v32  ;;  %v8222_v35 = vpop.f32.mrb[166].mxu0  ;;  %v8117_v8 = vpop.f32.mrb[139].mxu1 }
 0x664   : > { %v6101_v7 = vadd.f32 %v8115_v49, %v10767_v15  ;;  %v8118_v61 = vadd.f32 %v8117_v8, %v8116_v16  ;;  %v8223_v28 = vpop.f32.mrb[167].mxu0 }
 0x665   : > { %v8224_v46 = vadd.f32 %v8223_v28, %v8222_v35  ;;  %v10859_v63 = vadd.f32 %v8221_v40, %v6093_v34 }
 0x666   : > { %v6104_v22 = vadd.f32 %v8118_v61, %v10770_v45 }
 0x667   : > { %v10862_v17 = vadd.f32 %v8224_v46, %v6096_v43 }
 0x668   : > { %v8119_v5 = vpop.f32.mrb[140].mxu1 }
 0x669   : > { %v8225_v60 = vpop.f32.mrb[168].mxu0  ;;  %v8120_v6 = vpop.f32.mrb[141].mxu1 }
 0x66a   : > { %v8121_v18 = vadd.f32 %v8120_v6, %v8119_v5  ;;  %v8226_v23 = vpop.f32.mrb[169].mxu0  ;;  %v8122_v27 = vpop.f32.mrb[142].mxu1 }
 0x66b   : > { %v8227_v39 = vadd.f32 %v8226_v23, %v8225_v60  ;;  %v8228_v58 = vpop.f32.mrb[170].mxu0  ;;  %v8123_v9 = vpop.f32.mrb[143].mxu1 }
 0x66c   : > { %v6109_v15 = vadd.f32 %v8121_v18, %v10774_v13  ;;  %v8124_v24 = vadd.f32 %v8123_v9, %v8122_v27  ;;  %v8229_v26 = vpop.f32.mrb[171].mxu0 }
 0x66d   : > { %v8230_v54 = vadd.f32 %v8229_v26, %v8228_v58  ;;  %v10865_v31 = vadd.f32 %v8227_v39, %v6101_v7 }
 0x66e   : > { %v6112_v45 = vadd.f32 %v8124_v24, %v10776_v48 }
 0x66f   : > { %v10868_v34 = vadd.f32 %v8230_v54, %v6104_v22 }
 0x670   : > { %v8125_v4 = vpop.f32.mrb[144].mxu1 }
 0x671   : > { %v8231_v44 = vpop.f32.mrb[172].mxu0  ;;  %v8126_v41 = vpop.f32.mrb[145].mxu1 }
 0x672   : > { %v8127_v43 = vadd.f32 %v8126_v41, %v8125_v4  ;;  %v8232_v25 = vpop.f32.mrb[173].mxu0  ;;  %v8128_v32 = vpop.f32.mrb[146].mxu1 }
 0x673   : > { %v8233_v52 = vadd.f32 %v8232_v25, %v8231_v44  ;;  %v8234_v49 = vpop.f32.mrb[174].mxu0  ;;  %v8129_v11 = vpop.f32.mrb[147].mxu1 }
 0x674   : > { %v6117_v13 = vadd.f32 %v8127_v43, %v10780_v38  ;;  %v8130_v16 = vadd.f32 %v8129_v11, %v8128_v32  ;;  %v8235_v40 = vpop.f32.mrb[175].mxu0 }
 0x675   : > { %v8236_v35 = vadd.f32 %v8235_v40, %v8234_v49  ;;  %v10871_v8 = vadd.f32 %v8233_v52, %v6109_v15 }
 0x676   : > { %v6120_v48 = vadd.f32 %v8130_v16, %v10782_v12 }
 0x677   : > { %v10874_v7 = vadd.f32 %v8236_v35, %v6112_v45 }
 0x678   : > { %v8131_v61 = vpop.f32.mrb[148].mxu1 }
 0x679   : > { %v8237_v28 = vpop.f32.mrb[176].mxu0  ;;  %v8132_v46 = vpop.f32.mrb[149].mxu1 }
 0x67a   : > { %v8133_v22 = vadd.f32 %v8132_v46, %v8131_v61  ;;  %v8238_v5 = vpop.f32.mrb[177].mxu0  ;;  %v8134_v60 = vpop.f32.mrb[150].mxu1 }
 0x67b   : > { %v8239_v6 = vadd.f32 %v8238_v5, %v8237_v28  ;;  %v8240_v18 = vpop.f32.mrb[178].mxu0  ;;  %v8135_v23 = vpop.f32.mrb[151].mxu1 }
 0x67c   : > { %v6125_v38 = vadd.f32 %v8133_v22, %v10786_v53  ;;  %v8136_v27 = vadd.f32 %v8135_v23, %v8134_v60  ;;  %v8241_v39 = vpop.f32.mrb[179].mxu0 }
 0x67d   : > { %v8242_v58 = vadd.f32 %v8241_v39, %v8240_v18  ;;  %v10877_v9 = vadd.f32 %v8239_v6, %v6117_v13 }
 0x67e   : > { %v6128_v12 = vadd.f32 %v8136_v27, %v10788_v57 }
 0x67f   : > { %v10880_v15 = vadd.f32 %v8242_v58, %v6120_v48 }
 0x680   : > { %v8137_v24 = vpop.f32.mrb[152].mxu1 }
 0x681   : > { %v8243_v26 = vpop.f32.mrb[180].mxu0  ;;  %v8138_v54 = vpop.f32.mrb[153].mxu1 }
 0x682   : > { %v8139_v45 = vadd.f32 %v8138_v54, %v8137_v24  ;;  %v8244_v4 = vpop.f32.mrb[181].mxu0  ;;  %v8140_v44 = vpop.f32.mrb[154].mxu1 }
 0x683   : > { %v8245_v41 = vadd.f32 %v8244_v4, %v8243_v26  ;;  %v8246_v43 = vpop.f32.mrb[182].mxu0  ;;  %v8141_v25 = vpop.f32.mrb[155].mxu1 }
 0x684   : > { %v6133_v53 = vadd.f32 %v8139_v45, %v10792_v3  ;;  %v8142_v32 = vadd.f32 %v8141_v25, %v8140_v44  ;;  %v8247_v52 = vpop.f32.mrb[183].mxu0 }
 0x685   : > { %v8248_v49 = vadd.f32 %v8247_v52, %v8246_v43  ;;  %v10883_v11 = vadd.f32 %v8245_v41, %v6125_v38 }
 0x686   : > { %v6136_v57 = vadd.f32 %v8142_v32, %v10794_v2 }
 0x687   : > { %v10886_v13 = vadd.f32 %v8248_v49, %v6128_v12 }
 0x688   : > { %v8143_v16 = vpop.f32.mrb[156].mxu1 }
 0x689   : > { %v8249_v40 = vpop.f32.mrb[184].mxu0  ;;  %v8144_v35 = vpop.f32.mrb[157].mxu1 }
 0x68a   : > { %v8145_v48 = vadd.f32 %v8144_v35, %v8143_v16  ;;  %v8250_v61 = vpop.f32.mrb[185].mxu0  ;;  %v8146_v28 = vpop.f32.mrb[158].mxu1 }
 0x68b   : > { %v8251_v46 = vadd.f32 %v8250_v61, %v8249_v40  ;;  %v8252_v22 = vpop.f32.mrb[186].mxu0  ;;  %v8147_v5 = vpop.f32.mrb[159].mxu1 }
 0x68c   : > { %v6141_v3 = vadd.f32 %v8145_v48, %v10799_v29  ;;  %v8148_v60 = vadd.f32 %v8147_v5, %v8146_v28  ;;  %v8253_v6 = vpop.f32.mrb[187].mxu0 }
 0x68d   : > { %v8254_v18 = vadd.f32 %v8253_v6, %v8252_v22  ;;  %v10889_v23 = vadd.f32 %v8251_v46, %v6133_v53 }
 0x68e   : > { %v6144_v2 = vadd.f32 %v8148_v60, %v10802_v0 }
 0x68f   : > { %v10893_v38 = vadd.f32 %v8254_v18, %v6136_v57 }
 0x690   : > { %v8447_v27 = vpop.f32.mrb[160].mxu1 }
 0x691   : > { %v8255_v39 = vpop.f32.mrb[188].mxu0  ;;  %v6351_v58 = vadd.f32 %v8447_v27, %v10811_v62  ;;  %v6342_v12 = vpop.f32.mrb[161].mxu1 }
 0x692   : > { %v8256_v29 = vpop.f32.mrb[189].mxu0  ;;  %v6343_v24 = vadd.f32 %v6342_v12, %v10805_v55  ;;  %v8448_v0 = vpop.f32.mrb[162].mxu1 }
 0x693   : > { %v6471_v26 = vmax.f32 %v6351_v58, 0.0  ;;  %v8257_v54 = vadd.f32 %v8256_v29, %v8255_v39  ;;  %v8258_v45 = vpop.f32.mrb[190].mxu0  ;;  %v6354_v4 = vadd.f32 %v8448_v0, %v10814_v19  ;;  %v6345_v62 = vpop.f32.mrb[163].mxu1 }
 0x694   : > { %v6469_v44 = vmax.f32 %v6343_v24, 0.0  ;;  %v8259_v41 = vpop.f32.mrb[191].mxu0  ;;  %v6346_v43 = vadd.f32 %v6345_v62, %v10808_v56 }
 0x695   : > { %6503 = vst [vmem:[%s10899_s19 + $0x10] sm:$0xff] %v6471_v26  ;;  %v6472_v25 = vmax.f32 %v6354_v4, 0.0  ;;  %v8260_v53 = vadd.f32 %v8259_v41, %v8258_v45  ;;  %v10905_v32 = vadd.f32 %v8257_v54, %v6141_v3 }
 0x696   : > { %6501 = vst [vmem:[%s10899_s19] sm:$0xff] %v6469_v44  ;;  %v6470_v55 = vmax.f32 %v6346_v43, 0.0 }
 0x697   : > { %6504 = vst [vmem:[%s10899_s19 + $0x18] sm:$0xff] %v6472_v25  ;;  %v10909_v52 = vadd.f32 %v8260_v53, %v6144_v2 }
 0x698   : > { %6502 = vst [vmem:[%s10899_s19 + $0x8] sm:$0xff] %v6470_v55  ;;  %v8451_v19 = vpop.f32.mrb[164].mxu1 }
 0x699   : > { %v6367_v49 = vadd.f32 %v8451_v19, %v10823_v37  ;;  %v6358_v57 = vpop.f32.mrb[165].mxu1 }
 0x69a   : > { %v6359_v56 = vadd.f32 %v6358_v57, %v10817_v21  ;;  %v8452_v16 = vpop.f32.mrb[166].mxu1 }
 0x69b   : > { %v6475_v40 = vmax.f32 %v6367_v49, 0.0  ;;  %v6370_v35 = vadd.f32 %v8452_v16, %v10826_v1  ;;  %v6361_v48 = vpop.f32.mrb[167].mxu1 }
 0x69c   : > { %v6473_v61 = vmax.f32 %v6359_v56, 0.0  ;;  %v6362_v28 = vadd.f32 %v6361_v48, %v10820_v10 }
 0x69d   : > { %6507 = vst [vmem:[%s10899_s19 + $0x30] sm:$0xff] %v6475_v40  ;;  %v6476_v46 = vmax.f32 %v6370_v35, 0.0 }
 0x69e   : > { %6505 = vst [vmem:[%s10899_s19 + $0x20] sm:$0xff] %v6473_v61  ;;  %v6474_v22 = vmax.f32 %v6362_v28, 0.0 }
 0x69f   : > { %6508 = vst [vmem:[%s10899_s19 + $0x38] sm:$0xff] %v6476_v46 }
 0x6a0   : > { %6506 = vst [vmem:[%s10899_s19 + $0x28] sm:$0xff] %v6474_v22  ;;  %v8455_v37 = vpop.f32.mrb[168].mxu1 }
 0x6a1   : > { %v6383_v21 = vadd.f32 %v8455_v37, %v10835_v30  ;;  %v6374_v5 = vpop.f32.mrb[169].mxu1 }
 0x6a2   : > { %v6375_v1 = vadd.f32 %v6374_v5, %v10829_v50  ;;  %v8456_v3 = vpop.f32.mrb[170].mxu1 }
 0x6a3   : > { %v6479_v60 = vmax.f32 %v6383_v21, 0.0  ;;  %v6386_v10 = vadd.f32 %v8456_v3, %v10838_v47  ;;  %v6377_v6 = vpop.f32.mrb[171].mxu1 }
 0x6a4   : > { %v6477_v18 = vmax.f32 %v6375_v1, 0.0  ;;  %v6378_v2 = vadd.f32 %v6377_v6, %v10832_v42 }
 0x6a5   : > { %6511 = vst [vmem:[%s10899_s19 + $0x50] sm:$0xff] %v6479_v60  ;;  %v6480_v27 = vmax.f32 %v6386_v10, 0.0 }
 0x6a6   : > { %6509 = vst [vmem:[%s10899_s19 + $0x40] sm:$0xff] %v6477_v18  ;;  %v6478_v39 = vmax.f32 %v6378_v2, 0.0 }
 0x6a7   : > { %6512 = vst [vmem:[%s10899_s19 + $0x58] sm:$0xff] %v6480_v27 }
 0x6a8   : > { %6510 = vst [vmem:[%s10899_s19 + $0x48] sm:$0xff] %v6478_v39  ;;  %v8459_v30 = vpop.f32.mrb[172].mxu1 }
 0x6a9   : > { %v6399_v50 = vadd.f32 %v8459_v30, %v10847_v36  ;;  %v6390_v58 = vpop.f32.mrb[173].mxu1 }
 0x6aa   : > { %v6391_v47 = vadd.f32 %v6390_v58, %v10841_v20  ;;  %v8460_v12 = vpop.f32.mrb[174].mxu1 }
 0x6ab   : > { %v6483_v29 = vmax.f32 %v6399_v50, 0.0  ;;  %v6402_v42 = vadd.f32 %v8460_v12, %v10850_v33  ;;  %v6393_v24 = vpop.f32.mrb[175].mxu1 }
 0x6ac   : > { %v6481_v0 = vmax.f32 %v6391_v47, 0.0  ;;  %v6394_v26 = vadd.f32 %v6393_v24, %v10844_v59 }
 0x6ad   : > { %6515 = vst [vmem:[%s10899_s19 + $0x70] sm:$0xff] %v6483_v29  ;;  %v6484_v54 = vmax.f32 %v6402_v42, 0.0 }
 0x6ae   : > { %6513 = vst [vmem:[%s10899_s19 + $0x60] sm:$0xff] %v6481_v0  ;;  %v6482_v45 = vmax.f32 %v6394_v26, 0.0 }
 0x6af   : > { %6516 = vst [vmem:[%s10899_s19 + $0x78] sm:$0xff] %v6484_v54 }
 0x6b0   : > { %6514 = vst [vmem:[%s10899_s19 + $0x68] sm:$0xff] %v6482_v45  ;;  %v8463_v36 = vpop.f32.mrb[176].mxu1 }
 0x6b1   : > { %v6415_v20 = vadd.f32 %v8463_v36, %v10859_v63  ;;  %v6406_v4 = vpop.f32.mrb[177].mxu1 }
 0x6b2   : > { %v6407_v33 = vadd.f32 %v6406_v4, %v10853_v14  ;;  %v8464_v62 = vpop.f32.mrb[178].mxu1 }
 0x6b3   : > { %v6487_v44 = vmax.f32 %v6415_v20, 0.0  ;;  %v6418_v59 = vadd.f32 %v8464_v62, %v10862_v17  ;;  %v6409_v41 = vpop.f32.mrb[179].mxu1 }
 0x6b4   : > { %v6485_v43 = vmax.f32 %v6407_v33, 0.0  ;;  %v6410_v25 = vadd.f32 %v6409_v41, %v10856_v51 }
 0x6b5   : > { %6519 = vst [vmem:[%s10899_s19 + $0x90] sm:$0xff] %v6487_v44  ;;  %v6488_v53 = vmax.f32 %v6418_v59, 0.0 }
 0x6b6   : > { %6517 = vst [vmem:[%s10899_s19 + $0x80] sm:$0xff] %v6485_v43  ;;  %v6486_v55 = vmax.f32 %v6410_v25, 0.0 }
 0x6b7   : > { %6520 = vst [vmem:[%s10899_s19 + $0x98] sm:$0xff] %v6488_v53 }
 0x6b8   : > { %6518 = vst [vmem:[%s10899_s19 + $0x88] sm:$0xff] %v6486_v55  ;;  %v8467_v63 = vpop.f32.mrb[180].mxu1 }
 0x6b9   : > { %v6431_v14 = vadd.f32 %v8467_v63, %v10871_v8  ;;  %v6422_v19 = vpop.f32.mrb[181].mxu1 }
 0x6ba   : > { %v6423_v17 = vadd.f32 %v6422_v19, %v10865_v31  ;;  %v8468_v49 = vpop.f32.mrb[182].mxu1 }
 0x6bb   : > { %v6491_v57 = vmax.f32 %v6431_v14, 0.0  ;;  %v6434_v51 = vadd.f32 %v8468_v49, %v10874_v7  ;;  %v6425_v56 = vpop.f32.mrb[183].mxu1 }
 0x6bc   : > { %v6489_v16 = vmax.f32 %v6423_v17, 0.0  ;;  %v6426_v40 = vadd.f32 %v6425_v56, %v10868_v34 }
 0x6bd   : > { %6523 = vst [vmem:[%s10899_s19 + $0xb0] sm:$0xff] %v6491_v57  ;;  %v6492_v35 = vmax.f32 %v6434_v51, 0.0 }
 0x6be   : > { %6521 = vst [vmem:[%s10899_s19 + $0xa0] sm:$0xff] %v6489_v16  ;;  %v6490_v48 = vmax.f32 %v6426_v40, 0.0 }
 0x6bf   : > { %6524 = vst [vmem:[%s10899_s19 + $0xb8] sm:$0xff] %v6492_v35 }
 0x6c0   : > { %6522 = vst [vmem:[%s10899_s19 + $0xa8] sm:$0xff] %v6490_v48  ;;  %v8471_v8 = vpop.f32.mrb[184].mxu1 }
 0x6c1   : > { %v6447_v31 = vadd.f32 %v8471_v8, %v10883_v11  ;;  %v6438_v61 = vpop.f32.mrb[185].mxu1 }
 0x6c2   : > { %v6439_v7 = vadd.f32 %v6438_v61, %v10877_v9  ;;  %v8472_v28 = vpop.f32.mrb[186].mxu1 }
 0x6c3   : > { %v6495_v46 = vmax.f32 %v6447_v31, 0.0  ;;  %v6450_v34 = vadd.f32 %v8472_v28, %v10886_v13  ;;  %v6441_v22 = vpop.f32.mrb[187].mxu1 }
 0x6c4   : > { %v6493_v37 = vmax.f32 %v6439_v7, 0.0  ;;  %v6442_v21 = vadd.f32 %v6441_v22, %v10880_v15 }
 0x6c5   : > { %6527 = vst [vmem:[%s10899_s19 + $0xd0] sm:$0xff] %v6495_v46  ;;  %v6496_v5 = vmax.f32 %v6450_v34, 0.0 }
 0x6c6   : > { %6525 = vst [vmem:[%s10899_s19 + $0xc0] sm:$0xff] %v6493_v37  ;;  %v6494_v1 = vmax.f32 %v6442_v21, 0.0 }
 0x6c7   : > { %6528 = vst [vmem:[%s10899_s19 + $0xd8] sm:$0xff] %v6496_v5 }
 0x6c8   : > { %6526 = vst [vmem:[%s10899_s19 + $0xc8] sm:$0xff] %v6494_v1  ;;  %v8475_v11 = vpop.f32.mrb[188].mxu1 }
 0x6c9   : > { %v6463_v9 = vadd.f32 %v8475_v11, %v10905_v32  ;;  %v6454_v3 = vpop.f32.mrb[189].mxu1 }
 0x6ca   : > { %v6455_v13 = vadd.f32 %v6454_v3, %v10889_v23  ;;  %v8476_v60 = vpop.f32.mrb[190].mxu1 }
 0x6cb   : > { %v6499_v10 = vmax.f32 %v6463_v9, 0.0  ;;  %v6466_v15 = vadd.f32 %v8476_v60, %v10909_v52  ;;  %v6457_v6 = vpop.f32.mrb[191].mxu1 }
 0x6cc   : > { %v6497_v18 = vmax.f32 %v6455_v13, 0.0  ;;  %v6458_v2 = vadd.f32 %v6457_v6, %v10893_v38 }
 0x6cd   : > { %6531 = vst [vmem:[%s10899_s19 + $0xf0] sm:$0xff] %v6499_v10  ;;  %v6500_v27 = vmax.f32 %v6466_v15, 0.0 }
 0x6ce   : > { %6529 = vst [vmem:[%s10899_s19 + $0xe0] sm:$0xff] %v6497_v18  ;;  %v6498_v39 = vmax.f32 %v6458_v2, 0.0 }
 0x6cf   : > { %6532 = vst [vmem:[%s10899_s19 + $0xf8] sm:$0xff] %v6500_v27 }
 0x6d0   : > { %6530 = vst [vmem:[%s10899_s19 + $0xe8] sm:$0xff] %v6498_v39 }
 0x6d1 PF: > { %s19_s30 = sadd.s32 1, %s8735_s30  }
 0x6d2   : > { %p16_p4 = scmp.ge.s32.totalorder %s19_s30, 4  }
 0x6d4   :  { %18 = sbr.rel (!%p16_p4) target bundleno = 1 (0x1), region = 95 }

</bundles_post_ra>
